<compile_context>
chip_gen: v7x
topology: tpu7x:2x2x1
jax: 0.10.0
libtpu: 0.0.40
codegen_flags: <defaults>
</compile_context>

<pallas_src>
import math

import numpy as np
import jax
import jax.numpy as jnp
from jax import lax
from jax.experimental import pallas as pl
from jax.experimental.pallas import tpu as pltpu


# ----------------------------------------------------------------------------
# Fused Pallas kernel: stem conv -> backbone conv -> pool -> linear head
# ----------------------------------------------------------------------------
def fused_clf_forward_kernel(x_ref, ws_ref, bs_ref, wb_ref, bbias_ref, sel_ref,
                             wh_ref, bh_ref, o_ref, stem_scr):
    n, hp, wp, cin = x_ref.shape          # padded input (n, h+2, w+2, cin)
    h, w = hp - 2, wp - 2
    cstem = ws_ref.shape[1]
    cbb = wb_ref.shape[1]
    m = n * h * w

    # ---- clf_stem: Conv2d(cin->cstem, k3, s1, p1) + BN(eval, identity) + ReLU ----
    # 3x3 conv as a sum of 9 shifted matmuls; f32 accumulation, bf16 MXU operands.
    acc1 = jnp.zeros((m, cstem), jnp.float32)
    for k in range(9):
        di, dj = divmod(k, 3)
        patch = x_ref[:, di:di + h, dj:dj + w, :]                     # (n, h, w, cin)
        p2 = patch.reshape(m, cin).astype(jnp.bfloat16)
        wk = ws_ref[k * cin:(k + 1) * cin, :].astype(jnp.bfloat16)    # (cin, cstem)
        acc1 = acc1 + jnp.dot(p2, wk, preferred_element_type=jnp.float32)
    stem = jnp.maximum(acc1 + bs_ref[...], 0.0)                       # (m, cstem) f32

    # ---- re-pad the stem activation inside VMEM (zero border) for the next conv ----
    stem_scr[...] = jnp.zeros_like(stem_scr)
    stem_scr[:, 1:h + 1, 1:w + 1, :] = stem.reshape(n, h, w, cstem)

    # ---- backbone: Conv2d(cstem->cbb, k3, s2, p1) + ReLU ----
    # Computed at stride 1; the stride-2 subsampling is folded into sel_ref below
    # (subsample(conv_s1) == conv_s2, and bias/ReLU commute with subsampling).
    # TODO(synk): at production resolutions, extract the stride-2 phases instead of
    #             computing the full stride-1 map (4x extra MXU flops, negligible here).
    acc2 = jnp.zeros((m, cbb), jnp.float32)
    for k in range(9):
        di, dj = divmod(k, 3)
        patch = stem_scr[:, di:di + h, dj:dj + w, :]                  # (n, h, w, cstem)
        p2 = patch.reshape(m, cstem).astype(jnp.bfloat16)
        wk = wb_ref[k * cstem:(k + 1) * cstem, :].astype(jnp.bfloat16)
        acc2 = acc2 + jnp.dot(p2, wk, preferred_element_type=jnp.float32)
    bb_feats = jnp.maximum(acc2 + bbias_ref[...], 0.0)                # (m, cbb) f32

    # ---- clf_head: stride-2 selection + AdaptiveAvgPool2d(1) as one MXU matmul,
    #      then Linear(cbb -> num_classes) ----
    pooled = jnp.dot(sel_ref[...], bb_feats, preferred_element_type=jnp.float32)   # (n, cbb)
    logits = jnp.dot(pooled, wh_ref[...], preferred_element_type=jnp.float32) + bh_ref[...]
    o_ref[...] = logits.astype(o_ref.dtype)


# ----------------------------------------------------------------------------
# Constant selection/averaging matrix: picks the stride-2 positions of the
# stride-1 backbone map and averages them (== AvgPool2d(1) of the stride-2 conv).
# ----------------------------------------------------------------------------
def _pool_select_matrix(n, h, w, stride):
    ho, wo = h // stride, w // stride
    sel = np.zeros((n, n * h * w), np.float32)
    oi, oj = np.meshgrid(np.arange(ho), np.arange(wo), indexing="ij")
    flat = (oi * stride) * w + (oj * stride)
    for b in range(n):
        sel[b, b * h * w + flat.ravel()] = 1.0 / (ho * wo)
    return jnp.asarray(sel)


# ----------------------------------------------------------------------------
# Wrapper: layout plumbing (NCHW -> NHWC, zero pad, weight re-layout) + 1 pallas_call
# ----------------------------------------------------------------------------
@jax.jit
def sk_child_net_clf_forward(images_nchw, params):
    x = jnp.transpose(images_nchw, (0, 2, 3, 1)).astype(jnp.float32)   # NCHW -> NHWC
    n, h, w, cin = x.shape
    x_pad = jnp.pad(x, ((0, 0), (1, 1), (1, 1), (0, 0)))               # (n, h+2, w+2, cin)

    stem_w, stem_b = params["stem_w"], params["stem_b"]
    bb_w, bb_b = params["bb_w"], params["bb_b"]
    head_w, head_b = params["head_w"], params["head_b"]

    cstem = stem_w.shape[0]
    cbb = bb_w.shape[0]
    ncls = head_w.shape[1]

    # PyTorch conv weight (O, I, KH, KW) -> tap-major (KH*KW*I, O), matching kernel order.
    ws = jnp.transpose(stem_w, (2, 3, 1, 0)).reshape(9 * cin, cstem)
    wb = jnp.transpose(bb_w, (2, 3, 1, 0)).reshape(9 * cstem, cbb)
    sel = _pool_select_matrix(n, h, w, stride=2)                       # (n, n*h*w)

    grid_spec = pltpu.PrefetchScalarGridSpec(
        num_scalar_prefetch=0,
        grid=(1,),
        in_specs=[
            pl.BlockSpec((n, h + 2, w + 2, cin), lambda i: (0, 0, 0, 0)),
            pl.BlockSpec((9 * cin, cstem), lambda i: (0, 0)),
            pl.BlockSpec((1, cstem), lambda i: (0, 0)),
            pl.BlockSpec((9 * cstem, cbb), lambda i: (0, 0)),
            pl.BlockSpec((1, cbb), lambda i: (0, 0)),
            pl.BlockSpec((n, n * h * w), lambda i: (0, 0)),
            pl.BlockSpec((cbb, ncls), lambda i: (0, 0)),
            pl.BlockSpec((1, ncls), lambda i: (0, 0)),
        ],
        out_specs=pl.BlockSpec((n, ncls), lambda i: (0, 0)),
        scratch_shapes=[pltpu.VMEM((n, h + 2, w + 2, cstem), jnp.float32)],
    )
    logits = pl.pallas_call(
        fused_clf_forward_kernel,
        out_shape=jax.ShapeDtypeStruct((n, ncls), jnp.float32),
        grid_spec=grid_spec,
        compiler_params=pltpu.CompilerParams(dimension_semantics=("arbitrary",)),
    )(x_pad, ws, stem_b.reshape(1, cstem), wb, bb_b.reshape(1, cbb), sel,
      head_w, head_b.reshape(1, ncls))
    return {"outputs": logits}


# ----------------------------------------------------------------------------
# Deterministic parameter init (mirrors init_weights: kaiming + zero bias;
# BatchNorm2d weight=1/bias=0 with fresh running stats => identity in eval)
# ----------------------------------------------------------------------------
def kaiming_normal_conv(key, o, i, kh, kw):
    fan_in = i * kh * kw
    std = math.sqrt(2.0 / fan_in)
    return jax.random.normal(key, (o, i, kh, kw), jnp.float32) * std


def kaiming_uniform_linear(key, in_f, out_f):
    bound = math.sqrt(6.0 / in_f)
    return jax.random.uniform(key, (in_f, out_f), jnp.float32, -bound, bound)


def make_params(key, in_ch=3, stem_ch=8, backbone_out=32, num_classes=10):
    k1, k2, k3 = jax.random.split(key, 3)
    return {
        "stem_w": kaiming_normal_conv(k1, stem_ch, in_ch, 3, 3),
        "stem_b": jnp.zeros((stem_ch,), jnp.float32),
        "bb_w": kaiming_normal_conv(k2, backbone_out, stem_ch, 3, 3),
        "bb_b": jnp.zeros((backbone_out,), jnp.float32),
        "head_w": kaiming_uniform_linear(k3, backbone_out, num_classes),
        "head_b": jnp.zeros((num_classes,), jnp.float32),
    }


# ----------------------------------------------------------------------------
# Pure-JAX (XLA) reference of the same forward, for a numerical sanity check
# ----------------------------------------------------------------------------
def reference_forward(images_nchw, params):
    x = jnp.transpose(images_nchw, (0, 2, 3, 1)).astype(jnp.float32)
    dn = ("NHWC", "HWIO", "NHWC")
    ws = jnp.transpose(params["stem_w"], (2, 3, 1, 0))
    stem = lax.conv_general_dilated(x, ws, (1, 1), ((1, 1), (1, 1)), dimension_numbers=dn)
    stem = jnp.maximum(stem + params["stem_b"], 0.0)
    wb = jnp.transpose(params["bb_w"], (2, 3, 1, 0))
    bb = lax.conv_general_dilated(stem, wb, (2, 2), ((1, 1), (1, 1)), dimension_numbers=dn)
    bb = jnp.maximum(bb + params["bb_b"], 0.0)
    pooled = jnp.mean(bb, axis=(1, 2))
    return pooled @ params["head_w"] + params["head_b"]


if __name__ == "__main__":
    key = jax.random.PRNGKey(0)
    k_img, k_par = jax.random.split(key)
    images = jax.random.normal(k_img, (2, 3, 16, 16), jnp.float32)   # NCHW like PyTorch
    params = make_params(k_par)

    out = sk_child_net_clf_forward(images, params)
    logits = jax.block_until_ready(out["outputs"])

    assert logits.shape == (2, 10)
    assert bool(jnp.all(jnp.isfinite(logits)))

    # Loose tolerance: kernel uses bf16 MXU operands with f32 accumulation.
    ref = reference_forward(images, params)
    max_err = float(jnp.max(jnp.abs(logits - ref)))
    assert max_err < 5e-2, f"max abs error vs reference: {max_err}"

    print("KERNEL_OK")
</pallas_src>

<mosaic_0001>
module attributes {stable_mosaic.version = 11 : i64} {
  func.func @fused_clf_forward_kernel(%arg0: i32, %arg1: memref<2x18x18x3xf32, #tpu.memory_space<vmem>>, %arg2: memref<27x8xf32, #tpu.memory_space<vmem>>, %arg3: memref<1x8xf32, #tpu.memory_space<vmem>>, %arg4: memref<72x32xf32, #tpu.memory_space<vmem>>, %arg5: memref<1x32xf32, #tpu.memory_space<vmem>>, %arg6: memref<2x512xf32, #tpu.memory_space<vmem>>, %arg7: memref<32x10xf32, #tpu.memory_space<vmem>>, %arg8: memref<1x10xf32, #tpu.memory_space<vmem>>, %arg9: memref<2x10xf32, #tpu.memory_space<vmem>>, %arg10: memref<2x18x18x8xf32, #tpu.memory_space<vmem>>) attributes {dimension_semantics = [#tpu.dimension_semantics<arbitrary>], iteration_bounds = array<i64: 1>, scalar_prefetch = 0 : i64, scratch_operands = 1 : i64, tpu.core_type = #tpu.core_type<tc>, window_params = [{pipeline_mode = #tpu.pipeline_mode<synchronous>, transform_indices = @transform_0, window_bounds = array<i64: 2, 18, 18, 3>}, {pipeline_mode = #tpu.pipeline_mode<synchronous>, transform_indices = @transform_1, window_bounds = array<i64: 27, 8>}, {pipeline_mode = #tpu.pipeline_mode<synchronous>, transform_indices = @transform_2, window_bounds = array<i64: 1, 8>}, {pipeline_mode = #tpu.pipeline_mode<synchronous>, transform_indices = @transform_3, window_bounds = array<i64: 72, 32>}, {pipeline_mode = #tpu.pipeline_mode<synchronous>, transform_indices = @transform_4, window_bounds = array<i64: 1, 32>}, {pipeline_mode = #tpu.pipeline_mode<synchronous>, transform_indices = @transform_5, window_bounds = array<i64: 2, 512>}, {pipeline_mode = #tpu.pipeline_mode<synchronous>, transform_indices = @transform_6, window_bounds = array<i64: 32, 10>}, {pipeline_mode = #tpu.pipeline_mode<synchronous>, transform_indices = @transform_7, window_bounds = array<i64: 1, 10>}, {pipeline_mode = #tpu.pipeline_mode<synchronous>, transform_indices = @transform_8, window_bounds = array<i64: 2, 10>}]} {
    %cst = arith.constant 0.000000e+00 : f32
    %0 = vector.broadcast %cst : f32 to vector<512x8xf32>
    %c0 = arith.constant 0 : index
    %c0_0 = arith.constant 0 : index
    %c0_1 = arith.constant 0 : index
    %c0_2 = arith.constant 0 : index
    %1 = vector.load %arg1[%c0, %c0_0, %c0_1, %c0_2] : memref<2x18x18x3xf32, #tpu.memory_space<vmem>>, vector<2x16x16x3xf32>
    %2 = vector.shape_cast %1 : vector<2x16x16x3xf32> to vector<512x3xf32>
    %3 = arith.truncf %2 : vector<512x3xf32> to vector<512x3xbf16>
    %c0_3 = arith.constant 0 : index
    %c0_4 = arith.constant 0 : index
    %4 = vector.load %arg2[%c0_3, %c0_4] : memref<27x8xf32, #tpu.memory_space<vmem>>, vector<3x8xf32>
    %5 = arith.truncf %4 : vector<3x8xf32> to vector<3x8xbf16>
    %cst_5 = arith.constant dense<0.000000e+00> : vector<512x8xf32>
    %6 = tpu.matmul %3, %5, %cst_5 {dimension_numbers = #tpu.dot_dimension_numbers<[1], [0], [0], [1], [0, 0, 1, 1], [], []>} : vector<512x3xbf16>, vector<3x8xbf16>, vector<512x8xf32> -> vector<512x8xf32>
    %7 = arith.addf %0, %6 : vector<512x8xf32>
    %c0_6 = arith.constant 0 : index
    %c0_7 = arith.constant 0 : index
    %c1 = arith.constant 1 : index
    %c0_8 = arith.constant 0 : index
    %8 = vector.load %arg1[%c0_6, %c0_7, %c1, %c0_8] : memref<2x18x18x3xf32, #tpu.memory_space<vmem>>, vector<2x16x16x3xf32>
    %9 = vector.shape_cast %8 : vector<2x16x16x3xf32> to vector<512x3xf32>
    %10 = arith.truncf %9 : vector<512x3xf32> to vector<512x3xbf16>
    %c3 = arith.constant 3 : index
    %c0_9 = arith.constant 0 : index
    %11 = vector.load %arg2[%c3, %c0_9] : memref<27x8xf32, #tpu.memory_space<vmem>>, vector<3x8xf32>
    %12 = arith.truncf %11 : vector<3x8xf32> to vector<3x8xbf16>
    %cst_10 = arith.constant dense<0.000000e+00> : vector<512x8xf32>
    %13 = tpu.matmul %10, %12, %cst_10 {dimension_numbers = #tpu.dot_dimension_numbers<[1], [0], [0], [1], [0, 0, 1, 1], [], []>} : vector<512x3xbf16>, vector<3x8xbf16>, vector<512x8xf32> -> vector<512x8xf32>
    %14 = arith.addf %7, %13 : vector<512x8xf32>
    %c0_11 = arith.constant 0 : index
    %c0_12 = arith.constant 0 : index
    %c2 = arith.constant 2 : index
    %c0_13 = arith.constant 0 : index
    %15 = vector.load %arg1[%c0_11, %c0_12, %c2, %c0_13] : memref<2x18x18x3xf32, #tpu.memory_space<vmem>>, vector<2x16x16x3xf32>
    %16 = vector.shape_cast %15 : vector<2x16x16x3xf32> to vector<512x3xf32>
    %17 = arith.truncf %16 : vector<512x3xf32> to vector<512x3xbf16>
    %c6 = arith.constant 6 : index
    %c0_14 = arith.constant 0 : index
    %18 = vector.load %arg2[%c6, %c0_14] : memref<27x8xf32, #tpu.memory_space<vmem>>, vector<3x8xf32>
    %19 = arith.truncf %18 : vector<3x8xf32> to vector<3x8xbf16>
    %cst_15 = arith.constant dense<0.000000e+00> : vector<512x8xf32>
    %20 = tpu.matmul %17, %19, %cst_15 {dimension_numbers = #tpu.dot_dimension_numbers<[1], [0], [0], [1], [0, 0, 1, 1], [], []>} : vector<512x3xbf16>, vector<3x8xbf16>, vector<512x8xf32> -> vector<512x8xf32>
    %21 = arith.addf %14, %20 : vector<512x8xf32>
    %c0_16 = arith.constant 0 : index
    %c1_17 = arith.constant 1 : index
    %c0_18 = arith.constant 0 : index
    %c0_19 = arith.constant 0 : index
    %22 = vector.load %arg1[%c0_16, %c1_17, %c0_18, %c0_19] : memref<2x18x18x3xf32, #tpu.memory_space<vmem>>, vector<2x16x16x3xf32>
    %23 = vector.shape_cast %22 : vector<2x16x16x3xf32> to vector<512x3xf32>
    %24 = arith.truncf %23 : vector<512x3xf32> to vector<512x3xbf16>
    %c9 = arith.constant 9 : index
    %c0_20 = arith.constant 0 : index
    %25 = vector.load %arg2[%c9, %c0_20] : memref<27x8xf32, #tpu.memory_space<vmem>>, vector<3x8xf32>
    %26 = arith.truncf %25 : vector<3x8xf32> to vector<3x8xbf16>
    %cst_21 = arith.constant dense<0.000000e+00> : vector<512x8xf32>
    %27 = tpu.matmul %24, %26, %cst_21 {dimension_numbers = #tpu.dot_dimension_numbers<[1], [0], [0], [1], [0, 0, 1, 1], [], []>} : vector<512x3xbf16>, vector<3x8xbf16>, vector<512x8xf32> -> vector<512x8xf32>
    %28 = arith.addf %21, %27 : vector<512x8xf32>
    %c0_22 = arith.constant 0 : index
    %c1_23 = arith.constant 1 : index
    %c1_24 = arith.constant 1 : index
    %c0_25 = arith.constant 0 : index
    %29 = vector.load %arg1[%c0_22, %c1_23, %c1_24, %c0_25] : memref<2x18x18x3xf32, #tpu.memory_space<vmem>>, vector<2x16x16x3xf32>
    %30 = vector.shape_cast %29 : vector<2x16x16x3xf32> to vector<512x3xf32>
    %31 = arith.truncf %30 : vector<512x3xf32> to vector<512x3xbf16>
    %c12 = arith.constant 12 : index
    %c0_26 = arith.constant 0 : index
    %32 = vector.load %arg2[%c12, %c0_26] : memref<27x8xf32, #tpu.memory_space<vmem>>, vector<3x8xf32>
    %33 = arith.truncf %32 : vector<3x8xf32> to vector<3x8xbf16>
    %cst_27 = arith.constant dense<0.000000e+00> : vector<512x8xf32>
    %34 = tpu.matmul %31, %33, %cst_27 {dimension_numbers = #tpu.dot_dimension_numbers<[1], [0], [0], [1], [0, 0, 1, 1], [], []>} : vector<512x3xbf16>, vector<3x8xbf16>, vector<512x8xf32> -> vector<512x8xf32>
    %35 = arith.addf %28, %34 : vector<512x8xf32>
    %c0_28 = arith.constant 0 : index
    %c1_29 = arith.constant 1 : index
    %c2_30 = arith.constant 2 : index
    %c0_31 = arith.constant 0 : index
    %36 = vector.load %arg1[%c0_28, %c1_29, %c2_30, %c0_31] : memref<2x18x18x3xf32, #tpu.memory_space<vmem>>, vector<2x16x16x3xf32>
    %37 = vector.shape_cast %36 : vector<2x16x16x3xf32> to vector<512x3xf32>
    %38 = arith.truncf %37 : vector<512x3xf32> to vector<512x3xbf16>
    %c15 = arith.constant 15 : index
    %c0_32 = arith.constant 0 : index
    %39 = vector.load %arg2[%c15, %c0_32] : memref<27x8xf32, #tpu.memory_space<vmem>>, vector<3x8xf32>
    %40 = arith.truncf %39 : vector<3x8xf32> to vector<3x8xbf16>
    %cst_33 = arith.constant dense<0.000000e+00> : vector<512x8xf32>
    %41 = tpu.matmul %38, %40, %cst_33 {dimension_numbers = #tpu.dot_dimension_numbers<[1], [0], [0], [1], [0, 0, 1, 1], [], []>} : vector<512x3xbf16>, vector<3x8xbf16>, vector<512x8xf32> -> vector<512x8xf32>
    %42 = arith.addf %35, %41 : vector<512x8xf32>
    %c0_34 = arith.constant 0 : index
    %c2_35 = arith.constant 2 : index
    %c0_36 = arith.constant 0 : index
    %c0_37 = arith.constant 0 : index
    %43 = vector.load %arg1[%c0_34, %c2_35, %c0_36, %c0_37] : memref<2x18x18x3xf32, #tpu.memory_space<vmem>>, vector<2x16x16x3xf32>
    %44 = vector.shape_cast %43 : vector<2x16x16x3xf32> to vector<512x3xf32>
    %45 = arith.truncf %44 : vector<512x3xf32> to vector<512x3xbf16>
    %c18 = arith.constant 18 : index
    %c0_38 = arith.constant 0 : index
    %46 = vector.load %arg2[%c18, %c0_38] : memref<27x8xf32, #tpu.memory_space<vmem>>, vector<3x8xf32>
    %47 = arith.truncf %46 : vector<3x8xf32> to vector<3x8xbf16>
    %cst_39 = arith.constant dense<0.000000e+00> : vector<512x8xf32>
    %48 = tpu.matmul %45, %47, %cst_39 {dimension_numbers = #tpu.dot_dimension_numbers<[1], [0], [0], [1], [0, 0, 1, 1], [], []>} : vector<512x3xbf16>, vector<3x8xbf16>, vector<512x8xf32> -> vector<512x8xf32>
    %49 = arith.addf %42, %48 : vector<512x8xf32>
    %c0_40 = arith.constant 0 : index
    %c2_41 = arith.constant 2 : index
    %c1_42 = arith.constant 1 : index
    %c0_43 = arith.constant 0 : index
    %50 = vector.load %arg1[%c0_40, %c2_41, %c1_42, %c0_43] : memref<2x18x18x3xf32, #tpu.memory_space<vmem>>, vector<2x16x16x3xf32>
    %51 = vector.shape_cast %50 : vector<2x16x16x3xf32> to vector<512x3xf32>
    %52 = arith.truncf %51 : vector<512x3xf32> to vector<512x3xbf16>
    %c21 = arith.constant 21 : index
    %c0_44 = arith.constant 0 : index
    %53 = vector.load %arg2[%c21, %c0_44] : memref<27x8xf32, #tpu.memory_space<vmem>>, vector<3x8xf32>
    %54 = arith.truncf %53 : vector<3x8xf32> to vector<3x8xbf16>
    %cst_45 = arith.constant dense<0.000000e+00> : vector<512x8xf32>
    %55 = tpu.matmul %52, %54, %cst_45 {dimension_numbers = #tpu.dot_dimension_numbers<[1], [0], [0], [1], [0, 0, 1, 1], [], []>} : vector<512x3xbf16>, vector<3x8xbf16>, vector<512x8xf32> -> vector<512x8xf32>
    %56 = arith.addf %49, %55 : vector<512x8xf32>
    %c0_46 = arith.constant 0 : index
    %c2_47 = arith.constant 2 : index
    %c2_48 = arith.constant 2 : index
    %c0_49 = arith.constant 0 : index
    %57 = vector.load %arg1[%c0_46, %c2_47, %c2_48, %c0_49] : memref<2x18x18x3xf32, #tpu.memory_space<vmem>>, vector<2x16x16x3xf32>
    %58 = vector.shape_cast %57 : vector<2x16x16x3xf32> to vector<512x3xf32>
    %59 = arith.truncf %58 : vector<512x3xf32> to vector<512x3xbf16>
    %c24 = arith.constant 24 : index
    %c0_50 = arith.constant 0 : index
    %60 = vector.load %arg2[%c24, %c0_50] : memref<27x8xf32, #tpu.memory_space<vmem>>, vector<3x8xf32>
    %61 = arith.truncf %60 : vector<3x8xf32> to vector<3x8xbf16>
    %cst_51 = arith.constant dense<0.000000e+00> : vector<512x8xf32>
    %62 = tpu.matmul %59, %61, %cst_51 {dimension_numbers = #tpu.dot_dimension_numbers<[1], [0], [0], [1], [0, 0, 1, 1], [], []>} : vector<512x3xbf16>, vector<3x8xbf16>, vector<512x8xf32> -> vector<512x8xf32>
    %63 = arith.addf %56, %62 : vector<512x8xf32>
    %c0_52 = arith.constant 0 : index
    %c0_53 = arith.constant 0 : index
    %64 = vector.load %arg3[%c0_52, %c0_53] : memref<1x8xf32, #tpu.memory_space<vmem>>, vector<1x8xf32>
    %65 = vector.broadcast %64 : vector<1x8xf32> to vector<512x8xf32>
    %66 = arith.addf %63, %65 : vector<512x8xf32>
    %cst_54 = arith.constant 0.000000e+00 : f32
    %67 = vector.broadcast %cst_54 : f32 to vector<512x8xf32>
    %68 = arith.maximumf %66, %67 : vector<512x8xf32>
    %cst_55 = arith.constant 0.000000e+00 : f32
    %69 = vector.broadcast %cst_55 : f32 to vector<2x18x18x8xf32>
    %c0_56 = arith.constant 0 : index
    %c0_57 = arith.constant 0 : index
    %c0_58 = arith.constant 0 : index
    %c0_59 = arith.constant 0 : index
    %70 = vector.load %arg10[%c0_56, %c0_57, %c0_58, %c0_59] : memref<2x18x18x8xf32, #tpu.memory_space<vmem>>, vector<2x18x18x8xf32>
    tpu.vector_store %arg10[%c0_56, %c0_57, %c0_58, %c0_59], %69 {strides = array<i32>} : memref<2x18x18x8xf32, #tpu.memory_space<vmem>>, vector<2x18x18x8xf32>,
    %71 = vector.shape_cast %68 : vector<512x8xf32> to vector<2x16x16x8xf32>
    %c0_60 = arith.constant 0 : index
    %c1_61 = arith.constant 1 : index
    %c1_62 = arith.constant 1 : index
    %c0_63 = arith.constant 0 : index
    %72 = vector.load %arg10[%c0_60, %c1_61, %c1_62, %c0_63] : memref<2x18x18x8xf32, #tpu.memory_space<vmem>>, vector<2x16x16x8xf32>
    tpu.vector_store %arg10[%c0_60, %c1_61, %c1_62, %c0_63], %71 {strides = array<i32>} : memref<2x18x18x8xf32, #tpu.memory_space<vmem>>, vector<2x16x16x8xf32>,
    %cst_64 = arith.constant 0.000000e+00 : f32
    %73 = vector.broadcast %cst_64 : f32 to vector<512x32xf32>
    %c0_65 = arith.constant 0 : index
    %c0_66 = arith.constant 0 : index
    %c0_67 = arith.constant 0 : index
    %c0_68 = arith.constant 0 : index
    %74 = vector.load %arg10[%c0_65, %c0_66, %c0_67, %c0_68] : memref<2x18x18x8xf32, #tpu.memory_space<vmem>>, vector<2x16x16x8xf32>
    %75 = vector.shape_cast %74 : vector<2x16x16x8xf32> to vector<512x8xf32>
    %76 = arith.truncf %75 : vector<512x8xf32> to vector<512x8xbf16>
    %c0_69 = arith.constant 0 : index
    %c0_70 = arith.constant 0 : index
    %77 = vector.load %arg4[%c0_69, %c0_70] : memref<72x32xf32, #tpu.memory_space<vmem>>, vector<8x32xf32>
    %78 = arith.truncf %77 : vector<8x32xf32> to vector<8x32xbf16>
    %cst_71 = arith.constant dense<0.000000e+00> : vector<512x32xf32>
    %79 = tpu.matmul %76, %78, %cst_71 {dimension_numbers = #tpu.dot_dimension_numbers<[1], [0], [0], [1], [0, 0, 1, 1], [], []>} : vector<512x8xbf16>, vector<8x32xbf16>, vector<512x32xf32> -> vector<512x32xf32>
    %80 = arith.addf %73, %79 : vector<512x32xf32>
    %c0_72 = arith.constant 0 : index
    %c0_73 = arith.constant 0 : index
    %c1_74 = arith.constant 1 : index
    %c0_75 = arith.constant 0 : index
    %81 = vector.load %arg10[%c0_72, %c0_73, %c1_74, %c0_75] : memref<2x18x18x8xf32, #tpu.memory_space<vmem>>, vector<2x16x16x8xf32>
    %82 = vector.shape_cast %81 : vector<2x16x16x8xf32> to vector<512x8xf32>
    %83 = arith.truncf %82 : vector<512x8xf32> to vector<512x8xbf16>
    %c8 = arith.constant 8 : index
    %c0_76 = arith.constant 0 : index
    %84 = vector.load %arg4[%c8, %c0_76] : memref<72x32xf32, #tpu.memory_space<vmem>>, vector<8x32xf32>
    %85 = arith.truncf %84 : vector<8x32xf32> to vector<8x32xbf16>
    %cst_77 = arith.constant dense<0.000000e+00> : vector<512x32xf32>
    %86 = tpu.matmul %83, %85, %cst_77 {dimension_numbers = #tpu.dot_dimension_numbers<[1], [0], [0], [1], [0, 0, 1, 1], [], []>} : vector<512x8xbf16>, vector<8x32xbf16>, vector<512x32xf32> -> vector<512x32xf32>
    %87 = arith.addf %80, %86 : vector<512x32xf32>
    %c0_78 = arith.constant 0 : index
    %c0_79 = arith.constant 0 : index
    %c2_80 = arith.constant 2 : index
    %c0_81 = arith.constant 0 : index
    %88 = vector.load %arg10[%c0_78, %c0_79, %c2_80, %c0_81] : memref<2x18x18x8xf32, #tpu.memory_space<vmem>>, vector<2x16x16x8xf32>
    %89 = vector.shape_cast %88 : vector<2x16x16x8xf32> to vector<512x8xf32>
    %90 = arith.truncf %89 : vector<512x8xf32> to vector<512x8xbf16>
    %c16 = arith.constant 16 : index
    %c0_82 = arith.constant 0 : index
    %91 = vector.load %arg4[%c16, %c0_82] : memref<72x32xf32, #tpu.memory_space<vmem>>, vector<8x32xf32>
    %92 = arith.truncf %91 : vector<8x32xf32> to vector<8x32xbf16>
    %cst_83 = arith.constant dense<0.000000e+00> : vector<512x32xf32>
    %93 = tpu.matmul %90, %92, %cst_83 {dimension_numbers = #tpu.dot_dimension_numbers<[1], [0], [0], [1], [0, 0, 1, 1], [], []>} : vector<512x8xbf16>, vector<8x32xbf16>, vector<512x32xf32> -> vector<512x32xf32>
    %94 = arith.addf %87, %93 : vector<512x32xf32>
    %c0_84 = arith.constant 0 : index
    %c1_85 = arith.constant 1 : index
    %c0_86 = arith.constant 0 : index
    %c0_87 = arith.constant 0 : index
    %95 = vector.load %arg10[%c0_84, %c1_85, %c0_86, %c0_87] : memref<2x18x18x8xf32, #tpu.memory_space<vmem>>, vector<2x16x16x8xf32>
    %96 = vector.shape_cast %95 : vector<2x16x16x8xf32> to vector<512x8xf32>
    %97 = arith.truncf %96 : vector<512x8xf32> to vector<512x8xbf16>
    %c24_88 = arith.constant 24 : index
    %c0_89 = arith.constant 0 : index
    %98 = vector.load %arg4[%c24_88, %c0_89] : memref<72x32xf32, #tpu.memory_space<vmem>>, vector<8x32xf32>
    %99 = arith.truncf %98 : vector<8x32xf32> to vector<8x32xbf16>
    %cst_90 = arith.constant dense<0.000000e+00> : vector<512x32xf32>
    %100 = tpu.matmul %97, %99, %cst_90 {dimension_numbers = #tpu.dot_dimension_numbers<[1], [0], [0], [1], [0, 0, 1, 1], [], []>} : vector<512x8xbf16>, vector<8x32xbf16>, vector<512x32xf32> -> vector<512x32xf32>
    %101 = arith.addf %94, %100 : vector<512x32xf32>
    %c0_91 = arith.constant 0 : index
    %c1_92 = arith.constant 1 : index
    %c1_93 = arith.constant 1 : index
    %c0_94 = arith.constant 0 : index
    %102 = vector.load %arg10[%c0_91, %c1_92, %c1_93, %c0_94] : memref<2x18x18x8xf32, #tpu.memory_space<vmem>>, vector<2x16x16x8xf32>
    %103 = vector.shape_cast %102 : vector<2x16x16x8xf32> to vector<512x8xf32>
    %104 = arith.truncf %103 : vector<512x8xf32> to vector<512x8xbf16>
    %c32 = arith.constant 32 : index
    %c0_95 = arith.constant 0 : index
    %105 = vector.load %arg4[%c32, %c0_95] : memref<72x32xf32, #tpu.memory_space<vmem>>, vector<8x32xf32>
    %106 = arith.truncf %105 : vector<8x32xf32> to vector<8x32xbf16>
    %cst_96 = arith.constant dense<0.000000e+00> : vector<512x32xf32>
    %107 = tpu.matmul %104, %106, %cst_96 {dimension_numbers = #tpu.dot_dimension_numbers<[1], [0], [0], [1], [0, 0, 1, 1], [], []>} : vector<512x8xbf16>, vector<8x32xbf16>, vector<512x32xf32> -> vector<512x32xf32>
    %108 = arith.addf %101, %107 : vector<512x32xf32>
    %c0_97 = arith.constant 0 : index
    %c1_98 = arith.constant 1 : index
    %c2_99 = arith.constant 2 : index
    %c0_100 = arith.constant 0 : index
    %109 = vector.load %arg10[%c0_97, %c1_98, %c2_99, %c0_100] : memref<2x18x18x8xf32, #tpu.memory_space<vmem>>, vector<2x16x16x8xf32>
    %110 = vector.shape_cast %109 : vector<2x16x16x8xf32> to vector<512x8xf32>
    %111 = arith.truncf %110 : vector<512x8xf32> to vector<512x8xbf16>
    %c40 = arith.constant 40 : index
    %c0_101 = arith.constant 0 : index
    %112 = vector.load %arg4[%c40, %c0_101] : memref<72x32xf32, #tpu.memory_space<vmem>>, vector<8x32xf32>
    %113 = arith.truncf %112 : vector<8x32xf32> to vector<8x32xbf16>
    %cst_102 = arith.constant dense<0.000000e+00> : vector<512x32xf32>
    %114 = tpu.matmul %111, %113, %cst_102 {dimension_numbers = #tpu.dot_dimension_numbers<[1], [0], [0], [1], [0, 0, 1, 1], [], []>} : vector<512x8xbf16>, vector<8x32xbf16>, vector<512x32xf32> -> vector<512x32xf32>
    %115 = arith.addf %108, %114 : vector<512x32xf32>
    %c0_103 = arith.constant 0 : index
    %c2_104 = arith.constant 2 : index
    %c0_105 = arith.constant 0 : index
    %c0_106 = arith.constant 0 : index
    %116 = vector.load %arg10[%c0_103, %c2_104, %c0_105, %c0_106] : memref<2x18x18x8xf32, #tpu.memory_space<vmem>>, vector<2x16x16x8xf32>
    %117 = vector.shape_cast %116 : vector<2x16x16x8xf32> to vector<512x8xf32>
    %118 = arith.truncf %117 : vector<512x8xf32> to vector<512x8xbf16>
    %c48 = arith.constant 48 : index
    %c0_107 = arith.constant 0 : index
    %119 = vector.load %arg4[%c48, %c0_107] : memref<72x32xf32, #tpu.memory_space<vmem>>, vector<8x32xf32>
    %120 = arith.truncf %119 : vector<8x32xf32> to vector<8x32xbf16>
    %cst_108 = arith.constant dense<0.000000e+00> : vector<512x32xf32>
    %121 = tpu.matmul %118, %120, %cst_108 {dimension_numbers = #tpu.dot_dimension_numbers<[1], [0], [0], [1], [0, 0, 1, 1], [], []>} : vector<512x8xbf16>, vector<8x32xbf16>, vector<512x32xf32> -> vector<512x32xf32>
    %122 = arith.addf %115, %121 : vector<512x32xf32>
    %c0_109 = arith.constant 0 : index
    %c2_110 = arith.constant 2 : index
    %c1_111 = arith.constant 1 : index
    %c0_112 = arith.constant 0 : index
    %123 = vector.load %arg10[%c0_109, %c2_110, %c1_111, %c0_112] : memref<2x18x18x8xf32, #tpu.memory_space<vmem>>, vector<2x16x16x8xf32>
    %124 = vector.shape_cast %123 : vector<2x16x16x8xf32> to vector<512x8xf32>
    %125 = arith.truncf %124 : vector<512x8xf32> to vector<512x8xbf16>
    %c56 = arith.constant 56 : index
    %c0_113 = arith.constant 0 : index
    %126 = vector.load %arg4[%c56, %c0_113] : memref<72x32xf32, #tpu.memory_space<vmem>>, vector<8x32xf32>
    %127 = arith.truncf %126 : vector<8x32xf32> to vector<8x32xbf16>
    %cst_114 = arith.constant dense<0.000000e+00> : vector<512x32xf32>
    %128 = tpu.matmul %125, %127, %cst_114 {dimension_numbers = #tpu.dot_dimension_numbers<[1], [0], [0], [1], [0, 0, 1, 1], [], []>} : vector<512x8xbf16>, vector<8x32xbf16>, vector<512x32xf32> -> vector<512x32xf32>
    %129 = arith.addf %122, %128 : vector<512x32xf32>
    %c0_115 = arith.constant 0 : index
    %c2_116 = arith.constant 2 : index
    %c2_117 = arith.constant 2 : index
    %c0_118 = arith.constant 0 : index
    %130 = vector.load %arg10[%c0_115, %c2_116, %c2_117, %c0_118] : memref<2x18x18x8xf32, #tpu.memory_space<vmem>>, vector<2x16x16x8xf32>
    %131 = vector.shape_cast %130 : vector<2x16x16x8xf32> to vector<512x8xf32>
    %132 = arith.truncf %131 : vector<512x8xf32> to vector<512x8xbf16>
    %c64 = arith.constant 64 : index
    %c0_119 = arith.constant 0 : index
    %133 = vector.load %arg4[%c64, %c0_119] : memref<72x32xf32, #tpu.memory_space<vmem>>, vector<8x32xf32>
    %134 = arith.truncf %133 : vector<8x32xf32> to vector<8x32xbf16>
    %cst_120 = arith.constant dense<0.000000e+00> : vector<512x32xf32>
    %135 = tpu.matmul %132, %134, %cst_120 {dimension_numbers = #tpu.dot_dimension_numbers<[1], [0], [0], [1], [0, 0, 1, 1], [], []>} : vector<512x8xbf16>, vector<8x32xbf16>, vector<512x32xf32> -> vector<512x32xf32>
    %136 = arith.addf %129, %135 : vector<512x32xf32>
    %c0_121 = arith.constant 0 : index
    %c0_122 = arith.constant 0 : index
    %137 = vector.load %arg5[%c0_121, %c0_122] : memref<1x32xf32, #tpu.memory_space<vmem>>, vector<1x32xf32>
    %138 = vector.broadcast %137 : vector<1x32xf32> to vector<512x32xf32>
    %139 = arith.addf %136, %138 : vector<512x32xf32>
    %cst_123 = arith.constant 0.000000e+00 : f32
    %140 = vector.broadcast %cst_123 : f32 to vector<512x32xf32>
    %141 = arith.maximumf %139, %140 : vector<512x32xf32>
    %c0_124 = arith.constant 0 : index
    %c0_125 = arith.constant 0 : index
    %142 = vector.load %arg6[%c0_124, %c0_125] : memref<2x512xf32, #tpu.memory_space<vmem>>, vector<2x512xf32>
    %cst_126 = arith.constant dense<0.000000e+00> : vector<2x32xf32>
    %143 = tpu.matmul %142, %141, %cst_126 {dimension_numbers = #tpu.dot_dimension_numbers<[1], [0], [0], [1], [0, 0, 1, 1], [], []>} : vector<2x512xf32>, vector<512x32xf32>, vector<2x32xf32> -> vector<2x32xf32>
    %c0_127 = arith.constant 0 : index
    %c0_128 = arith.constant 0 : index
    %144 = vector.load %arg7[%c0_127, %c0_128] : memref<32x10xf32, #tpu.memory_space<vmem>>, vector<32x10xf32>
    %cst_129 = arith.constant dense<0.000000e+00> : vector<2x10xf32>
    %145 = tpu.matmul %143, %144, %cst_129 {dimension_numbers = #tpu.dot_dimension_numbers<[1], [0], [0], [1], [0, 0, 1, 1], [], []>} : vector<2x32xf32>, vector<32x10xf32>, vector<2x10xf32> -> vector<2x10xf32>
    %c0_130 = arith.constant 0 : index
    %c0_131 = arith.constant 0 : index
    %146 = vector.load %arg8[%c0_130, %c0_131] : memref<1x10xf32, #tpu.memory_space<vmem>>, vector<1x10xf32>
    %147 = vector.broadcast %146 : vector<1x10xf32> to vector<2x10xf32>
    %148 = arith.addf %145, %147 : vector<2x10xf32>
    %c0_132 = arith.constant 0 : index
    %c0_133 = arith.constant 0 : index
    %149 = vector.load %arg9[%c0_132, %c0_133] : memref<2x10xf32, #tpu.memory_space<vmem>>, vector<2x10xf32>
    tpu.vector_store %arg9[%c0_132, %c0_133], %148 {strides = array<i32>} : memref<2x10xf32, #tpu.memory_space<vmem>>, vector<2x10xf32>,
    return
  }
  func.func @transform_0(%arg0: i32) -> (i32, i32, i32, i32) {
    %c0_i32 = arith.constant 0 : i32
    %c0_i32_0 = arith.constant 0 : i32
    %c0_i32_1 = arith.constant 0 : i32
    %c0_i32_2 = arith.constant 0 : i32
    %c0_i32_3 = arith.constant 0 : i32
    return %c0_i32, %c0_i32_0, %c0_i32_1, %c0_i32_2 : i32, i32, i32, i32
  }
  func.func @transform_1(%arg0: i32) -> (i32, i32) {
    %c0_i32 = arith.constant 0 : i32
    %c0_i32_0 = arith.constant 0 : i32
    %c0_i32_1 = arith.constant 0 : i32
    return %c0_i32, %c0_i32_0 : i32, i32
  }
  func.func @transform_2(%arg0: i32) -> (i32, i32) {
    %c0_i32 = arith.constant 0 : i32
    %c0_i32_0 = arith.constant 0 : i32
    %c0_i32_1 = arith.constant 0 : i32
    return %c0_i32, %c0_i32_0 : i32, i32
  }
  func.func @transform_3(%arg0: i32) -> (i32, i32) {
    %c0_i32 = arith.constant 0 : i32
    %c0_i32_0 = arith.constant 0 : i32
    %c0_i32_1 = arith.constant 0 : i32
    return %c0_i32, %c0_i32_0 : i32, i32
  }
  func.func @transform_4(%arg0: i32) -> (i32, i32) {
    %c0_i32 = arith.constant 0 : i32
    %c0_i32_0 = arith.constant 0 : i32
    %c0_i32_1 = arith.constant 0 : i32
    return %c0_i32, %c0_i32_0 : i32, i32
  }
  func.func @transform_5(%arg0: i32) -> (i32, i32) {
    %c0_i32 = arith.constant 0 : i32
    %c0_i32_0 = arith.constant 0 : i32
    %c0_i32_1 = arith.constant 0 : i32
    return %c0_i32, %c0_i32_0 : i32, i32
  }
  func.func @transform_6(%arg0: i32) -> (i32, i32) {
    %c0_i32 = arith.constant 0 : i32
    %c0_i32_0 = arith.constant 0 : i32
    %c0_i32_1 = arith.constant 0 : i32
    return %c0_i32, %c0_i32_0 : i32, i32
  }
  func.func @transform_7(%arg0: i32) -> (i32, i32) {
    %c0_i32 = arith.constant 0 : i32
    %c0_i32_0 = arith.constant 0 : i32
    %c0_i32_1 = arith.constant 0 : i32
    return %c0_i32, %c0_i32_0 : i32, i32
  }
  func.func @transform_8(%arg0: i32) -> (i32, i32) {
    %c0_i32 = arith.constant 0 : i32
    %c0_i32_0 = arith.constant 0 : i32
    %c0_i32_1 = arith.constant 0 : i32
    return %c0_i32, %c0_i32_0 : i32, i32
  }
}

</mosaic_0001>

<bundles_post_ra>
// kernel: sk_child_net_clf_forward.1
= control target key start
LH: loop header
LB: loop body
LE: loop exit
PB: predicated region body
PF: predicated region fallthrough
CT: control target
= control target key end

     0   :  { %vm324_vm0 = vcmask 1040384   ;;  %vm325_vm1 = vcmask 1041408   ;;  %v14359_v3 = vmov 65535   ;;  %vm227_vm2 = vcmask 23552   ;;  %s17510_s0 = inlined_call_operand.vmem [shape: f32[2,18,18,3], index: 0, kind: input, shape index: {}]   ;;  %s17511_s1 = inlined_call_operand.vmem [shape: f32[27,8], index: 1, kind: input, shape index: {}]   ;;  %s17512_s2 = inlined_call_operand.vmem [shape: f32[1,8], index: 2, kind: input, shape index: {}]   ;;  %s17513_s3 = inlined_call_operand.vmem [shape: f32[72,32], index: 3, kind: input, shape index: {}]   ;;  %s17514_s4 = inlined_call_operand.vmem [shape: f32[1,32], index: 4, kind: input, shape index: {}]   ;;  %s17515_s5 = inlined_call_operand.vmem [shape: f32[2,512], index: 5, kind: input, shape index: {}]   ;;  %s17516_s6 = inlined_call_operand.vmem [shape: f32[32,10], index: 6, kind: input, shape index: {}]   ;;  %s17517_s7 = inlined_call_operand.vmem [shape: f32[1,10], index: 7, kind: input, shape index: {}]   ;;  %s17518_s8 = inlined_call_operand.hbm [shape: f32[2,10], index: 8, kind: output, shape index: {}]  }
   0x1   :  { %v225_v0 = vld [vmem:[%s17511_s1 + $0x3] sm:$0x7]  ;;  %v326_v4 = vsel %vm324_vm0, 4294967295, %v14359_v3  ;;  %v130_v5 = vld [vmem:[%s17510_s0 + $0x9] sm:$0xff]  ;;  %v131_v8 = vld [vmem:[%s17510_s0 + $0x19] sm:$0xff] }
   0x2   :  { %v129_v1 = vld [vmem:[%s17510_s0 + $0x1] sm:$0xff]  ;;  %v226_v2 = vpack.c.bf16 %v225_v0, %v225_v0  ;;  %v14419_v6 = vsel %vm325_vm1, %v326_v4, 0  ;;  %v133_v11 = vld [vmem:[%s17510_s0 + $0x31] sm:$0xff]  ;;  %v134_v12 = vld [vmem:[%s17510_s0 + $0x39] sm:$0xff] }
   0x3   :  { %v193_v7 = vpack.c.bf16 %v130_v5, %v129_v1  ;;  %v132_v9 = vld [vmem:[%s17510_s0 + $0x21] sm:$0xff]  ;;  %v195_v14 = vpack.c.bf16 %v134_v12, %v133_v11  ;;  %v135_v15 = vld [vmem:[%s17510_s0 + $0x49] sm:$0xff]  ;;  %v136_v16 = vld [vmem:[%s17510_s0 + $0x51] sm:$0xff] }
   0x4   :  { %v329_v10 = vand.u32 %v14419_v6, %v226_v2  ;;  %v194_v13 = vpack.c.bf16 %v132_v9, %v131_v8  ;;  %v137_v17 = vld [vmem:[%s17510_s0 + $0x61] sm:$0xff]  ;;  %v138_v18 = vld [vmem:[%s17510_s0 + $0x69] sm:$0xff]  ;;  %v196_v19 = vpack.c.bf16 %v136_v16, %v135_v15  ;;  %v139_v21 = vld [vmem:[%s17510_s0 + $0x79] sm:$0xff] }
   0x5   :  { %12028 = vmatprep.mubr.msk.bf16.mxu0 %vm227_vm2, %v193_v7  ;;  %v197_v20 = vpack.c.bf16 %v138_v18, %v137_v17  ;;  %v140_v22 = vld [vmem:[%s17510_s0 + $0x81] sm:$0xff]  ;;  %v141_v24 = vld [vmem:[%s17510_s0 + $0x91] sm:$0xff]  ;;  %v142_v25 = vld [vmem:[%s17510_s0 + $0x99] sm:$0xff] }
   0x6   :  { %12026 = vmatprep.subr.bf16.mxu0 %v329_v10  ;;  %v127_v23 = vld [vmem:[%s17511_s1] sm:$0x7]  ;;  %v198_v27 = vpack.c.bf16 %v140_v22, %v139_v21  ;;  %v199_v29 = vpack.c.bf16 %v142_v25, %v141_v24  ;;  %v143_v30 = vld [vmem:[%s17510_s0 + $0xa9] sm:$0xff]  ;;  %v144_v31 = vld [vmem:[%s17510_s0 + $0xb1] sm:$0xff] }
   0x7   :  { %12027 = vmatpush3.bf16.msra.mxu0 %v329_v10  ;;  %v128_v26 = vpack.c.bf16 %v127_v23, %v127_v23  ;;  %v145_v32 = vld [vmem:[%s17510_s0 + $0xc1] sm:$0xff]  ;;  %v146_v33 = vld [vmem:[%s17510_s0 + $0xc9] sm:$0xff] }
   0x9   :  { %v717_v28 = vand.u32 %v14419_v6, %v128_v26 }
   0xa   :  { %12029 = vmatmul.mubr.msk.bf16.vlgmr.msra.gmra.mrb[0].mxu0 %vm227_vm2, %v194_v13 }
   0xb   :  { %12032 = vmatprep.mubr.msk.bf16.mxu0 %vm227_vm2, %v195_v14  ;;  %12092 = vmatprep.subr.bf16.mxu0 %v717_v28 }
   0xc   :  { %12093 = vmatpush3.bf16.msra.mxu0 %v717_v28 }
  0x12   :  { %12033 = vmatmul.mubr.msk.bf16.gmra.mrb[4].mxu0 %vm227_vm2, %v196_v19 }
  0x13   :  { %12036 = vmatprep.mubr.msk.bf16.mxu0 %vm227_vm2, %v197_v20 }
  0x1a   :  { %12037 = vmatmul.mubr.msk.bf16.gmra.mrb[8].mxu0 %vm227_vm2, %v198_v27 }
  0x1b   :  { %12040 = vmatprep.mubr.msk.bf16.mxu0 %vm227_vm2, %v199_v29 }
  0x1c   :  { %13 = vsyncpa [#allocation4], 0  ;;  %v200_v34 = vpack.c.bf16 %v144_v31, %v143_v30  ;;  %v201_v35 = vpack.c.bf16 %v146_v33, %v145_v32  ;;  %v147_v36 = vld [vmem:[%s17510_s0 + $0xd9] sm:$0xff]  ;;  %v148_v37 = vld [vmem:[%s17510_s0 + $0xe1] sm:$0xff]  ;;  %vm4995_vm3 = vcmask 64512   ;;  %vm4998_vm4 = vcmask 58368  }
  0x1d   :  { %v149_v38 = vld [vmem:[%s17510_s0 + $0xf1] sm:$0xff]  ;;  %v150_v39 = vld [vmem:[%s17510_s0 + $0xf9] sm:$0xff]  ;;  %v202_v40 = vpack.c.bf16 %v148_v37, %v147_v36  ;;  %v151_v42 = vld [vmem:[%s17510_s0 + $0x109] sm:$0xff]  ;;  %vm5462_vm5 = vcmask 1043456   ;;  %vm14363_vm6 = vmmov 0   ;;  %vm10303_vm7 = vcmask 261120  }
  0x1e   :  { %v203_v41 = vpack.c.bf16 %v150_v39, %v149_v38  ;;  %v152_v43 = vld [vmem:[%s17510_s0 + $0x111] sm:$0xff]  ;;  %v153_v44 = vld [vmem:[%s17510_s0 + $0x121] sm:$0xff]  ;;  %v154_v45 = vld [vmem:[%s17510_s0 + $0x129] sm:$0xff]  ;;  %vm10377_vm8 = vcmask 74752  }
  0x1f   :  { %v204_v46 = vpack.c.bf16 %v152_v43, %v151_v42  ;;  %v205_v47 = vpack.c.bf16 %v154_v45, %v153_v44  ;;  %v155_v48 = vld [vmem:[%s17510_s0 + $0x139] sm:$0xff]  ;;  %v156_v49 = vld [vmem:[%s17510_s0 + $0x141] sm:$0xff]  ;;  %v157_v50 = vld [vmem:[%s17510_s0 + $0x151] sm:$0xff] }
  0x20   :  { %v158_v51 = vld [vmem:[%s17510_s0 + $0x159] sm:$0xff]  ;;  %v206_v52 = vpack.c.bf16 %v156_v49, %v155_v48  ;;  %v159_v54 = vld [vmem:[%s17510_s0 + $0x169] sm:$0xff]  ;;  %v160_v55 = vld [vmem:[%s17510_s0 + $0x171] sm:$0xff] }
  0x21   :  { %v207_v53 = vpack.c.bf16 %v158_v51, %v157_v50  ;;  %v161_v56 = vld [vmem:[%s17510_s0 + $0x1b1] sm:$0xff]  ;;  %v162_v57 = vld [vmem:[%s17510_s0 + $0x1b9] sm:$0xff]  ;;  %v208_v58 = vpack.c.bf16 %v160_v55, %v159_v54  ;;  %v163_v60 = vld [vmem:[%s17510_s0 + $0x1c9] sm:$0xff] }
  0x22   :  { %12041 = vmatmul.mubr.msk.bf16.gmra.mrb[12].mxu0 %vm227_vm2, %v200_v34  ;;  %v209_v59 = vpack.c.bf16 %v162_v57, %v161_v56  ;;  %v164_v61 = vld [vmem:[%s17510_s0 + $0x1d1] sm:$0xff]  ;;  %v165_v62 = vld [vmem:[%s17510_s0 + $0x1e1] sm:$0xff]  ;;  %v166_v63 = vld [vmem:[%s17510_s0 + $0x1e9] sm:$0xff] }
  0x23   :  { %12044 = vmatprep.mubr.msk.bf16.mxu0 %vm227_vm2, %v201_v35  ;;  %v210_v0 = vpack.c.bf16 %v164_v61, %v163_v60  ;;  %v211_v1 = vpack.c.bf16 %v166_v63, %v165_v62  ;;  %v167_v2 = vld [vmem:[%s17510_s0 + $0x1f9] sm:$0xff]  ;;  %v168_v3 = vld [vmem:[%s17510_s0 + $0x201] sm:$0xff]  ;;  %v169_v4 = vld [vmem:[%s17510_s0 + $0x211] sm:$0xff] }
  0x24   :  { %v170_v5 = vld [vmem:[%s17510_s0 + $0x219] sm:$0xff]  ;;  %v212_v7 = vpack.c.bf16 %v168_v3, %v167_v2  ;;  %v171_v9 = vld [vmem:[%s17510_s0 + $0x229] sm:$0xff]  ;;  %v172_v10 = vld [vmem:[%s17510_s0 + $0x231] sm:$0xff] }
  0x25   :  { %v213_v8 = vpack.c.bf16 %v170_v5, %v169_v4  ;;  %v173_v11 = vld [vmem:[%s17510_s0 + $0x241] sm:$0xff]  ;;  %v174_v12 = vld [vmem:[%s17510_s0 + $0x249] sm:$0xff]  ;;  %v214_v13 = vpack.c.bf16 %v172_v10, %v171_v9  ;;  %v175_v15 = vld [vmem:[%s17510_s0 + $0x259] sm:$0xff] }
  0x26   :  { %v215_v14 = vpack.c.bf16 %v174_v12, %v173_v11  ;;  %v176_v16 = vld [vmem:[%s17510_s0 + $0x261] sm:$0xff]  ;;  %v177_v17 = vld [vmem:[%s17510_s0 + $0x271] sm:$0xff]  ;;  %v178_v18 = vld [vmem:[%s17510_s0 + $0x279] sm:$0xff] }
  0x27   :  { %v216_v19 = vpack.c.bf16 %v176_v16, %v175_v15  ;;  %v217_v20 = vpack.c.bf16 %v178_v18, %v177_v17  ;;  %v179_v21 = vld [vmem:[%s17510_s0 + $0x289] sm:$0xff]  ;;  %v180_v22 = vld [vmem:[%s17510_s0 + $0x291] sm:$0xff]  ;;  %v181_v23 = vld [vmem:[%s17510_s0 + $0x2a1] sm:$0xff] }
  0x28   :  { %v182_v24 = vld [vmem:[%s17510_s0 + $0x2a9] sm:$0xff]  ;;  %v218_v25 = vpack.c.bf16 %v180_v22, %v179_v21  ;;  %v1104_v27 = vld [vmem:[%s17511_s1 + $0x6] sm:$0x7]  ;;  %v183_v28 = vld [vmem:[%s17510_s0 + $0x2b9] sm:$0xff] }
  0x29   :  { %v219_v26 = vpack.c.bf16 %v182_v24, %v181_v23  ;;  %v184_v29 = vld [vmem:[%s17510_s0 + $0x2c1] sm:$0xff]  ;;  %v1105_v30 = vpack.c.bf16 %v1104_v27, %v1104_v27  ;;  %v185_v31 = vld [vmem:[%s17510_s0 + $0x2d1] sm:$0xff]  ;;  %v186_v32 = vld [vmem:[%s17510_s0 + $0x2d9] sm:$0xff] }
  0x2a   :  { %12045 = vmatmul.mubr.msk.bf16.gmra.mrb[16].mxu0 %vm227_vm2, %v202_v40  ;;  %v220_v34 = vpack.c.bf16 %v184_v29, %v183_v28  ;;  %v221_v35 = vpack.c.bf16 %v186_v32, %v185_v31  ;;  %v187_v36 = vld [vmem:[%s17510_s0 + $0x2e9] sm:$0xff]  ;;  %v188_v37 = vld [vmem:[%s17510_s0 + $0x2f1] sm:$0xff]  ;;  %v189_v38 = vld [vmem:[%s17510_s0 + $0x301] sm:$0xff] }
  0x2b   :  { %12048 = vmatprep.mubr.msk.bf16.mxu0 %vm227_vm2, %v203_v41  ;;  %v1203_v33 = vand.u32 %v1105_v30, %v14419_v6  ;;  %v190_v39 = vld [vmem:[%s17510_s0 + $0x309] sm:$0xff]  ;;  %v222_v40 = vpack.c.bf16 %v188_v37, %v187_v36  ;;  %v191_v42 = vld [vmem:[%s17510_s0 + $0x319] sm:$0xff]  ;;  %v192_v43 = vld [vmem:[%s17510_s0 + $0x321] sm:$0xff] }
  0x2c   :  { %v223_v41 = vpack.c.bf16 %v190_v39, %v189_v38  ;;  %v31_v44 = vld [vmem:[%s17510_s0] sm:$0xff]  ;;  %v32_v45 = vld [vmem:[%s17510_s0 + $0x8] sm:$0xff]  ;;  %v33_v48 = vld [vmem:[%s17510_s0 + $0x18] sm:$0xff] }
  0x2d   :  { %12158 = vmatprep.subr.bf16.mxu0 %v1203_v33  ;;  %v34_v49 = vld [vmem:[%s17510_s0 + $0x20] sm:$0xff]  ;;  %v35_v50 = vld [vmem:[%s17510_s0 + $0x30] sm:$0xff]  ;;  %v36_v51 = vld [vmem:[%s17510_s0 + $0x38] sm:$0xff] }
  0x2e   :  { %v37_v54 = vld [vmem:[%s17510_s0 + $0x48] sm:$0xff]  ;;  %v38_v55 = vld [vmem:[%s17510_s0 + $0x50] sm:$0xff]  ;;  %v39_v56 = vld [vmem:[%s17510_s0 + $0x60] sm:$0xff] }
  0x2f   :  { %v40_v57 = vld [vmem:[%s17510_s0 + $0x68] sm:$0xff]  ;;  %v41_v60 = vld [vmem:[%s17510_s0 + $0x78] sm:$0xff]  ;;  %v42_v61 = vld [vmem:[%s17510_s0 + $0x80] sm:$0xff] }
  0x30   :  { %v43_v62 = vld [vmem:[%s17510_s0 + $0x90] sm:$0xff]  ;;  %v44_v63 = vld [vmem:[%s17510_s0 + $0x98] sm:$0xff]  ;;  %v45_v2 = vld [vmem:[%s17510_s0 + $0xa8] sm:$0xff] }
  0x31   :  { %v46_v3 = vld [vmem:[%s17510_s0 + $0xb0] sm:$0xff]  ;;  %v47_v4 = vld [vmem:[%s17510_s0 + $0xc0] sm:$0xff]  ;;  %v48_v5 = vld [vmem:[%s17510_s0 + $0xc8] sm:$0xff] }
  0x32   :  { %12049 = vmatmul.mubr.msk.bf16.gmra.mrb[20].mxu0 %vm227_vm2, %v204_v46  ;;  %v224_v46 = vpack.c.bf16 %v192_v43, %v191_v42  ;;  %v49_v9 = vld [vmem:[%s17510_s0 + $0xd8] sm:$0xff]  ;;  %v50_v10 = vld [vmem:[%s17510_s0 + $0xe0] sm:$0xff]  ;;  %v51_v11 = vld [vmem:[%s17510_s0 + $0xf0] sm:$0xff] }
  0x33   :  { %12052 = vmatprep.mubr.msk.bf16.mxu0 %vm227_vm2, %v205_v47  ;;  %v95_v47 = vpack.c.bf16 %v32_v45, %v31_v44  ;;  %v52_v12 = vld [vmem:[%s17510_s0 + $0xf8] sm:$0xff]  ;;  %v53_v15 = vld [vmem:[%s17510_s0 + $0x108] sm:$0xff]  ;;  %v54_v16 = vld [vmem:[%s17510_s0 + $0x110] sm:$0xff] }
  0x34   :  { %v55_v17 = vld [vmem:[%s17510_s0 + $0x120] sm:$0xff]  ;;  %v56_v18 = vld [vmem:[%s17510_s0 + $0x128] sm:$0xff]  ;;  %v57_v21 = vld [vmem:[%s17510_s0 + $0x138] sm:$0xff] }
  0x35   :  { %v58_v22 = vld [vmem:[%s17510_s0 + $0x140] sm:$0xff]  ;;  %v59_v23 = vld [vmem:[%s17510_s0 + $0x150] sm:$0xff]  ;;  %v60_v24 = vld [vmem:[%s17510_s0 + $0x158] sm:$0xff] }
  0x36   :  { %v61_v27 = vld [vmem:[%s17510_s0 + $0x168] sm:$0xff]  ;;  %v62_v28 = vld [vmem:[%s17510_s0 + $0x170] sm:$0xff]  ;;  %v64_v30 = vld [vmem:[%s17510_s0 + $0x1b8] sm:$0xff] }
  0x37   :  { %v63_v29 = vld [vmem:[%s17510_s0 + $0x1b0] sm:$0xff]  ;;  %v14807_v31 = vpack.c.bf16 %v62_v28, %v61_v27  ;;  %v68_v36 = vld [vmem:[%s17510_s0 + $0x1e8] sm:$0xff]  ;;  %v69_v39 = vld [vmem:[%s17510_s0 + $0x1f8] sm:$0xff] }
  0x38   :  { %v111_v32 = vpack.c.bf16 %v64_v30, %v63_v29  ;;  %v72_v42 = vld [vmem:[%s17510_s0 + $0x218] sm:$0xff]  ;;  %v73_v45 = vld [vmem:[%s17510_s0 + $0x228] sm:$0xff]  ;;  %v94_v30 = vld [vmem:[%s17510_s0 + $0x320] sm:$0xff] }
  0x39   :  { %v93_v29 = vld [vmem:[%s17510_s0 + $0x318] sm:$0xff] }
  0x3a   :  { %12053 = vmatmul.mubr.msk.bf16.gmra.mrb[24].mxu0 %vm227_vm2, %v206_v52  ;;  %v14667_v52 = vpack.c.bf16 %v34_v49, %v33_v48  ;;  %v76_v48 = vld [vmem:[%s17510_s0 + $0x248] sm:$0xff] }
  0x3b   :  { %12056 = vmatprep.mubr.msk.bf16.mxu0 %vm227_vm2, %v207_v53  ;;  %v14669_v53 = vpack.c.bf16 %v36_v51, %v35_v50  ;;  %v77_v51 = vld [vmem:[%s17510_s0 + $0x258] sm:$0xff] }
  0x42   :  { %12057 = vmatmul.mubr.msk.bf16.gmra.mrb[28].mxu0 %vm227_vm2, %v208_v58  ;;  %v14687_v58 = vpack.c.bf16 %v38_v55, %v37_v54  ;;  %v78_v54 = vld [vmem:[%s17510_s0 + $0x260] sm:$0xff]  ;;  %v79_v55 = vld [vmem:[%s17510_s0 + $0x270] sm:$0xff] }
  0x43   :  { %12060 = vmatprep.mubr.msk.bf16.mxu0 %vm227_vm2, %v209_v59  ;;  %v14689_v59 = vpack.c.bf16 %v40_v57, %v39_v56  ;;  %v80_v56 = vld [vmem:[%s17510_s0 + $0x278] sm:$0xff]  ;;  %v14884_v57 = vpack.c.bf16 %v78_v54, %v77_v51  ;;  %v1017_v51 = vld [vmem:[%s17510_s0 + $0x6a] sm:$0xff] }
  0x4a   :  { %12061 = vmatmul.mubr.msk.bf16.gmra.mrb[32].mxu0 %vm227_vm2, %v210_v0  ;;  %v14707_v0 = vpack.c.bf16 %v42_v61, %v41_v60  ;;  %v14886_v60 = vpack.c.bf16 %v80_v56, %v79_v55  ;;  %v81_v61 = vld [vmem:[%s17510_s0 + $0x288] sm:$0xff]  ;;  %v1018_v56 = vld [vmem:[%s17510_s0 + $0x7a] sm:$0xff] }
  0x4b   :  { %12064 = vmatprep.mubr.msk.bf16.mxu0 %vm227_vm2, %v211_v1  ;;  %v14709_v1 = vpack.c.bf16 %v44_v63, %v43_v62  ;;  %v82_v62 = vld [vmem:[%s17510_s0 + $0x290] sm:$0xff]  ;;  %v83_v63 = vld [vmem:[%s17510_s0 + $0x2a0] sm:$0xff] }
  0x52   :  { %12065 = vmatmul.mubr.msk.bf16.gmra.mrb[36].mxu0 %vm227_vm2, %v212_v7  ;;  %v14727_v7 = vpack.c.bf16 %v46_v3, %v45_v2  ;;  %v84_v2 = vld [vmem:[%s17510_s0 + $0x2a8] sm:$0xff]  ;;  %v14904_v3 = vpack.c.bf16 %v82_v62, %v81_v61  ;;  %v1020_v62 = vld [vmem:[%s17510_s0 + $0x92] sm:$0xff] }
  0x53   :  { %12068 = vmatprep.mubr.msk.bf16.mxu0 %vm227_vm2, %v213_v8  ;;  %v14729_v8 = vpack.c.bf16 %v48_v5, %v47_v4  ;;  %v14906_v4 = vpack.c.bf16 %v84_v2, %v83_v63  ;;  %v1655_v5 = vld [vmem:[%s17511_s1 + $0x9] sm:$0x7]  ;;  %v1021_v63 = vld [vmem:[%s17510_s0 + $0x9a] sm:$0xff] }
  0x54   :  { %v1019_v61 = vld [vmem:[%s17510_s0 + $0x82] sm:$0xff] }
  0x55   :  { %v15025_v2 = vpack.c.bf16 %v1019_v61, %v1018_v56  ;;  %v1038_v61 = vld [vmem:[%s17510_s0 + $0x16a] sm:$0xff] }
  0x5a   :  { %12069 = vmatmul.mubr.msk.bf16.gmra.mrb[40].mxu0 %vm227_vm2, %v214_v13  ;;  %v14747_v13 = vpack.c.bf16 %v50_v10, %v49_v9  ;;  %v85_v9 = vld [vmem:[%s17510_s0 + $0x2b8] sm:$0xff]  ;;  %v86_v10 = vld [vmem:[%s17510_s0 + $0x2c0] sm:$0xff] }
  0x5b   :  { %12072 = vmatprep.mubr.msk.bf16.mxu0 %vm227_vm2, %v215_v14  ;;  %v14749_v14 = vpack.c.bf16 %v52_v12, %v51_v11  ;;  %v1656_v11 = vpack.c.bf16 %v1655_v5, %v1655_v5  ;;  %v87_v12 = vld [vmem:[%s17510_s0 + $0x2d0] sm:$0xff]  ;;  %v15027_v5 = vpack.c.bf16 %v1021_v63, %v1020_v62 }
  0x5c   :  { %v1039_v62 = vld [vmem:[%s17510_s0 + $0x172] sm:$0xff] }
  0x5d   :  { %v1040_v63 = vld [vmem:[%s17510_s0 + $0x1b2] sm:$0xff] }
  0x62   :  { %12073 = vmatmul.mubr.msk.bf16.gmra.mrb[44].mxu0 %vm227_vm2, %v216_v19  ;;  %v14767_v19 = vpack.c.bf16 %v54_v16, %v53_v15  ;;  %v88_v15 = vld [vmem:[%s17510_s0 + $0x2d8] sm:$0xff]  ;;  %v1754_v16 = vand.u32 %v1656_v11, %v14419_v6  ;;  %v1024_v11 = vld [vmem:[%s17510_s0 + $0xc2] sm:$0xff] }
  0x63   :  { %12076 = vmatprep.mubr.msk.bf16.mxu0 %vm227_vm2, %v217_v20  ;;  %v14769_v20 = vpack.c.bf16 %v56_v18, %v55_v17  ;;  %v14928_v17 = vpack.c.bf16 %v86_v10, %v85_v9  ;;  %v14930_v18 = vpack.c.bf16 %v88_v15, %v87_v12  ;;  %v1022_v9 = vld [vmem:[%s17510_s0 + $0xaa] sm:$0xff]  ;;  %v1023_v10 = vld [vmem:[%s17510_s0 + $0xb2] sm:$0xff] }
  0x64   :  { %v1025_v12 = vld [vmem:[%s17510_s0 + $0xca] sm:$0xff]  ;;  %v15045_v15 = vpack.c.bf16 %v1023_v10, %v1022_v9  ;;  %v1041_v9 = vld [vmem:[%s17510_s0 + $0x1ba] sm:$0xff]  ;;  %v15125_v10 = vpack.c.bf16 %v1039_v62, %v1038_v61  ;;  %v1051_v61 = vld [vmem:[%s17510_s0 + $0x232] sm:$0xff] }
  0x65   :  { %v1052_v62 = vld [vmem:[%s17510_s0 + $0x242] sm:$0xff] }
  0x6a   :  { %12077 = vmatmul.mubr.msk.bf16.gmra.mrb[48].mxu0 %vm227_vm2, %v218_v25  ;;  %v14787_v25 = vpack.c.bf16 %v58_v22, %v57_v21  ;;  %v89_v21 = vld [vmem:[%s17510_s0 + $0x2e8] sm:$0xff]  ;;  %v90_v22 = vld [vmem:[%s17510_s0 + $0x2f0] sm:$0xff] }
  0x6b   :  { %12080 = vmatprep.mubr.msk.bf16.mxu0 %vm227_vm2, %v219_v26  ;;  %v14789_v26 = vpack.c.bf16 %v60_v24, %v59_v23  ;;  %v91_v23 = vld [vmem:[%s17510_s0 + $0x300] sm:$0xff]  ;;  %v92_v24 = vld [vmem:[%s17510_s0 + $0x308] sm:$0xff]  ;;  %v14948_v27 = vpack.c.bf16 %v90_v22, %v89_v21 }
  0x6c   :  { %v14950_v28 = vpack.c.bf16 %v92_v24, %v91_v23  ;;  %v1026_v21 = vld [vmem:[%s17510_s0 + $0xda] sm:$0xff]  ;;  %v1027_v22 = vld [vmem:[%s17510_s0 + $0xe2] sm:$0xff]  ;;  %v1028_v23 = vld [vmem:[%s17510_s0 + $0xf2] sm:$0xff] }
  0x6d   :  { %v1029_v24 = vld [vmem:[%s17510_s0 + $0xfa] sm:$0xff] }
  0x72   :  { %12081 = vmatmul.mubr.msk.bf16.gmra.mrb[52].mxu0 %vm227_vm2, %v220_v34  ;;  %v66_v34 = vld [vmem:[%s17510_s0 + $0x1d0] sm:$0xff] }
  0x73   :  { %12084 = vmatprep.mubr.msk.bf16.mxu0 %vm227_vm2, %v221_v35  ;;  %v67_v35 = vld [vmem:[%s17510_s0 + $0x1e0] sm:$0xff] }
  0x74   :  { %v14826_v38 = vpack.c.bf16 %v68_v36, %v67_v35  ;;  %v1010_v36 = vld [vmem:[%s17510_s0 + $0x1a] sm:$0xff] }
  0x7a   :  { %12085 = vmatmul.mubr.msk.bf16.gmra.mrb[56].mxu0 %vm227_vm2, %v222_v40  ;;  %v70_v40 = vld [vmem:[%s17510_s0 + $0x200] sm:$0xff] }
  0x7b   :  { %12088 = vmatprep.mubr.msk.bf16.mxu0 %vm227_vm2, %v223_v41  ;;  %v71_v41 = vld [vmem:[%s17510_s0 + $0x210] sm:$0xff]  ;;  %v14844_v43 = vpack.c.bf16 %v70_v40, %v69_v39  ;;  %v1011_v39 = vld [vmem:[%s17510_s0 + $0x22] sm:$0xff] }
  0x7c   :  { %v14846_v44 = vpack.c.bf16 %v72_v42, %v71_v41  ;;  %v1012_v40 = vld [vmem:[%s17510_s0 + $0x32] sm:$0xff]  ;;  %v1013_v41 = vld [vmem:[%s17510_s0 + $0x3a] sm:$0xff]  ;;  %v14985_v42 = vpack.c.bf16 %v1011_v39, %v1010_v36  ;;  %v1033_v36 = vld [vmem:[%s17510_s0 + $0x12a] sm:$0xff] }
  0x82   :  { %12089 = vmatmul.mubr.msk.bf16.gmra.mrb[60].mxu0 %vm227_vm2, %v224_v46  ;;  %v74_v46 = vld [vmem:[%s17510_s0 + $0x230] sm:$0xff] }
  0x83   :  { %12094 = vmatprep.mubr.msk.bf16.mxu0 %vm227_vm2, %v95_v47  ;;  %v75_v47 = vld [vmem:[%s17510_s0 + $0x240] sm:$0xff]  ;;  %v14864_v49 = vpack.c.bf16 %v74_v46, %v73_v45  ;;  %v14987_v45 = vpack.c.bf16 %v1013_v41, %v1012_v40  ;;  %v1014_v46 = vld [vmem:[%s17510_s0 + $0x4a] sm:$0xff] }
  0x84   :  { %v14866_v50 = vpack.c.bf16 %v76_v48, %v75_v47  ;;  %v1015_v47 = vld [vmem:[%s17510_s0 + $0x52] sm:$0xff]  ;;  %v1016_v48 = vld [vmem:[%s17510_s0 + $0x62] sm:$0xff]  ;;  %v1034_v41 = vld [vmem:[%s17510_s0 + $0x13a] sm:$0xff] }
  0x85   :  { %v15005_v54 = vpack.c.bf16 %v1015_v47, %v1014_v46  ;;  %v15007_v55 = vpack.c.bf16 %v1017_v51, %v1016_v48  ;;  %v1035_v46 = vld [vmem:[%s17510_s0 + $0x142] sm:$0xff]  ;;  %v1036_v47 = vld [vmem:[%s17510_s0 + $0x152] sm:$0xff]  ;;  %v1037_v48 = vld [vmem:[%s17510_s0 + $0x15a] sm:$0xff] }
  0x86   :  { %v15105_v51 = vpack.c.bf16 %v1035_v46, %v1034_v41  ;;  %v15107_v56 = vpack.c.bf16 %v1037_v48, %v1036_v47  ;;  %v1049_v41 = vld [vmem:[%s17510_s0 + $0x21a] sm:$0xff]  ;;  %v1050_v48 = vld [vmem:[%s17510_s0 + $0x22a] sm:$0xff] }
  0x8a   :  { %12095 = vmatmul.mubr.msk.bf16.vlgmr.msra.gmra.mrb[0].mxu0 %vm227_vm2, %v14667_v52 }
  0x8b   :  { %12098 = vmatprep.mubr.msk.bf16.mxu0 %vm227_vm2, %v14669_v53  ;;  %12159 = vmatpush3.bf16.msra.mxu0 %v1203_v33  ;;  %v65_v33 = vld [vmem:[%s17510_s0 + $0x1c8] sm:$0xff] }
  0x8c   :  { %v14824_v37 = vpack.c.bf16 %v66_v34, %v65_v33  ;;  %12224 = vmatprep.subr.bf16.mxu0 %v1754_v16  ;;  %v1009_v33 = vld [vmem:[%s17510_s0 + $0xa] sm:$0xff]  ;;  %v14968_v34 = vpack.c.bf16 %v94_v30, %v93_v29  ;;  %v15065_v29 = vpack.c.bf16 %v1027_v22, %v1026_v21  ;;  %v15067_v30 = vpack.c.bf16 %v1029_v24, %v1028_v23  ;;  %v1043_v21 = vld [vmem:[%s17510_s0 + $0x1d2] sm:$0xff]  ;;  %v1044_v22 = vld [vmem:[%s17510_s0 + $0x1e2] sm:$0xff] }
  0x8d   :  { %v1045_v23 = vld [vmem:[%s17510_s0 + $0x1ea] sm:$0xff] }
  0x92   :  { %12099 = vmatmul.mubr.msk.bf16.gmra.mrb[4].mxu0 %vm227_vm2, %v14687_v58 }
  0x93   :  { %12102 = vmatprep.mubr.msk.bf16.mxu0 %vm227_vm2, %v14689_v59 }
  0x9a   :  { %12103 = vmatmul.mubr.msk.bf16.gmra.mrb[8].mxu0 %vm227_vm2, %v14707_v0 }
  0x9b   :  { %12106 = vmatprep.mubr.msk.bf16.mxu0 %vm227_vm2, %v14709_v1 }
  0xa2   :  { %12107 = vmatmul.mubr.msk.bf16.gmra.mrb[12].mxu0 %vm227_vm2, %v14727_v7 }
  0xa3   :  { %12110 = vmatprep.mubr.msk.bf16.mxu0 %vm227_vm2, %v14729_v8 }
  0xaa   :  { %12111 = vmatmul.mubr.msk.bf16.gmra.mrb[16].mxu0 %vm227_vm2, %v14747_v13 }
  0xab   :  { %12114 = vmatprep.mubr.msk.bf16.mxu0 %vm227_vm2, %v14749_v14 }
  0xb2   :  { %12115 = vmatmul.mubr.msk.bf16.gmra.mrb[20].mxu0 %vm227_vm2, %v14767_v19 }
  0xb3   :  { %12118 = vmatprep.mubr.msk.bf16.mxu0 %vm227_vm2, %v14769_v20 }
  0xba   :  { %12119 = vmatmul.mubr.msk.bf16.gmra.mrb[24].mxu0 %vm227_vm2, %v14787_v25 }
  0xbb   :  { %12122 = vmatprep.mubr.msk.bf16.mxu0 %vm227_vm2, %v14789_v26 }
  0xc2   :  { %12123 = vmatmul.mubr.msk.bf16.gmra.mrb[28].mxu0 %vm227_vm2, %v14807_v31 }
  0xc3   :  { %12126 = vmatprep.mubr.msk.bf16.mxu0 %vm227_vm2, %v111_v32  ;;  %v1008_v32 = vld [vmem:[%s17510_s0 + $0x2] sm:$0xff] }
  0xc4   :  { %v1072_v35 = vpack.c.bf16 %v1009_v33, %v1008_v32  ;;  %v1030_v32 = vld [vmem:[%s17510_s0 + $0x10a] sm:$0xff]  ;;  %v1031_v33 = vld [vmem:[%s17510_s0 + $0x112] sm:$0xff] }
  0xc5   :  { %v15085_v39 = vpack.c.bf16 %v1031_v33, %v1030_v32  ;;  %v15144_v32 = vpack.c.bf16 %v1045_v23, %v1044_v22  ;;  %v1046_v33 = vld [vmem:[%s17510_s0 + $0x1fa] sm:$0xff]  ;;  %v1056_v22 = vld [vmem:[%s17510_s0 + $0x272] sm:$0xff] }
  0xc6   :  { %v1057_v23 = vld [vmem:[%s17510_s0 + $0x27a] sm:$0xff] }
  0xca   :  { %12127 = vmatmul.mubr.msk.bf16.gmra.mrb[32].mxu0 %vm227_vm2, %v14824_v37 }
  0xcb   :  { %12130 = vmatprep.mubr.msk.bf16.mxu0 %vm227_vm2, %v14826_v38 }
  0xd2   :  { %12131 = vmatmul.mubr.msk.bf16.gmra.mrb[36].mxu0 %vm227_vm2, %v14844_v43 }
  0xd3   :  { %12134 = vmatprep.mubr.msk.bf16.mxu0 %vm227_vm2, %v14846_v44 }
  0xda   :  { %12135 = vmatmul.mubr.msk.bf16.gmra.mrb[40].mxu0 %vm227_vm2, %v14864_v49 }
  0xdb   :  { %12138 = vmatprep.mubr.msk.bf16.mxu0 %vm227_vm2, %v14866_v50 }
  0xe2   :  { %12139 = vmatmul.mubr.msk.bf16.gmra.mrb[44].mxu0 %vm227_vm2, %v14884_v57 }
  0xe3   :  { %12142 = vmatprep.mubr.msk.bf16.mxu0 %vm227_vm2, %v14886_v60 }
  0xea   :  { %12143 = vmatmul.mubr.msk.bf16.gmra.mrb[48].mxu0 %vm227_vm2, %v14904_v3 }
  0xeb   :  { %12146 = vmatprep.mubr.msk.bf16.mxu0 %vm227_vm2, %v14906_v4 }
  0xf2   :  { %12147 = vmatmul.mubr.msk.bf16.gmra.mrb[52].mxu0 %vm227_vm2, %v14928_v17 }
  0xf3   :  { %12150 = vmatprep.mubr.msk.bf16.mxu0 %vm227_vm2, %v14930_v18 }
  0xfa   :  { %12151 = vmatmul.mubr.msk.bf16.gmra.mrb[56].mxu0 %vm227_vm2, %v14948_v27 }
  0xfb   :  { %12154 = vmatprep.mubr.msk.bf16.mxu0 %vm227_vm2, %v14950_v28 }
 0x102   :  { %12155 = vmatmul.mubr.msk.bf16.gmra.mrb[60].mxu0 %vm227_vm2, %v14968_v34 }
 0x103   :  { %12160 = vmatprep.mubr.msk.bf16.mxu0 %vm227_vm2, %v1072_v35  ;;  %v1032_v35 = vld [vmem:[%s17510_s0 + $0x122] sm:$0xff] }
 0x104   :  { %v15087_v40 = vpack.c.bf16 %v1033_v36, %v1032_v35  ;;  %v1047_v35 = vld [vmem:[%s17510_s0 + $0x202] sm:$0xff]  ;;  %v1048_v36 = vld [vmem:[%s17510_s0 + $0x212] sm:$0xff] }
 0x105   :  { %v15162_v46 = vpack.c.bf16 %v1047_v35, %v1046_v33  ;;  %v15164_v47 = vpack.c.bf16 %v1049_v41, %v1048_v36  ;;  %v15204_v35 = vpack.c.bf16 %v1057_v23, %v1056_v22  ;;  %v1058_v36 = vld [vmem:[%s17510_s0 + $0x28a] sm:$0xff]  ;;  %v1059_v41 = vld [vmem:[%s17510_s0 + $0x292] sm:$0xff]  ;;  %v1063_v22 = vld [vmem:[%s17510_s0 + $0x2c2] sm:$0xff] }
 0x10a   :  { %12161 = vmatmul.mubr.msk.bf16.vlgmr.msra.gmra.mrb[0].mxu0 %vm227_vm2, %v14985_v42 }
 0x10b   :  { %12164 = vmatprep.mubr.msk.bf16.mxu0 %vm227_vm2, %v14987_v45  ;;  %12225 = vmatpush3.bf16.msra.mxu0 %v1754_v16  ;;  %v15047_v16 = vpack.c.bf16 %v1025_v12, %v1024_v11  ;;  %v1088_v11 = vpack.c.bf16 %v1041_v9, %v1040_v63  ;;  %v1042_v12 = vld [vmem:[%s17510_s0 + $0x1ca] sm:$0xff]  ;;  %v15182_v9 = vpack.c.bf16 %v1051_v61, %v1050_v48  ;;  %v1060_v48 = vld [vmem:[%s17510_s0 + $0x2a2] sm:$0xff] }
 0x10c   :  { %v15142_v24 = vpack.c.bf16 %v1043_v21, %v1042_v12  ;;  %v1053_v63 = vld [vmem:[%s17510_s0 + $0x24a] sm:$0xff]  ;;  %v1054_v12 = vld [vmem:[%s17510_s0 + $0x25a] sm:$0xff]  ;;  %v1055_v21 = vld [vmem:[%s17510_s0 + $0x262] sm:$0xff] }
 0x10d   :  { %v15202_v33 = vpack.c.bf16 %v1055_v21, %v1054_v12  ;;  %v1061_v61 = vld [vmem:[%s17510_s0 + $0x2aa] sm:$0xff]  ;;  %v1062_v21 = vld [vmem:[%s17510_s0 + $0x2ba] sm:$0xff] }
 0x10e   :  { %v2205_v12 = vld [vmem:[%s17511_s1 + $0xc] sm:$0x7] }
 0x10f   :  { %v2206_v23 = vpack.c.bf16 %v2205_v12, %v2205_v12  ;;  %v1066_v12 = vld [vmem:[%s17510_s0 + $0x2ea] sm:$0xff] }
 0x112   :  { %12165 = vmatmul.mubr.msk.bf16.gmra.mrb[4].mxu0 %vm227_vm2, %v15005_v54 }
 0x113   :  { %12168 = vmatprep.mubr.msk.bf16.mxu0 %vm227_vm2, %v15007_v55 }
 0x11a   :  { %12169 = vmatmul.mubr.msk.bf16.gmra.mrb[8].mxu0 %vm227_vm2, %v15025_v2 }
 0x11b   :  { %12172 = vmatprep.mubr.msk.bf16.mxu0 %vm227_vm2, %v15027_v5 }
 0x122   :  { %12173 = vmatmul.mubr.msk.bf16.gmra.mrb[12].mxu0 %vm227_vm2, %v15045_v15 }
 0x123   :  { %12176 = vmatprep.mubr.msk.bf16.mxu0 %vm227_vm2, %v15047_v16 }
 0x12a   :  { %12177 = vmatmul.mubr.msk.bf16.gmra.mrb[16].mxu0 %vm227_vm2, %v15065_v29 }
 0x12b   :  { %12180 = vmatprep.mubr.msk.bf16.mxu0 %vm227_vm2, %v15067_v30 }
 0x132   :  { %12181 = vmatmul.mubr.msk.bf16.gmra.mrb[20].mxu0 %vm227_vm2, %v15085_v39 }
 0x133   :  { %12184 = vmatprep.mubr.msk.bf16.mxu0 %vm227_vm2, %v15087_v40 }
 0x13a   :  { %12185 = vmatmul.mubr.msk.bf16.gmra.mrb[24].mxu0 %vm227_vm2, %v15105_v51 }
 0x13b   :  { %12188 = vmatprep.mubr.msk.bf16.mxu0 %vm227_vm2, %v15107_v56 }
 0x142   :  { %12189 = vmatmul.mubr.msk.bf16.gmra.mrb[28].mxu0 %vm227_vm2, %v15125_v10 }
 0x143   :  { %12192 = vmatprep.mubr.msk.bf16.mxu0 %vm227_vm2, %v1088_v11  ;;  %v15184_v11 = vpack.c.bf16 %v1053_v63, %v1052_v62  ;;  %v15222_v62 = vpack.c.bf16 %v1059_v41, %v1058_v36  ;;  %v15224_v63 = vpack.c.bf16 %v1061_v61, %v1060_v48  ;;  %v1064_v36 = vld [vmem:[%s17510_s0 + $0x2d2] sm:$0xff]  ;;  %v1065_v41 = vld [vmem:[%s17510_s0 + $0x2da] sm:$0xff]  ;;  %v2304_v48 = vand.u32 %v2206_v23, %v14419_v6 }
 0x144   :  { %v15246_v61 = vpack.c.bf16 %v1063_v22, %v1062_v21  ;;  %v1068_v21 = vld [vmem:[%s17510_s0 + $0x302] sm:$0xff]  ;;  %v1069_v22 = vld [vmem:[%s17510_s0 + $0x30a] sm:$0xff] }
 0x145   :  { %17532 = vst [vmem:[#allocation6_spill] sm:$0xff] %v15222_v62  ;;  %17533 = vst [vmem:[#allocation7_spill] sm:$0xff] %v15224_v63  ;;  %12290 = vmatprep.subr.bf16.mxu0 %v2304_v48 }
 0x146   :  { %17534 = vst [vmem:[#allocation8_spill] sm:$0xff] %v15246_v61 }
 0x14a   :  { %12193 = vmatmul.mubr.msk.bf16.gmra.mrb[32].mxu0 %vm227_vm2, %v15142_v24 }
 0x14b   :  { %12196 = vmatprep.mubr.msk.bf16.mxu0 %vm227_vm2, %v15144_v32 }
 0x152   :  { %12197 = vmatmul.mubr.msk.bf16.gmra.mrb[36].mxu0 %vm227_vm2, %v15162_v46 }
 0x153   :  { %12200 = vmatprep.mubr.msk.bf16.mxu0 %vm227_vm2, %v15164_v47 }
 0x15a   :  { %12201 = vmatmul.mubr.msk.bf16.gmra.mrb[40].mxu0 %vm227_vm2, %v15182_v9 }
 0x15b   :  { %12204 = vmatprep.mubr.msk.bf16.mxu0 %vm227_vm2, %v15184_v11 }
 0x162   :  { %12205 = vmatmul.mubr.msk.bf16.gmra.mrb[44].mxu0 %vm227_vm2, %v15202_v33 }
 0x163   :  { %12208 = vmatprep.mubr.msk.bf16.mxu0 %vm227_vm2, %v15204_v35 }
 0x16a   :  { %12209 = vmatmul.mubr.msk.bf16.gmra.mrb[48].mxu0 %vm227_vm2, %v15222_v62  ;;  %v1067_v62 = vld [vmem:[%s17510_s0 + $0x2f2] sm:$0xff] }
 0x16b   :  { %12212 = vmatprep.mubr.msk.bf16.mxu0 %vm227_vm2, %v15224_v63  ;;  %v15248_v63 = vpack.c.bf16 %v1065_v41, %v1064_v36  ;;  %v15266_v23 = vpack.c.bf16 %v1067_v62, %v1066_v12  ;;  %v15268_v36 = vpack.c.bf16 %v1069_v22, %v1068_v21  ;;  %v1070_v41 = vld [vmem:[%s17510_s0 + $0x31a] sm:$0xff] }
 0x16c   :  { %v10599_v62 = vld [vmem:[%s17510_s0 + $0xc1] sm:$0xff] }
 0x16d   :  { %17535 = vst [vmem:[#allocation9_spill] sm:$0xff] %v15248_v63  ;;  %v10602_v12 = vld [vmem:[%s17510_s0 + $0xe1] sm:$0xff] }
 0x172   :  { %12213 = vmatmul.mubr.msk.bf16.gmra.mrb[52].mxu0 %vm227_vm2, %v15246_v61 }
 0x173   :  { %12216 = vmatprep.mubr.msk.bf16.mxu0 %vm227_vm2, %v15248_v63  ;;  %v1071_v63 = vld [vmem:[%s17510_s0 + $0x322] sm:$0xff] }
 0x174   :  { %v15280_v61 = vpack.c.bf16 %v1071_v63, %v1070_v41  ;;  %v10600_v63 = vld [vmem:[%s17510_s0 + $0xc9] sm:$0xff]  ;;  %v10603_v41 = vld [vmem:[%s17510_s0 + $0xf1] sm:$0xff] }
 0x175   :  { %v15447_v21 = vpack.c.bf16 %v10600_v63, %v10599_v62  ;;  %v10619_v63 = vld [vmem:[%s17510_s0 + $0x1e1] sm:$0xff] }
 0x17a   :  { %12217 = vmatmul.mubr.msk.bf16.gmra.mrb[56].mxu0 %vm227_vm2, %v15266_v23 }
 0x17b   :  { %12220 = vmatprep.mubr.msk.bf16.mxu0 %vm227_vm2, %v15268_v36 }
 0x182   :  { %12221 = vmatmul.mubr.msk.bf16.gmra.mrb[60].mxu0 %vm227_vm2, %v15280_v61 }
 0x183   :  { %12226 = vmatprep.mubr.msk.bf16.mxu0 %vm227_vm2, %v14667_v52  ;;  %v10519_v52 = vld [vmem:[%s17510_s0 + $0x180] sm:$0xff] }
 0x18a   :  { %12227 = vmatmul.mubr.msk.bf16.vlgmr.msra.gmra.mrb[0].mxu0 %vm227_vm2, %v14669_v53  ;;  %v10520_v53 = vld [vmem:[%s17510_s0 + $0x188] sm:$0xff] }
 0x18b   :  { %12230 = vmatprep.mubr.msk.bf16.mxu0 %vm227_vm2, %v14687_v58  ;;  %12291 = vmatpush3.bf16.msra.mxu0 %v2304_v48  ;;  %v15320_v58 = vpack.c.bf16 %v10520_v53, %v10519_v52  ;;  %v10601_v48 = vld [vmem:[%s17510_s0 + $0xd9] sm:$0xff]  ;;  %v10605_v53 = vld [vmem:[%s17510_s0 + $0x109] sm:$0xff] }
 0x18c   :  { %v15449_v22 = vpack.c.bf16 %v10602_v12, %v10601_v48  ;;  %v10604_v52 = vld [vmem:[%s17510_s0 + $0xf9] sm:$0xff]  ;;  %v10620_v48 = vld [vmem:[%s17510_s0 + $0x1e9] sm:$0xff] }
 0x18d   :  { %v10621_v12 = vld [vmem:[%s17510_s0 + $0x1f9] sm:$0xff] }
 0x192   :  { %12231 = vmatmul.mubr.msk.bf16.gmra.mrb[4].mxu0 %vm227_vm2, %v14689_v59  ;;  %v2755_v59 = vld [vmem:[%s17511_s1 + $0xf] sm:$0x7] }
 0x193   :  { %12234 = vmatprep.mubr.msk.bf16.mxu0 %vm227_vm2, %v14707_v0  ;;  %v2756_v0 = vpack.c.bf16 %v2755_v59, %v2755_v59  ;;  %v10606_v59 = vld [vmem:[%s17510_s0 + $0x111] sm:$0xff] }
 0x19a   :  { %12235 = vmatmul.mubr.msk.bf16.gmra.mrb[8].mxu0 %vm227_vm2, %v14709_v1  ;;  %v2854_v1 = vand.u32 %v2756_v0, %v14419_v6  ;;  %v15467_v0 = vpack.c.bf16 %v10604_v52, %v10603_v41  ;;  %v10622_v41 = vld [vmem:[%s17510_s0 + $0x201] sm:$0xff]  ;;  %v15544_v52 = vpack.c.bf16 %v10620_v48, %v10619_v63  ;;  %v10633_v63 = vld [vmem:[%s17510_s0 + $0x289] sm:$0xff]  ;;  %v10634_v48 = vld [vmem:[%s17510_s0 + $0x291] sm:$0xff] }
 0x19b   :  { %12238 = vmatprep.mubr.msk.bf16.mxu0 %vm227_vm2, %v14727_v7  ;;  %v10551_v7 = vld [vmem:[%s17510_s0 + $0x330] sm:$0xff] }
 0x19c   :  { %12356 = vmatprep.subr.bf16.mxu0 %v2854_v1 }
 0x1a2   :  { %12239 = vmatmul.mubr.msk.bf16.gmra.mrb[12].mxu0 %vm227_vm2, %v14729_v8  ;;  %v10552_v8 = vld [vmem:[%s17510_s0 + $0x338] sm:$0xff] }
 0x1a3   :  { %12242 = vmatprep.mubr.msk.bf16.mxu0 %vm227_vm2, %v14747_v13  ;;  %v10585_v13 = vld [vmem:[%s17510_s0 + $0x19] sm:$0xff] }
 0x1aa   :  { %12243 = vmatmul.mubr.msk.bf16.gmra.mrb[16].mxu0 %vm227_vm2, %v14749_v14  ;;  %v10586_v14 = vld [vmem:[%s17510_s0 + $0x21] sm:$0xff] }
 0x1ab   :  { %12246 = vmatprep.mubr.msk.bf16.mxu0 %vm227_vm2, %v14767_v19  ;;  %v15370_v19 = vpack.c.bf16 %v10552_v8, %v10551_v7  ;;  %v10607_v7 = vld [vmem:[%s17510_s0 + $0x121] sm:$0xff]  ;;  %v10608_v8 = vld [vmem:[%s17510_s0 + $0x129] sm:$0xff] }
 0x1b2   :  { %12247 = vmatmul.mubr.msk.bf16.gmra.mrb[20].mxu0 %vm227_vm2, %v14769_v20  ;;  %v2173_v20 = vpack.c.bf16 %v10586_v14, %v10585_v13  ;;  %v10609_v13 = vld [vmem:[%s17510_s0 + $0x139] sm:$0xff]  ;;  %v10610_v14 = vld [vmem:[%s17510_s0 + $0x141] sm:$0xff] }
 0x1b3   :  { %12250 = vmatprep.mubr.msk.bf16.mxu0 %vm227_vm2, %v14787_v25  ;;  %v10587_v25 = vld [vmem:[%s17510_s0 + $0x31] sm:$0xff] }
 0x1ba   :  { %12251 = vmatmul.mubr.msk.bf16.gmra.mrb[24].mxu0 %vm227_vm2, %v14789_v26  ;;  %v10588_v26 = vld [vmem:[%s17510_s0 + $0x39] sm:$0xff] }
 0x1bb   :  { %12254 = vmatprep.mubr.msk.bf16.mxu0 %vm227_vm2, %v14807_v31  ;;  %v10589_v31 = vld [vmem:[%s17510_s0 + $0x49] sm:$0xff] }
 0x1c2   :  { %12255 = vmatmul.mubr.msk.bf16.gmra.mrb[28].mxu0 %vm227_vm2, %v15320_v58 }
 0x1c3   :  { %12258 = vmatprep.mubr.msk.bf16.mxu0 %vm227_vm2, %v14824_v37  ;;  %v10590_v37 = vld [vmem:[%s17510_s0 + $0x51] sm:$0xff] }
 0x1ca   :  { %12259 = vmatmul.mubr.msk.bf16.gmra.mrb[32].mxu0 %vm227_vm2, %v14826_v38  ;;  %v15387_v38 = vpack.c.bf16 %v10588_v26, %v10587_v25  ;;  %v15489_v25 = vpack.c.bf16 %v10610_v14, %v10609_v13  ;;  %v10611_v26 = vld [vmem:[%s17510_s0 + $0x151] sm:$0xff] }
 0x1cb   :  { %12262 = vmatprep.mubr.msk.bf16.mxu0 %vm227_vm2, %v14844_v43  ;;  %v15389_v43 = vpack.c.bf16 %v10590_v37, %v10589_v31  ;;  %v10612_v31 = vld [vmem:[%s17510_s0 + $0x159] sm:$0xff]  ;;  %v10613_v37 = vld [vmem:[%s17510_s0 + $0x169] sm:$0xff]  ;;  %v10626_v13 = vld [vmem:[%s17510_s0 + $0x231] sm:$0xff] }
 0x1d2   :  { %12263 = vmatmul.mubr.msk.bf16.gmra.mrb[36].mxu0 %vm227_vm2, %v14846_v44  ;;  %v10591_v44 = vld [vmem:[%s17510_s0 + $0x61] sm:$0xff] }
 0x1d3   :  { %12266 = vmatprep.mubr.msk.bf16.mxu0 %vm227_vm2, %v14864_v49  ;;  %v10592_v49 = vld [vmem:[%s17510_s0 + $0x69] sm:$0xff] }
 0x1da   :  { %12267 = vmatmul.mubr.msk.bf16.gmra.mrb[40].mxu0 %vm227_vm2, %v14866_v50  ;;  %v10593_v50 = vld [vmem:[%s17510_s0 + $0x79] sm:$0xff] }
 0x1db   :  { %12270 = vmatprep.mubr.msk.bf16.mxu0 %vm227_vm2, %v14884_v57  ;;  %v10594_v57 = vld [vmem:[%s17510_s0 + $0x81] sm:$0xff] }
 0x1e2   :  { %12271 = vmatmul.mubr.msk.bf16.gmra.mrb[44].mxu0 %vm227_vm2, %v14886_v60  ;;  %v15407_v60 = vpack.c.bf16 %v10592_v49, %v10591_v44  ;;  %v10614_v44 = vld [vmem:[%s17510_s0 + $0x171] sm:$0xff]  ;;  %v15507_v49 = vpack.c.bf16 %v10612_v31, %v10611_v26  ;;  %v10627_v31 = vld [vmem:[%s17510_s0 + $0x241] sm:$0xff] }
 0x1e3   :  { %12274 = vmatprep.mubr.msk.bf16.mxu0 %vm227_vm2, %v14904_v3  ;;  %v15409_v3 = vpack.c.bf16 %v10594_v57, %v10593_v50  ;;  %v15509_v50 = vpack.c.bf16 %v10614_v44, %v10613_v37  ;;  %v10615_v57 = vld [vmem:[%s17510_s0 + $0x181] sm:$0xff]  ;;  %v10628_v37 = vld [vmem:[%s17510_s0 + $0x249] sm:$0xff]  ;;  %v10629_v44 = vld [vmem:[%s17510_s0 + $0x259] sm:$0xff] }
 0x1ea   :  { %12275 = vmatmul.mubr.msk.bf16.gmra.mrb[48].mxu0 %vm227_vm2, %v14906_v4  ;;  %v10595_v4 = vld [vmem:[%s17510_s0 + $0x91] sm:$0xff] }
 0x1eb   :  { %12278 = vmatprep.mubr.msk.bf16.mxu0 %vm227_vm2, %v14928_v17  ;;  %v10596_v17 = vld [vmem:[%s17510_s0 + $0x99] sm:$0xff] }
 0x1f2   :  { %12279 = vmatmul.mubr.msk.bf16.gmra.mrb[52].mxu0 %vm227_vm2, %v14930_v18  ;;  %v10597_v18 = vld [vmem:[%s17510_s0 + $0xa9] sm:$0xff] }
 0x1f3   :  { %12282 = vmatprep.mubr.msk.bf16.mxu0 %vm227_vm2, %v14948_v27  ;;  %v10598_v27 = vld [vmem:[%s17510_s0 + $0xb1] sm:$0xff] }
 0x1fa   :  { %12283 = vmatmul.mubr.msk.bf16.gmra.mrb[56].mxu0 %vm227_vm2, %v14950_v28  ;;  %v15427_v28 = vpack.c.bf16 %v10596_v17, %v10595_v4  ;;  %v10616_v4 = vld [vmem:[%s17510_s0 + $0x189] sm:$0xff] }
 0x1fb   :  { %12286 = vmatprep.mubr.msk.bf16.mxu0 %vm227_vm2, %v14968_v34  ;;  %v15429_v34 = vpack.c.bf16 %v10598_v27, %v10597_v18  ;;  %v10617_v17 = vld [vmem:[%s17510_s0 + $0x1c9] sm:$0xff]  ;;  %v10618_v18 = vld [vmem:[%s17510_s0 + $0x1d1] sm:$0xff]  ;;  %v15527_v27 = vpack.c.bf16 %v10616_v4, %v10615_v57  ;;  %v10630_v57 = vld [vmem:[%s17510_s0 + $0x261] sm:$0xff]  ;;  %v15584_v4 = vpack.c.bf16 %v10628_v37, %v10627_v31 }
 0x1fc   :  { %v2189_v62 = vpack.c.bf16 %v10618_v18, %v10617_v17  ;;  %v15586_v17 = vpack.c.bf16 %v10630_v57, %v10629_v44  ;;  %v10631_v18 = vld [vmem:[%s17510_s0 + $0x271] sm:$0xff] }
 0x1fd   :  { %v3306_v44 = vld [vmem:[%s17511_s1 + $0x12] sm:$0x7] }
 0x1fe   :  { %v10639_v57 = vld [vmem:[%s17510_s0 + $0x2d1] sm:$0xff] }
 0x202   :  { %12287 = vmatmul.mubr.msk.bf16.gmra.mrb[60].mxu0 %vm227_vm2, %v15370_v19 }
 0x203   :  { %12292 = vmatprep.mubr.msk.bf16.mxu0 %vm227_vm2, %v2173_v20  ;;  %v15487_v20 = vpack.c.bf16 %v10608_v8, %v10607_v7  ;;  %v10624_v7 = vld [vmem:[%s17510_s0 + $0x219] sm:$0xff]  ;;  %v10625_v8 = vld [vmem:[%s17510_s0 + $0x229] sm:$0xff] }
 0x204   :  { %v15566_v26 = vpack.c.bf16 %v10626_v13, %v10625_v8  ;;  %v10637_v8 = vld [vmem:[%s17510_s0 + $0x2b9] sm:$0xff]  ;;  %v10638_v13 = vld [vmem:[%s17510_s0 + $0x2c1] sm:$0xff] }
 0x205   :  { %v15626_v37 = vpack.c.bf16 %v10638_v13, %v10637_v8  ;;  %v10643_v13 = vld [vmem:[%s17510_s0 + $0x301] sm:$0xff] }
 0x20a   :  { %12293 = vmatmul.mubr.msk.bf16.vlgmr.msra.gmra.mrb[0].mxu0 %vm227_vm2, %v15387_v38 }
 0x20b   :  { %12296 = vmatprep.mubr.msk.bf16.mxu0 %vm227_vm2, %v15389_v43  ;;  %12357 = vmatpush3.bf16.msra.mxu0 %v2854_v1  ;;  %v15469_v1 = vpack.c.bf16 %v10606_v59, %v10605_v53  ;;  %v15546_v53 = vpack.c.bf16 %v10622_v41, %v10621_v12  ;;  %v10623_v59 = vld [vmem:[%s17510_s0 + $0x211] sm:$0xff]  ;;  %v15606_v41 = vpack.c.bf16 %v10634_v48, %v10633_v63  ;;  %v10641_v63 = vld [vmem:[%s17510_s0 + $0x2e9] sm:$0xff] }
 0x20c   :  { %v15564_v14 = vpack.c.bf16 %v10624_v7, %v10623_v59  ;;  %v10635_v59 = vld [vmem:[%s17510_s0 + $0x2a1] sm:$0xff]  ;;  %v10636_v7 = vld [vmem:[%s17510_s0 + $0x2a9] sm:$0xff]  ;;  %v10642_v48 = vld [vmem:[%s17510_s0 + $0x2f1] sm:$0xff] }
 0x20d   :  { %v15624_v31 = vpack.c.bf16 %v10636_v7, %v10635_v59  ;;  %v15650_v8 = vpack.c.bf16 %v10642_v48, %v10641_v63  ;;  %v10647_v48 = vld [vmem:[%s17510_s0 + $0x331] sm:$0xff] }
 0x20f   :  { %17537 = vst [vmem:[#allocation11_spill] sm:$0xff] %v15650_v8 }
 0x212   :  { %12297 = vmatmul.mubr.msk.bf16.gmra.mrb[4].mxu0 %vm227_vm2, %v15407_v60 }
 0x213   :  { %12300 = vmatprep.mubr.msk.bf16.mxu0 %vm227_vm2, %v15409_v3 }
 0x21a   :  { %12301 = vmatmul.mubr.msk.bf16.gmra.mrb[8].mxu0 %vm227_vm2, %v15427_v28 }
 0x21b   :  { %12304 = vmatprep.mubr.msk.bf16.mxu0 %vm227_vm2, %v15429_v34 }
 0x222   :  { %12305 = vmatmul.mubr.msk.bf16.gmra.mrb[12].mxu0 %vm227_vm2, %v15447_v21 }
 0x223   :  { %12308 = vmatprep.mubr.msk.bf16.mxu0 %vm227_vm2, %v15449_v22 }
 0x22a   :  { %12309 = vmatmul.mubr.msk.bf16.gmra.mrb[16].mxu0 %vm227_vm2, %v15467_v0 }
 0x22b   :  { %12312 = vmatprep.mubr.msk.bf16.mxu0 %vm227_vm2, %v15469_v1 }
 0x232   :  { %12313 = vmatmul.mubr.msk.bf16.gmra.mrb[20].mxu0 %vm227_vm2, %v15487_v20 }
 0x233   :  { %12316 = vmatprep.mubr.msk.bf16.mxu0 %vm227_vm2, %v15489_v25 }
 0x23a   :  { %12317 = vmatmul.mubr.msk.bf16.gmra.mrb[24].mxu0 %vm227_vm2, %v15507_v49 }
 0x23b   :  { %12320 = vmatprep.mubr.msk.bf16.mxu0 %vm227_vm2, %v15509_v50 }
 0x242   :  { %12321 = vmatmul.mubr.msk.bf16.gmra.mrb[28].mxu0 %vm227_vm2, %v15527_v27 }
 0x243   :  { %12324 = vmatprep.mubr.msk.bf16.mxu0 %vm227_vm2, %v2189_v62  ;;  %v10632_v62 = vld [vmem:[%s17510_s0 + $0x279] sm:$0xff] }
 0x244   :  { %v15604_v12 = vpack.c.bf16 %v10632_v62, %v10631_v18  ;;  %v10640_v18 = vld [vmem:[%s17510_s0 + $0x2d9] sm:$0xff]  ;;  %v3307_v62 = vpack.c.bf16 %v3306_v44, %v3306_v44  ;;  %v10644_v44 = vld [vmem:[%s17510_s0 + $0x309] sm:$0xff] }
 0x245   :  { %v15648_v7 = vpack.c.bf16 %v10640_v18, %v10639_v57  ;;  %v10645_v57 = vld [vmem:[%s17510_s0 + $0x319] sm:$0xff]  ;;  %v10646_v18 = vld [vmem:[%s17510_s0 + $0x321] sm:$0xff] }
 0x246   :  { %v3405_v59 = vand.u32 %v3307_v62, %v14419_v6  ;;  %v15668_v62 = vpack.c.bf16 %v10644_v44, %v10643_v13  ;;  %v15670_v63 = vpack.c.bf16 %v10646_v18, %v10645_v57  ;;  %v10787_v13 = vld [vmem:[%s17510_s0 + $0xa8] sm:$0xff]  ;;  %v10788_v44 = vld [vmem:[%s17510_s0 + $0xb0] sm:$0xff]  ;;  %v10789_v57 = vld [vmem:[%s17510_s0 + $0xc0] sm:$0xff] }
 0x247   :  { %17536 = vst [vmem:[#allocation10_spill] sm:$0xff] %v15648_v7  ;;  %v10790_v18 = vld [vmem:[%s17510_s0 + $0xc8] sm:$0xff] }
 0x248   :  { %12422 = vmatprep.subr.bf16.mxu0 %v3405_v59 }
 0x24a   :  { %12325 = vmatmul.mubr.msk.bf16.gmra.mrb[32].mxu0 %vm227_vm2, %v15544_v52 }
 0x24b   :  { %12328 = vmatprep.mubr.msk.bf16.mxu0 %vm227_vm2, %v15546_v53 }
 0x252   :  { %12329 = vmatmul.mubr.msk.bf16.gmra.mrb[36].mxu0 %vm227_vm2, %v15564_v14 }
 0x253   :  { %12332 = vmatprep.mubr.msk.bf16.mxu0 %vm227_vm2, %v15566_v26 }
 0x25a   :  { %12333 = vmatmul.mubr.msk.bf16.gmra.mrb[40].mxu0 %vm227_vm2, %v15584_v4 }
 0x25b   :  { %12336 = vmatprep.mubr.msk.bf16.mxu0 %vm227_vm2, %v15586_v17 }
 0x262   :  { %12337 = vmatmul.mubr.msk.bf16.gmra.mrb[44].mxu0 %vm227_vm2, %v15604_v12 }
 0x263   :  { %12340 = vmatprep.mubr.msk.bf16.mxu0 %vm227_vm2, %v15606_v41 }
 0x26a   :  { %12341 = vmatmul.mubr.msk.bf16.gmra.mrb[48].mxu0 %vm227_vm2, %v15624_v31 }
 0x26b   :  { %12344 = vmatprep.mubr.msk.bf16.mxu0 %vm227_vm2, %v15626_v37 }
 0x272   :  { %12345 = vmatmul.mubr.msk.bf16.gmra.mrb[52].mxu0 %vm227_vm2, %v15648_v7 }
 0x273   :  { %12348 = vmatprep.mubr.msk.bf16.mxu0 %vm227_vm2, %v15650_v8  ;;  %v10648_v8 = vld [vmem:[%s17510_s0 + $0x339] sm:$0xff] }
 0x274   :  { %v15682_v7 = vpack.c.bf16 %v10648_v8, %v10647_v48  ;;  %v3279_v48 = vpack.c.bf16 %v10788_v44, %v10787_v13 }
 0x27a   :  { %12349 = vmatmul.mubr.msk.bf16.gmra.mrb[56].mxu0 %vm227_vm2, %v15668_v62 }
 0x27b   :  { %12352 = vmatprep.mubr.msk.bf16.mxu0 %vm227_vm2, %v15670_v63 }
 0x282   :  { %12353 = vmatmul.mubr.msk.bf16.gmra.mrb[60].mxu0 %vm227_vm2, %v15682_v7 }
 0x283   :  { %12358 = vmatprep.mubr.msk.bf16.mxu0 %vm227_vm2, %v14985_v42  ;;  %v10711_v42 = vld [vmem:[%s17510_s0 + $0x182] sm:$0xff] }
 0x28a   :  { %12359 = vmatmul.mubr.msk.bf16.vlgmr.msra.gmra.mrb[0].mxu0 %vm227_vm2, %v14987_v45  ;;  %v10712_v45 = vld [vmem:[%s17510_s0 + $0x18a] sm:$0xff] }
 0x28b   :  { %12362 = vmatprep.mubr.msk.bf16.mxu0 %vm227_vm2, %v15005_v54  ;;  %12423 = vmatpush3.bf16.msra.mxu0 %v3405_v59  ;;  %v15722_v54 = vpack.c.bf16 %v10712_v45, %v10711_v42  ;;  %v3280_v42 = vpack.c.bf16 %v10790_v18, %v10789_v57  ;;  %v10791_v45 = vld [vmem:[%s17510_s0 + $0xd8] sm:$0xff]  ;;  %v10812_v57 = vld [vmem:[%s17510_s0 + $0x200] sm:$0xff]  ;;  %v10813_v18 = vld [vmem:[%s17510_s0 + $0x210] sm:$0xff] }
 0x292   :  { %12363 = vmatmul.mubr.msk.bf16.gmra.mrb[4].mxu0 %vm227_vm2, %v15007_v55  ;;  %v17538_v55 = vld [vmem:[#allocation6_spill] sm:$0xff] }
 0x293   :  { %12366 = vmatprep.mubr.msk.bf16.mxu0 %vm227_vm2, %v15025_v2  ;;  %v17539_v2 = vld [vmem:[#allocation7_spill] sm:$0xff] }
 0x29a   :  { %12367 = vmatmul.mubr.msk.bf16.gmra.mrb[8].mxu0 %vm227_vm2, %v15027_v5  ;;  %v3856_v5 = vld [vmem:[%s17511_s1 + $0x15] sm:$0x7] }
 0x29b   :  { %12370 = vmatprep.mubr.msk.bf16.mxu0 %vm227_vm2, %v15045_v15  ;;  %v17540_v15 = vld [vmem:[#allocation8_spill] sm:$0xff] }
 0x2a2   :  { %12371 = vmatmul.mubr.msk.bf16.gmra.mrb[12].mxu0 %vm227_vm2, %v15047_v16  ;;  %v3857_v16 = vpack.c.bf16 %v3856_v5, %v3856_v5  ;;  %v10794_v5 = vld [vmem:[%s17510_s0 + $0xf8] sm:$0xff] }
 0x2a3   :  { %12374 = vmatprep.mubr.msk.bf16.mxu0 %vm227_vm2, %v15065_v29 }
 0x2a4   :  { %v3955_v29 = vand.u32 %v3857_v16, %v14419_v6 }
 0x2a6   :  { %12488 = vmatprep.subr.bf16.mxu0 %v3955_v29 }
 0x2aa   :  { %12375 = vmatmul.mubr.msk.bf16.gmra.mrb[16].mxu0 %vm227_vm2, %v15067_v30  ;;  %v17541_v30 = vld [vmem:[#allocation9_spill] sm:$0xff] }
 0x2ab   :  { %12378 = vmatprep.mubr.msk.bf16.mxu0 %vm227_vm2, %v15085_v39  ;;  %v10743_v39 = vld [vmem:[%s17510_s0 + $0x332] sm:$0xff] }
 0x2b2   :  { %12379 = vmatmul.mubr.msk.bf16.gmra.mrb[20].mxu0 %vm227_vm2, %v15087_v40  ;;  %v10744_v40 = vld [vmem:[%s17510_s0 + $0x33a] sm:$0xff] }
 0x2b3   :  { %12382 = vmatprep.mubr.msk.bf16.mxu0 %vm227_vm2, %v15105_v51  ;;  %v10777_v51 = vld [vmem:[%s17510_s0 + $0x30] sm:$0xff] }
 0x2ba   :  { %12383 = vmatmul.mubr.msk.bf16.gmra.mrb[24].mxu0 %vm227_vm2, %v15107_v56  ;;  %v10778_v56 = vld [vmem:[%s17510_s0 + $0x38] sm:$0xff] }
 0x2bb   :  { %12386 = vmatprep.mubr.msk.bf16.mxu0 %vm227_vm2, %v15125_v10  ;;  %v15772_v10 = vpack.c.bf16 %v10744_v40, %v10743_v39  ;;  %v10797_v39 = vld [vmem:[%s17510_s0 + $0x120] sm:$0xff]  ;;  %v10798_v40 = vld [vmem:[%s17510_s0 + $0x128] sm:$0xff] }
 0x2c2   :  { %12387 = vmatmul.mubr.msk.bf16.gmra.mrb[28].mxu0 %vm227_vm2, %v15722_v54 }
 0x2c3   :  { %12390 = vmatprep.mubr.msk.bf16.mxu0 %vm227_vm2, %v15142_v24  ;;  %v3274_v24 = vpack.c.bf16 %v10778_v56, %v10777_v51  ;;  %v3284_v56 = vpack.c.bf16 %v10798_v40, %v10797_v39  ;;  %v10820_v39 = vld [vmem:[%s17510_s0 + $0x260] sm:$0xff]  ;;  %v10821_v40 = vld [vmem:[%s17510_s0 + $0x270] sm:$0xff] }
 0x2ca   :  { %12391 = vmatmul.mubr.msk.bf16.gmra.mrb[32].mxu0 %vm227_vm2, %v15144_v32  ;;  %v10779_v32 = vld [vmem:[%s17510_s0 + $0x48] sm:$0xff] }
 0x2cb   :  { %12394 = vmatprep.mubr.msk.bf16.mxu0 %vm227_vm2, %v15162_v46  ;;  %v10780_v46 = vld [vmem:[%s17510_s0 + $0x50] sm:$0xff] }
 0x2d2   :  { %12395 = vmatmul.mubr.msk.bf16.gmra.mrb[36].mxu0 %vm227_vm2, %v15164_v47  ;;  %v10781_v47 = vld [vmem:[%s17510_s0 + $0x60] sm:$0xff] }
 0x2d3   :  { %12398 = vmatprep.mubr.msk.bf16.mxu0 %vm227_vm2, %v15182_v9  ;;  %v10782_v9 = vld [vmem:[%s17510_s0 + $0x68] sm:$0xff] }
 0x2da   :  { %12399 = vmatmul.mubr.msk.bf16.gmra.mrb[40].mxu0 %vm227_vm2, %v15184_v11  ;;  %v3275_v11 = vpack.c.bf16 %v10780_v46, %v10779_v32  ;;  %v10800_v32 = vld [vmem:[%s17510_s0 + $0x140] sm:$0xff]  ;;  %v10801_v46 = vld [vmem:[%s17510_s0 + $0x150] sm:$0xff] }
 0x2db   :  { %12402 = vmatprep.mubr.msk.bf16.mxu0 %vm227_vm2, %v15202_v33  ;;  %v3276_v33 = vpack.c.bf16 %v10782_v9, %v10781_v47  ;;  %v10802_v47 = vld [vmem:[%s17510_s0 + $0x158] sm:$0xff] }
 0x2e2   :  { %12403 = vmatmul.mubr.msk.bf16.gmra.mrb[44].mxu0 %vm227_vm2, %v15204_v35  ;;  %v10783_v35 = vld [vmem:[%s17510_s0 + $0x78] sm:$0xff] }
 0x2e3   :  { %12406 = vmatprep.mubr.msk.bf16.mxu0 %vm227_vm2, %v17538_v55  ;;  %v10792_v55 = vld [vmem:[%s17510_s0 + $0xe0] sm:$0xff] }
 0x2ea   :  { %12407 = vmatmul.mubr.msk.bf16.gmra.mrb[48].mxu0 %vm227_vm2, %v17539_v2  ;;  %v10793_v2 = vld [vmem:[%s17510_s0 + $0xf0] sm:$0xff] }
 0x2eb   :  { %12410 = vmatprep.mubr.msk.bf16.mxu0 %vm227_vm2, %v17540_v15  ;;  %v3281_v15 = vpack.c.bf16 %v10792_v55, %v10791_v45  ;;  %v3282_v16 = vpack.c.bf16 %v10794_v5, %v10793_v2  ;;  %v10815_v55 = vld [vmem:[%s17510_s0 + $0x228] sm:$0xff]  ;;  %v10816_v2 = vld [vmem:[%s17510_s0 + $0x230] sm:$0xff]  ;;  %v10817_v5 = vld [vmem:[%s17510_s0 + $0x240] sm:$0xff] }
 0x2f2   :  { %12411 = vmatmul.mubr.msk.bf16.gmra.mrb[52].mxu0 %vm227_vm2, %v17541_v30  ;;  %v10796_v30 = vld [vmem:[%s17510_s0 + $0x110] sm:$0xff] }
 0x2f3   :  { %12414 = vmatprep.mubr.msk.bf16.mxu0 %vm227_vm2, %v15266_v23  ;;  %v10785_v23 = vld [vmem:[%s17510_s0 + $0x90] sm:$0xff] }
 0x2fa   :  { %12415 = vmatmul.mubr.msk.bf16.gmra.mrb[56].mxu0 %vm227_vm2, %v15268_v36  ;;  %v10786_v36 = vld [vmem:[%s17510_s0 + $0x98] sm:$0xff] }
 0x2fb   :  { %12418 = vmatprep.mubr.msk.bf16.mxu0 %vm227_vm2, %v15280_v61  ;;  %v10784_v61 = vld [vmem:[%s17510_s0 + $0x80] sm:$0xff]  ;;  %v3278_v8 = vpack.c.bf16 %v10786_v36, %v10785_v23  ;;  %v10807_v23 = vld [vmem:[%s17510_s0 + $0x198] sm:$0xff] }
 0x2fc   :  { %v3277_v59 = vpack.c.bf16 %v10784_v61, %v10783_v35  ;;  %v10804_v35 = vld [vmem:[%s17510_s0 + $0x170] sm:$0xff]  ;;  %v10808_v36 = vld [vmem:[%s17510_s0 + $0x1a0] sm:$0xff] }
 0x2fd   :  { %v3289_v13 = vpack.c.bf16 %v10808_v36, %v10807_v23  ;;  %v10829_v23 = vld [vmem:[%s17510_s0 + $0x2d0] sm:$0xff]  ;;  %v10830_v36 = vld [vmem:[%s17510_s0 + $0x2d8] sm:$0xff] }
 0x302   :  { %12419 = vmatmul.mubr.msk.bf16.gmra.mrb[60].mxu0 %vm227_vm2, %v15772_v10 }
 0x303   :  { %12424 = vmatprep.mubr.msk.bf16.mxu0 %vm227_vm2, %v3274_v24  ;;  %v10799_v24 = vld [vmem:[%s17510_s0 + $0x138] sm:$0xff] }
 0x304   :  { %v3285_v9 = vpack.c.bf16 %v10800_v32, %v10799_v24  ;;  %v10823_v32 = vld [vmem:[%s17510_s0 + $0x288] sm:$0xff] }
 0x30a   :  { %12425 = vmatmul.mubr.msk.bf16.vlgmr.msra.gmra.mrb[0].mxu0 %vm227_vm2, %v3275_v11  ;;  %v3286_v11 = vpack.c.bf16 %v10802_v47, %v10801_v46  ;;  %v10824_v46 = vld [vmem:[%s17510_s0 + $0x290] sm:$0xff]  ;;  %v10825_v47 = vld [vmem:[%s17510_s0 + $0x2a0] sm:$0xff] }
 0x30b   :  { %12428 = vmatprep.mubr.msk.bf16.mxu0 %vm227_vm2, %v3276_v33  ;;  %12489 = vmatpush3.bf16.msra.mxu0 %v3955_v29  ;;  %v10795_v29 = vld [vmem:[%s17510_s0 + $0x108] sm:$0xff] }
 0x30c   :  { %v3283_v51 = vpack.c.bf16 %v10796_v30, %v10795_v29  ;;  %v10803_v33 = vld [vmem:[%s17510_s0 + $0x168] sm:$0xff]  ;;  %v10819_v30 = vld [vmem:[%s17510_s0 + $0x258] sm:$0xff] }
 0x30d   :  { %v3287_v61 = vpack.c.bf16 %v10804_v35, %v10803_v33  ;;  %v10827_v35 = vld [vmem:[%s17510_s0 + $0x2b8] sm:$0xff] }
 0x312   :  { %12429 = vmatmul.mubr.msk.bf16.gmra.mrb[4].mxu0 %vm227_vm2, %v3277_v59  ;;  %v10809_v59 = vld [vmem:[%s17510_s0 + $0x1e0] sm:$0xff] }
 0x313   :  { %12432 = vmatprep.mubr.msk.bf16.mxu0 %vm227_vm2, %v3278_v8  ;;  %v10810_v8 = vld [vmem:[%s17510_s0 + $0x1e8] sm:$0xff] }
 0x314   :  { %v3290_v44 = vpack.c.bf16 %v10810_v8, %v10809_v59  ;;  %v3300_v8 = vpack.c.bf16 %v10830_v36, %v10829_v23  ;;  %v10993_v23 = vld [vmem:[%s17510_s0 + $0x152] sm:$0xff]  ;;  %v10994_v36 = vld [vmem:[%s17510_s0 + $0x15a] sm:$0xff] }
 0x31a   :  { %12433 = vmatmul.mubr.msk.bf16.gmra.mrb[8].mxu0 %vm227_vm2, %v3279_v48  ;;  %v10814_v48 = vld [vmem:[%s17510_s0 + $0x218] sm:$0xff] }
 0x31b   :  { %12436 = vmatprep.mubr.msk.bf16.mxu0 %vm227_vm2, %v3280_v42  ;;  %v3292_v45 = vpack.c.bf16 %v10814_v48, %v10813_v18  ;;  %v10833_v18 = vld [vmem:[%s17510_s0 + $0x300] sm:$0xff]  ;;  %v10834_v48 = vld [vmem:[%s17510_s0 + $0x308] sm:$0xff] }
 0x322   :  { %12437 = vmatmul.mubr.msk.bf16.gmra.mrb[12].mxu0 %vm227_vm2, %v3281_v15  ;;  %v10818_v15 = vld [vmem:[%s17510_s0 + $0x248] sm:$0xff] }
 0x323   :  { %12440 = vmatprep.mubr.msk.bf16.mxu0 %vm227_vm2, %v3282_v16  ;;  %v3293_v16 = vpack.c.bf16 %v10816_v2, %v10815_v55  ;;  %v3294_v29 = vpack.c.bf16 %v10818_v15, %v10817_v5  ;;  %v3302_v55 = vpack.c.bf16 %v10834_v48, %v10833_v18  ;;  %v10835_v2 = vld [vmem:[%s17510_s0 + $0x318] sm:$0xff]  ;;  %v10836_v5 = vld [vmem:[%s17510_s0 + $0x320] sm:$0xff] }
 0x324   :  { %v3303_v15 = vpack.c.bf16 %v10836_v5, %v10835_v2  ;;  %v11000_v18 = vld [vmem:[%s17510_s0 + $0x1a2] sm:$0xff]  ;;  %v11005_v5 = vld [vmem:[%s17510_s0 + $0x212] sm:$0xff] }
 0x325   :  { %v11001_v48 = vld [vmem:[%s17510_s0 + $0x1e2] sm:$0xff] }
 0x326   :  { %v11004_v2 = vld [vmem:[%s17510_s0 + $0x202] sm:$0xff] }
 0x32a   :  { %12441 = vmatmul.mubr.msk.bf16.gmra.mrb[16].mxu0 %vm227_vm2, %v3283_v51  ;;  %v10822_v51 = vld [vmem:[%s17510_s0 + $0x278] sm:$0xff] }
 0x32b   :  { %12444 = vmatprep.mubr.msk.bf16.mxu0 %vm227_vm2, %v3284_v56  ;;  %v3295_v56 = vpack.c.bf16 %v10820_v39, %v10819_v30  ;;  %v3296_v24 = vpack.c.bf16 %v10822_v51, %v10821_v40  ;;  %v10983_v30 = vld [vmem:[%s17510_s0 + $0xda] sm:$0xff]  ;;  %v10984_v39 = vld [vmem:[%s17510_s0 + $0xe2] sm:$0xff]  ;;  %v10985_v40 = vld [vmem:[%s17510_s0 + $0xf2] sm:$0xff] }
 0x32c   :  { %v10986_v51 = vld [vmem:[%s17510_s0 + $0xfa] sm:$0xff] }
 0x332   :  { %12445 = vmatmul.mubr.msk.bf16.gmra.mrb[20].mxu0 %vm227_vm2, %v3285_v9  ;;  %v10826_v9 = vld [vmem:[%s17510_s0 + $0x2a8] sm:$0xff] }
 0x333   :  { %12448 = vmatprep.mubr.msk.bf16.mxu0 %vm227_vm2, %v3286_v11  ;;  %v3297_v11 = vpack.c.bf16 %v10824_v46, %v10823_v32  ;;  %v3298_v33 = vpack.c.bf16 %v10826_v9, %v10825_v47  ;;  %v10987_v32 = vld [vmem:[%s17510_s0 + $0x10a] sm:$0xff]  ;;  %v10988_v46 = vld [vmem:[%s17510_s0 + $0x112] sm:$0xff]  ;;  %v10989_v47 = vld [vmem:[%s17510_s0 + $0x122] sm:$0xff] }
 0x334   :  { %v10990_v9 = vld [vmem:[%s17510_s0 + $0x12a] sm:$0xff] }
 0x33a   :  { %12449 = vmatmul.mubr.msk.bf16.gmra.mrb[24].mxu0 %vm227_vm2, %v3287_v61  ;;  %v10828_v61 = vld [vmem:[%s17510_s0 + $0x2c0] sm:$0xff] }
 0x33b   :  { %12452 = vmatprep.mubr.msk.bf16.mxu0 %vm227_vm2, %v15320_v58  ;;  %v10811_v58 = vld [vmem:[%s17510_s0 + $0x1f8] sm:$0xff]  ;;  %v3299_v59 = vpack.c.bf16 %v10828_v61, %v10827_v35  ;;  %v10992_v61 = vld [vmem:[%s17510_s0 + $0x142] sm:$0xff] }
 0x33c   :  { %v3291_v42 = vpack.c.bf16 %v10812_v57, %v10811_v58  ;;  %v10832_v58 = vld [vmem:[%s17510_s0 + $0x2f0] sm:$0xff]  ;;  %v10991_v35 = vld [vmem:[%s17510_s0 + $0x13a] sm:$0xff] }
 0x342   :  { %12453 = vmatmul.mubr.msk.bf16.gmra.mrb[28].mxu0 %vm227_vm2, %v3289_v13  ;;  %v4406_v13 = vld [vmem:[%s17511_s1 + $0x18] sm:$0x7] }
 0x343   :  { %12456 = vmatprep.mubr.msk.bf16.mxu0 %vm227_vm2, %v3290_v44  ;;  %v10831_v44 = vld [vmem:[%s17510_s0 + $0x2e8] sm:$0xff]  ;;  %v4407_v57 = vpack.c.bf16 %v4406_v13, %v4406_v13 }
 0x344   :  { %v10995_v13 = vld [vmem:[%s17510_s0 + $0x16a] sm:$0xff] }
 0x34a   :  { %12457 = vmatmul.mubr.msk.bf16.gmra.mrb[32].mxu0 %vm227_vm2, %v3291_v42  ;;  %v4505_v42 = vand.u32 %v4407_v57, %v14419_v6  ;;  %v10839_v6 = vld [vmem:[%s17510_s0 + $0x348] sm:$0xff]  ;;  %v10999_v57 = vld [vmem:[%s17510_s0 + $0x19a] sm:$0xff] }
 0x34b   :  { %12460 = vmatprep.mubr.msk.bf16.mxu0 %vm227_vm2, %v3292_v45  ;;  %v3301_v45 = vpack.c.bf16 %v10832_v58, %v10831_v44  ;;  %v10996_v44 = vld [vmem:[%s17510_s0 + $0x172] sm:$0xff] }
 0x34c   :  { %12554 = vmatprep.subr.bf16.mxu0 %v4505_v42  ;;  %v4387_v58 = vpack.c.bf16 %v10996_v44, %v10995_v13 }
 0x352   :  { %12461 = vmatmul.mubr.msk.bf16.gmra.mrb[36].mxu0 %vm227_vm2, %v3293_v16  ;;  %v10840_v16 = vld [vmem:[%s17510_s0 + $0x350] sm:$0xff] }
 0x353   :  { %12464 = vmatprep.mubr.msk.bf16.mxu0 %vm227_vm2, %v3294_v29  ;;  %v3305_v29 = vpack.c.bf16 %v10840_v16, %v10839_v6 }
 0x35a   :  { %12465 = vmatmul.mubr.msk.bf16.gmra.mrb[40].mxu0 %vm227_vm2, %v3295_v56  ;;  %v4381_v56 = vpack.c.bf16 %v10984_v39, %v10983_v30 }
 0x35b   :  { %12468 = vmatprep.mubr.msk.bf16.mxu0 %vm227_vm2, %v3296_v24  ;;  %v4382_v24 = vpack.c.bf16 %v10986_v51, %v10985_v40  ;;  %v11025_v40 = vld [vmem:[%s17510_s0 + $0x302] sm:$0xff]  ;;  %v11026_v51 = vld [vmem:[%s17510_s0 + $0x30a] sm:$0xff] }
 0x362   :  { %12469 = vmatmul.mubr.msk.bf16.gmra.mrb[44].mxu0 %vm227_vm2, %v3297_v11  ;;  %v4383_v11 = vpack.c.bf16 %v10988_v46, %v10987_v32  ;;  %v4402_v32 = vpack.c.bf16 %v11026_v51, %v11025_v40  ;;  %v11027_v46 = vld [vmem:[%s17510_s0 + $0x31a] sm:$0xff] }
 0x363   :  { %12472 = vmatprep.mubr.msk.bf16.mxu0 %vm227_vm2, %v3298_v33  ;;  %v4384_v33 = vpack.c.bf16 %v10990_v9, %v10989_v47  ;;  %v11028_v47 = vld [vmem:[%s17510_s0 + $0x322] sm:$0xff] }
 0x364   :  { %v4403_v9 = vpack.c.bf16 %v11028_v47, %v11027_v46 }
 0x36a   :  { %12473 = vmatmul.mubr.msk.bf16.gmra.mrb[48].mxu0 %vm227_vm2, %v3299_v59  ;;  %v4385_v59 = vpack.c.bf16 %v10992_v61, %v10991_v35  ;;  %v5266_v61 = vld [vmem:[%s17513_s3] sm:$0xff] }
 0x36b   :  { %12476 = vmatprep.mubr.msk.bf16.mxu0 %vm227_vm2, %v3300_v8  ;;  %v4386_v8 = vpack.c.bf16 %v10994_v36, %v10993_v23  ;;  %v5267_v23 = vpack.c.bf16 %v5266_v61, %v5266_v61 }
 0x372   :  { %12477 = vmatmul.mubr.msk.bf16.gmra.mrb[52].mxu0 %vm227_vm2, %v3301_v45  ;;  %v4389_v45 = vpack.c.bf16 %v11000_v18, %v10999_v57 }
 0x373   :  { %12480 = vmatprep.mubr.msk.bf16.mxu0 %vm227_vm2, %v3302_v55 }
 0x37a   :  { %12481 = vmatmul.mubr.msk.bf16.gmra.mrb[56].mxu0 %vm227_vm2, %v3303_v15  ;;  %v11006_v15 = vld [vmem:[%s17510_s0 + $0x21a] sm:$0xff] }
 0x37b   :  { %12484 = vmatprep.mubr.msk.bf16.mxu0 %vm227_vm2, %v15370_v19  ;;  %v10903_v19 = vld [vmem:[%s17510_s0 + $0x199] sm:$0xff]  ;;  %v4392_v16 = vpack.c.bf16 %v11006_v15, %v11005_v5 }
 0x382   :  { %12485 = vmatmul.mubr.msk.bf16.gmra.mrb[60].mxu0 %vm227_vm2, %v3305_v29  ;;  %v11007_v29 = vld [vmem:[%s17510_s0 + $0x22a] sm:$0xff] }
 0x383   :  { %12490 = vmatprep.mubr.msk.bf16.mxu0 %vm227_vm2, %v15387_v38  ;;  %v10904_v38 = vld [vmem:[%s17510_s0 + $0x1a1] sm:$0xff] }
 0x38a   :  { %12491 = vmatmul.mubr.msk.bf16.vlgmr.msra.gmra.mrb[0].mxu0 %vm227_vm2, %v15389_v43  ;;  %v3839_v43 = vpack.c.bf16 %v10904_v38, %v10903_v19  ;;  %v11008_v19 = vld [vmem:[%s17510_s0 + $0x232] sm:$0xff]  ;;  %v11009_v38 = vld [vmem:[%s17510_s0 + $0x242] sm:$0xff] }
 0x38b   :  { %12494 = vmatprep.mubr.msk.bf16.mxu0 %vm227_vm2, %v15407_v60  ;;  %12555 = vmatpush3.bf16.msra.mxu0 %v4505_v42  ;;  %v17542_v60 = vld [vmem:[#allocation10_spill] sm:$0xff]  ;;  %v11002_v42 = vld [vmem:[%s17510_s0 + $0x1ea] sm:$0xff] }
 0x38c   :  { %v4390_v55 = vpack.c.bf16 %v11002_v42, %v11001_v48 }
 0x392   :  { %12495 = vmatmul.mubr.msk.bf16.gmra.mrb[4].mxu0 %vm227_vm2, %v15409_v3  ;;  %v17543_v3 = vld [vmem:[#allocation11_spill] sm:$0xff] }
 0x393   :  { %12498 = vmatprep.mubr.msk.bf16.mxu0 %vm227_vm2, %v15427_v28  ;;  %v10935_v28 = vld [vmem:[%s17510_s0 + $0x349] sm:$0xff] }
 0x39a   :  { %12499 = vmatmul.mubr.msk.bf16.gmra.mrb[8].mxu0 %vm227_vm2, %v15429_v34  ;;  %v10936_v34 = vld [vmem:[%s17510_s0 + $0x351] sm:$0xff] }
 0x39b   :  { %12502 = vmatprep.mubr.msk.bf16.mxu0 %vm227_vm2, %v15447_v21  ;;  %v10969_v21 = vld [vmem:[%s17510_s0 + $0x32] sm:$0xff] }
 0x3a2   :  { %12503 = vmatmul.mubr.msk.bf16.gmra.mrb[12].mxu0 %vm227_vm2, %v15449_v22  ;;  %v10970_v22 = vld [vmem:[%s17510_s0 + $0x3a] sm:$0xff] }
 0x3a3   :  { %12506 = vmatprep.mubr.msk.bf16.mxu0 %vm227_vm2, %v15467_v0  ;;  %v3855_v0 = vpack.c.bf16 %v10936_v34, %v10935_v28  ;;  %v11011_v28 = vld [vmem:[%s17510_s0 + $0x25a] sm:$0xff]  ;;  %v11012_v34 = vld [vmem:[%s17510_s0 + $0x262] sm:$0xff] }
 0x3aa   :  { %12507 = vmatmul.mubr.msk.bf16.gmra.mrb[16].mxu0 %vm227_vm2, %v15469_v1  ;;  %v4374_v1 = vpack.c.bf16 %v10970_v22, %v10969_v21  ;;  %v11013_v21 = vld [vmem:[%s17510_s0 + $0x272] sm:$0xff]  ;;  %v11014_v22 = vld [vmem:[%s17510_s0 + $0x27a] sm:$0xff] }
 0x3ab   :  { %12510 = vmatprep.mubr.msk.bf16.mxu0 %vm227_vm2, %v15487_v20  ;;  %v10971_v20 = vld [vmem:[%s17510_s0 + $0x4a] sm:$0xff] }
 0x3b2   :  { %12511 = vmatmul.mubr.msk.bf16.gmra.mrb[20].mxu0 %vm227_vm2, %v15489_v25  ;;  %v10972_v25 = vld [vmem:[%s17510_s0 + $0x52] sm:$0xff] }
 0x3b3   :  { %12514 = vmatprep.mubr.msk.bf16.mxu0 %vm227_vm2, %v15507_v49  ;;  %v10973_v49 = vld [vmem:[%s17510_s0 + $0x62] sm:$0xff] }
 0x3ba   :  { %12515 = vmatmul.mubr.msk.bf16.gmra.mrb[24].mxu0 %vm227_vm2, %v15509_v50  ;;  %v10974_v50 = vld [vmem:[%s17510_s0 + $0x6a] sm:$0xff] }
 0x3bb   :  { %12518 = vmatprep.mubr.msk.bf16.mxu0 %vm227_vm2, %v15527_v27  ;;  %v4375_v27 = vpack.c.bf16 %v10972_v25, %v10971_v20  ;;  %v16221_v20 = vld [vmem:[%s17510_s0 + $0x28a] sm:$0xff]  ;;  %v16226_v25 = vld [vmem:[%s17510_s0 + $0x292] sm:$0xff] }
 0x3c2   :  { %12519 = vmatmul.mubr.msk.bf16.gmra.mrb[28].mxu0 %vm227_vm2, %v3839_v43  ;;  %v11010_v43 = vld [vmem:[%s17510_s0 + $0x24a] sm:$0xff] }
 0x3c3   :  { %12522 = vmatprep.mubr.msk.bf16.mxu0 %vm227_vm2, %v15544_v52  ;;  %v4376_v52 = vpack.c.bf16 %v10974_v50, %v10973_v49  ;;  %v16231_v49 = vld [vmem:[%s17510_s0 + $0x2a2] sm:$0xff]  ;;  %v16236_v50 = vld [vmem:[%s17510_s0 + $0x2aa] sm:$0xff] }
 0x3ca   :  { %12523 = vmatmul.mubr.msk.bf16.gmra.mrb[32].mxu0 %vm227_vm2, %v15546_v53  ;;  %v10975_v53 = vld [vmem:[%s17510_s0 + $0x7a] sm:$0xff] }
 0x3cb   :  { %12526 = vmatprep.mubr.msk.bf16.mxu0 %vm227_vm2, %v15564_v14  ;;  %v10976_v14 = vld [vmem:[%s17510_s0 + $0x82] sm:$0xff] }
 0x3d2   :  { %12527 = vmatmul.mubr.msk.bf16.gmra.mrb[36].mxu0 %vm227_vm2, %v15566_v26  ;;  %v10977_v26 = vld [vmem:[%s17510_s0 + $0x92] sm:$0xff] }
 0x3d3   :  { %12530 = vmatprep.mubr.msk.bf16.mxu0 %vm227_vm2, %v15584_v4  ;;  %v10978_v4 = vld [vmem:[%s17510_s0 + $0x9a] sm:$0xff] }
 0x3da   :  { %12531 = vmatmul.mubr.msk.bf16.gmra.mrb[40].mxu0 %vm227_vm2, %v15586_v17  ;;  %v4377_v17 = vpack.c.bf16 %v10976_v14, %v10975_v53  ;;  %v17525_v53 = vmov 0.0   ;;  %v11019_v14 = vld [vmem:[%s17510_s0 + $0x2ba] sm:$0xff] }
 0x3db   :  { %12534 = vmatprep.mubr.msk.bf16.mxu0 %vm227_vm2, %v15604_v12  ;;  %v4378_v12 = vpack.c.bf16 %v10978_v4, %v10977_v26  ;;  %5003 = vst.msk [vmem:[#allocation2 + $0x30] sm:$0xff] %vm4995_vm3, %v17525_v53  ;;  %5004 = vst.msk [vmem:[#allocation2 + $0x38] sm:$0xff] %vm4995_vm3, %v17525_v53  ;;  %v11020_v26 = vld [vmem:[%s17510_s0 + $0x2c2] sm:$0xff]  ;;  %v11021_v4 = vld [vmem:[%s17510_s0 + $0x2d2] sm:$0xff] }
 0x3dc   :  { %4996 = vst.msk [vmem:[#allocation2] sm:$0xff] %vm4995_vm3, %v17525_v53  ;;  %4997 = vst.msk [vmem:[#allocation2 + $0x8] sm:$0xff] %vm4995_vm3, %v17525_v53 }
 0x3dd   :  { %5000 = vst.msk [vmem:[#allocation2 + $0x18] sm:$0xff] %vm4995_vm3, %v17525_v53  ;;  %5001 = vst.msk [vmem:[#allocation2 + $0x20] sm:$0xff] %vm4995_vm3, %v17525_v53 }
 0x3de   :  { %5006 = vst.msk [vmem:[#allocation2 + $0x48] sm:$0xff] %vm4995_vm3, %v17525_v53  ;;  %5007 = vst.msk [vmem:[#allocation2 + $0x50] sm:$0xff] %vm4995_vm3, %v17525_v53 }
 0x3df   :  { %5009 = vst.msk [vmem:[#allocation2 + $0x60] sm:$0xff] %vm4995_vm3, %v17525_v53  ;;  %5010 = vst.msk [vmem:[#allocation2 + $0x68] sm:$0xff] %vm4995_vm3, %v17525_v53 }
 0x3e0   :  { %5012 = vst.msk [vmem:[#allocation2 + $0x78] sm:$0xff] %vm4995_vm3, %v17525_v53  ;;  %5013 = vst.msk [vmem:[#allocation2 + $0x80] sm:$0xff] %vm4995_vm3, %v17525_v53 }
 0x3e1   :  { %5015 = vst.msk [vmem:[#allocation2 + $0x90] sm:$0xff] %vm4995_vm3, %v17525_v53  ;;  %5016 = vst.msk [vmem:[#allocation2 + $0x98] sm:$0xff] %vm4995_vm3, %v17525_v53 }
 0x3e2   :  { %12535 = vmatmul.mubr.msk.bf16.gmra.mrb[44].mxu0 %vm227_vm2, %v15606_v41  ;;  %v10979_v41 = vld [vmem:[%s17510_s0 + $0xaa] sm:$0xff]  ;;  %5018 = vst.msk [vmem:[#allocation2 + $0xa8] sm:$0xff] %vm4995_vm3, %v17525_v53  ;;  %5019 = vst.msk [vmem:[#allocation2 + $0xb0] sm:$0xff] %vm4995_vm3, %v17525_v53 }
 0x3e3   :  { %12538 = vmatprep.mubr.msk.bf16.mxu0 %vm227_vm2, %v15624_v31  ;;  %v10980_v31 = vld [vmem:[%s17510_s0 + $0xb2] sm:$0xff]  ;;  %5021 = vst.msk [vmem:[#allocation2 + $0xc0] sm:$0xff] %vm4995_vm3, %v17525_v53  ;;  %5022 = vst.msk [vmem:[#allocation2 + $0xc8] sm:$0xff] %vm4995_vm3, %v17525_v53  ;;  %v5268_v30 = vld [vmem:[#allocation2 + $0x1] sm:$0xff] }
 0x3e4   :  { %5024 = vst.msk [vmem:[#allocation2 + $0xd8] sm:$0xff] %vm4995_vm3, %v17525_v53  ;;  %5025 = vst.msk [vmem:[#allocation2 + $0xe0] sm:$0xff] %vm4995_vm3, %v17525_v53 }
 0x3e5   :  { %5027 = vst.msk [vmem:[#allocation2 + $0xf0] sm:$0xff] %vm4995_vm3, %v17525_v53  ;;  %5028 = vst.msk [vmem:[#allocation2 + $0xf8] sm:$0xff] %vm4995_vm3, %v17525_v53 }
 0x3e6   :  { %5030 = vst.msk [vmem:[#allocation2 + $0x108] sm:$0xff] %vm4995_vm3, %v17525_v53  ;;  %5031 = vst.msk [vmem:[#allocation2 + $0x110] sm:$0xff] %vm4995_vm3, %v17525_v53 }
 0x3e7   :  { %5033 = vst.msk [vmem:[#allocation2 + $0x120] sm:$0xff] %vm4995_vm3, %v17525_v53  ;;  %5034 = vst.msk [vmem:[#allocation2 + $0x128] sm:$0xff] %vm4995_vm3, %v17525_v53 }
 0x3e8   :  { %5036 = vst.msk [vmem:[#allocation2 + $0x138] sm:$0xff] %vm4995_vm3, %v17525_v53  ;;  %5037 = vst.msk [vmem:[#allocation2 + $0x140] sm:$0xff] %vm4995_vm3, %v17525_v53 }
 0x3e9   :  { %5039 = vst.msk [vmem:[#allocation2 + $0x150] sm:$0xff] %vm4995_vm3, %v17525_v53  ;;  %5040 = vst.msk [vmem:[#allocation2 + $0x158] sm:$0xff] %vm4995_vm3, %v17525_v53 }
 0x3ea   :  { %12539 = vmatmul.mubr.msk.bf16.gmra.mrb[48].mxu0 %vm227_vm2, %v15626_v37  ;;  %v10981_v37 = vld [vmem:[%s17510_s0 + $0xc2] sm:$0xff]  ;;  %5042 = vst.msk [vmem:[#allocation2 + $0x168] sm:$0xff] %vm4995_vm3, %v17525_v53  ;;  %5043 = vst.msk [vmem:[#allocation2 + $0x170] sm:$0xff] %vm4995_vm3, %v17525_v53 }
 0x3eb   :  { %12542 = vmatprep.mubr.msk.bf16.mxu0 %vm227_vm2, %v17542_v60  ;;  %v4393_v60 = vpack.c.bf16 %v11008_v19, %v11007_v29  ;;  %5045 = vst.msk [vmem:[#allocation2 + $0x180] sm:$0xff] %vm4995_vm3, %v17525_v53  ;;  %5046 = vst.msk [vmem:[#allocation2 + $0x188] sm:$0xff] %vm4995_vm3, %v17525_v53 }
 0x3ec   :  { %5048 = vst.msk [vmem:[#allocation2 + $0x198] sm:$0xff] %vm4995_vm3, %v17525_v53  ;;  %5049 = vst.msk [vmem:[#allocation2 + $0x1a0] sm:$0xff] %vm4995_vm3, %v17525_v53 }
 0x3ed   :  { %5051 = vst.msk [vmem:[#allocation2 + $0x1b0] sm:$0xff] %vm4995_vm3, %v17525_v53  ;;  %5052 = vst.msk [vmem:[#allocation2 + $0x1b8] sm:$0xff] %vm4995_vm3, %v17525_v53 }
 0x3ee   :  { %5054 = vst.msk [vmem:[#allocation2 + $0x1c8] sm:$0xff] %vm4995_vm3, %v17525_v53  ;;  %5055 = vst.msk [vmem:[#allocation2 + $0x1d0] sm:$0xff] %vm4995_vm3, %v17525_v53 }
 0x3ef   :  { %5057 = vst.msk [vmem:[#allocation2 + $0x1e0] sm:$0xff] %vm4995_vm3, %v17525_v53  ;;  %5058 = vst.msk [vmem:[#allocation2 + $0x1e8] sm:$0xff] %vm4995_vm3, %v17525_v53 }
 0x3f0   :  { %5060 = vst.msk [vmem:[#allocation2 + $0x1f8] sm:$0xff] %vm4995_vm3, %v17525_v53  ;;  %5061 = vst.msk [vmem:[#allocation2 + $0x200] sm:$0xff] %vm4995_vm3, %v17525_v53 }
 0x3f1   :  { %5063 = vst.msk [vmem:[#allocation2 + $0x210] sm:$0xff] %vm4995_vm3, %v17525_v53  ;;  %5064 = vst.msk [vmem:[#allocation2 + $0x218] sm:$0xff] %vm4995_vm3, %v17525_v53 }
 0x3f2   :  { %12543 = vmatmul.mubr.msk.bf16.gmra.mrb[52].mxu0 %vm227_vm2, %v17543_v3  ;;  %v4394_v3 = vpack.c.bf16 %v11010_v43, %v11009_v38  ;;  %5066 = vst.msk [vmem:[#allocation2 + $0x228] sm:$0xff] %vm4995_vm3, %v17525_v53  ;;  %5067 = vst.msk [vmem:[#allocation2 + $0x230] sm:$0xff] %vm4995_vm3, %v17525_v53 }
 0x3f3   :  { %12546 = vmatprep.mubr.msk.bf16.mxu0 %vm227_vm2, %v15668_v62  ;;  %v4379_v62 = vpack.c.bf16 %v10980_v31, %v10979_v41  ;;  %5069 = vst.msk [vmem:[#allocation2 + $0x240] sm:$0xff] %vm4995_vm3, %v17525_v53  ;;  %5070 = vst.msk [vmem:[#allocation2 + $0x248] sm:$0xff] %vm4995_vm3, %v17525_v53  ;;  %v5364_v31 = vld [vmem:[%s17513_s3 + $0x8] sm:$0xff] }
 0x3f4   :  { %5072 = vst.msk [vmem:[#allocation2 + $0x258] sm:$0xff] %vm4995_vm3, %v17525_v53  ;;  %5073 = vst.msk [vmem:[#allocation2 + $0x260] sm:$0xff] %vm4995_vm3, %v17525_v53 }
 0x3f5   :  { %5075 = vst.msk [vmem:[#allocation2 + $0x270] sm:$0xff] %vm4995_vm3, %v17525_v53  ;;  %5076 = vst.msk [vmem:[#allocation2 + $0x278] sm:$0xff] %vm4995_vm3, %v17525_v53 }
 0x3f6   :  { %5078 = vst.msk [vmem:[#allocation2 + $0x288] sm:$0xff] %vm4995_vm3, %v17525_v53  ;;  %5079 = vst.msk [vmem:[#allocation2 + $0x290] sm:$0xff] %vm4995_vm3, %v17525_v53 }
 0x3f7   :  { %5081 = vst.msk [vmem:[#allocation2 + $0x2a0] sm:$0xff] %vm4995_vm3, %v17525_v53  ;;  %5082 = vst.msk [vmem:[#allocation2 + $0x2a8] sm:$0xff] %vm4995_vm3, %v17525_v53 }
 0x3f8   :  { %5084 = vst.msk [vmem:[#allocation2 + $0x2b8] sm:$0xff] %vm4995_vm3, %v17525_v53  ;;  %5085 = vst.msk [vmem:[#allocation2 + $0x2c0] sm:$0xff] %vm4995_vm3, %v17525_v53 }
 0x3f9   :  { %5087 = vst.msk [vmem:[#allocation2 + $0x2d0] sm:$0xff] %vm4995_vm3, %v17525_v53  ;;  %5088 = vst.msk [vmem:[#allocation2 + $0x2d8] sm:$0xff] %vm4995_vm3, %v17525_v53 }
 0x3fa   :  { %12547 = vmatmul.mubr.msk.bf16.gmra.mrb[56].mxu0 %vm227_vm2, %v15670_v63  ;;  %5090 = vst.msk [vmem:[#allocation2 + $0x2e8] sm:$0xff] %vm4995_vm3, %v17525_v53  ;;  %5091 = vst.msk [vmem:[#allocation2 + $0x2f0] sm:$0xff] %vm4995_vm3, %v17525_v53 }
 0x3fb   :  { %12550 = vmatprep.mubr.msk.bf16.mxu0 %vm227_vm2, %v15682_v7  ;;  %v10982_v7 = vld [vmem:[%s17510_s0 + $0xca] sm:$0xff]  ;;  %5093 = vst.msk [vmem:[#allocation2 + $0x300] sm:$0xff] %vm4995_vm3, %v17525_v53  ;;  %5094 = vst.msk [vmem:[#allocation2 + $0x308] sm:$0xff] %vm4995_vm3, %v17525_v53 }
 0x3fc   :  { %v4380_v63 = vpack.c.bf16 %v10982_v7, %v10981_v37  ;;  %5096 = vst.msk [vmem:[#allocation2 + $0x318] sm:$0xff] %vm4995_vm3, %v17525_v53  ;;  %5097 = vst.msk [vmem:[#allocation2 + $0x320] sm:$0xff] %vm4995_vm3, %v17525_v53  ;;  %v5365_v37 = vpack.c.bf16 %v5364_v31, %v5364_v31  ;;  %v11023_v7 = vld [vmem:[%s17510_s0 + $0x2ea] sm:$0xff] }
 0x3fd   :  { %5099 = vst.msk [vmem:[#allocation2 + $0x330] sm:$0xff] %vm4995_vm3, %v17525_v53  ;;  %5100 = vst.msk [vmem:[#allocation2 + $0x338] sm:$0xff] %vm4995_vm3, %v17525_v53 }
 0x3fe   :  { %5102 = vst.msk [vmem:[#allocation2 + $0x348] sm:$0xff] %vm4995_vm3, %v17525_v53  ;;  %5103 = vst.msk [vmem:[#allocation2 + $0x350] sm:$0xff] %vm4995_vm3, %v17525_v53  ;;  %14319 = vmatprep.subr.msk.bf16.mxu1 %vm5462_vm5, %v5365_v37 }
 0x3ff   :  { %5005 = vst.msk [vmem:[#allocation2 + $0x40] sm:$0x3] %vm4998_vm4, %v17525_v53  ;;  %4999 = vst.msk [vmem:[#allocation2 + $0x10] sm:$0x3] %vm4998_vm4, %v17525_v53 }
 0x400   :  { %5002 = vst.msk [vmem:[#allocation2 + $0x28] sm:$0x3] %vm4998_vm4, %v17525_v53  ;;  %5008 = vst.msk [vmem:[#allocation2 + $0x58] sm:$0x3] %vm4998_vm4, %v17525_v53 }
 0x401   :  { %5011 = vst.msk [vmem:[#allocation2 + $0x70] sm:$0x3] %vm4998_vm4, %v17525_v53  ;;  %5014 = vst.msk [vmem:[#allocation2 + $0x88] sm:$0x3] %vm4998_vm4, %v17525_v53 }
 0x402   :  { %12551 = vmatmul.mubr.msk.bf16.gmra.mrb[60].mxu0 %vm227_vm2, %v3855_v0  ;;  %v4395_v0 = vpack.c.bf16 %v11012_v34, %v11011_v28  ;;  %5017 = vst.msk [vmem:[#allocation2 + $0xa0] sm:$0x3] %vm4998_vm4, %v17525_v53  ;;  %5020 = vst.msk [vmem:[#allocation2 + $0xb8] sm:$0x3] %vm4998_vm4, %v17525_v53 }
 0x403   :  { %12556 = vmatprep.mubr.msk.bf16.mxu0 %vm227_vm2, %v4374_v1  ;;  %v4396_v1 = vpack.c.bf16 %v11014_v22, %v11013_v21  ;;  %5023 = vst.msk [vmem:[#allocation2 + $0xd0] sm:$0x3] %vm4998_vm4, %v17525_v53  ;;  %5026 = vst.msk [vmem:[#allocation2 + $0xe8] sm:$0x3] %vm4998_vm4, %v17525_v53 }
 0x404   :  { %5029 = vst.msk [vmem:[#allocation2 + $0x100] sm:$0x3] %vm4998_vm4, %v17525_v53  ;;  %5032 = vst.msk [vmem:[#allocation2 + $0x118] sm:$0x3] %vm4998_vm4, %v17525_v53 }
 0x405   :  { %5035 = vst.msk [vmem:[#allocation2 + $0x130] sm:$0x3] %vm4998_vm4, %v17525_v53  ;;  %5038 = vst.msk [vmem:[#allocation2 + $0x148] sm:$0x3] %vm4998_vm4, %v17525_v53 }
 0x406   :  { %5041 = vst.msk [vmem:[#allocation2 + $0x160] sm:$0x3] %vm4998_vm4, %v17525_v53  ;;  %5044 = vst.msk [vmem:[#allocation2 + $0x178] sm:$0x3] %vm4998_vm4, %v17525_v53  ;;  %v5269_v39 = vld [vmem:[#allocation2 + $0x9] sm:$0xff] }
 0x407   :  { %5047 = vst.msk [vmem:[#allocation2 + $0x190] sm:$0x3] %vm4998_vm4, %v17525_v53  ;;  %5050 = vst.msk [vmem:[#allocation2 + $0x1a8] sm:$0x3] %vm4998_vm4, %v17525_v53 }
 0x408   :  { %5053 = vst.msk [vmem:[#allocation2 + $0x1c0] sm:$0x3] %vm4998_vm4, %v17525_v53  ;;  %5056 = vst.msk [vmem:[#allocation2 + $0x1d8] sm:$0x3] %vm4998_vm4, %v17525_v53 }
 0x409   :  { %5059 = vst.msk [vmem:[#allocation2 + $0x1f0] sm:$0x3] %vm4998_vm4, %v17525_v53  ;;  %5062 = vst.msk [vmem:[#allocation2 + $0x208] sm:$0x3] %vm4998_vm4, %v17525_v53 }
 0x40a   :  { %12557 = vmatmul.mubr.msk.bf16.vlgmr.msra.gmra.mrb[0].mxu0 %vm227_vm2, %v4375_v27  ;;  %v4397_v27 = vpack.c.bf16 %v16226_v25, %v16221_v20  ;;  %5065 = vst.msk [vmem:[#allocation2 + $0x220] sm:$0x3] %vm4998_vm4, %v17525_v53  ;;  %5068 = vst.msk [vmem:[#allocation2 + $0x238] sm:$0x3] %vm4998_vm4, %v17525_v53  ;;  %v5852_v20 = vsel %vm5462_vm5, %v5267_v23, 0 }
 0x40b   :  { %12560 = vmatprep.mubr.msk.bf16.mxu0 %vm227_vm2, %v4376_v52  ;;  %v4398_v52 = vpack.c.bf16 %v16236_v50, %v16231_v49  ;;  %5071 = vst.msk [vmem:[#allocation2 + $0x250] sm:$0x3] %vm4998_vm4, %v17525_v53  ;;  %5074 = vst.msk [vmem:[#allocation2 + $0x268] sm:$0x3] %vm4998_vm4, %v17525_v53 }
 0x40c   :  { %5077 = vst.msk [vmem:[#allocation2 + $0x280] sm:$0x3] %vm4998_vm4, %v17525_v53  ;;  %5080 = vst.msk [vmem:[#allocation2 + $0x298] sm:$0x3] %vm4998_vm4, %v17525_v53 }
 0x40d   :  { %5083 = vst.msk [vmem:[#allocation2 + $0x2b0] sm:$0x3] %vm4998_vm4, %v17525_v53  ;;  %5086 = vst.msk [vmem:[#allocation2 + $0x2c8] sm:$0x3] %vm4998_vm4, %v17525_v53 }
 0x40e   :  { %5089 = vst.msk [vmem:[#allocation2 + $0x2e0] sm:$0x3] %vm4998_vm4, %v17525_v53  ;;  %5092 = vst.msk [vmem:[#allocation2 + $0x2f8] sm:$0x3] %vm4998_vm4, %v17525_v53 }
 0x40f   :  { %5095 = vst.msk [vmem:[#allocation2 + $0x310] sm:$0x3] %vm4998_vm4, %v17525_v53  ;;  %5098 = vst.msk [vmem:[#allocation2 + $0x328] sm:$0x3] %vm4998_vm4, %v17525_v53 }
 0x410   :  { %5101 = vst.msk [vmem:[#allocation2 + $0x340] sm:$0x3] %vm4998_vm4, %v17525_v53  ;;  %5104 = vst.msk [vmem:[#allocation2 + $0x358] sm:$0x3] %vm4998_vm4, %v17525_v53 }
 0x412   :  { %12561 = vmatmul.mubr.msk.bf16.gmra.mrb[4].mxu0 %vm227_vm2, %v4377_v17  ;;  %v11022_v17 = vld [vmem:[%s17510_s0 + $0x2da] sm:$0xff] }
 0x413   :  { %12564 = vmatprep.mubr.msk.bf16.mxu0 %vm227_vm2, %v4378_v12  ;;  %v4399_v12 = vpack.c.bf16 %v11020_v26, %v11019_v14  ;;  %v4400_v41 = vpack.c.bf16 %v11022_v17, %v11021_v4 }
 0x41a   :  { %12565 = vmatmul.mubr.msk.bf16.gmra.mrb[8].mxu0 %vm227_vm2, %v4379_v62  ;;  %v11024_v62 = vld [vmem:[%s17510_s0 + $0x2f2] sm:$0xff] }
 0x41b   :  { %12568 = vmatprep.mubr.msk.bf16.mxu0 %vm227_vm2, %v4380_v63  ;;  %v5464_v63 = vsel %vm5462_vm5, %v5365_v37, 0 }
 0x41c   :  { %12621 = vmatpush3.bf16.msra.mxu1 %v5464_v63 }
 0x41d   :  { %14320 = vmatprep.subr.msk.bf16.mxu1 %vm5462_vm5, %v5267_v23 }
 0x422   :  { %12569 = vmatmul.mubr.msk.bf16.gmra.mrb[12].mxu0 %vm227_vm2, %v4381_v56  ;;  %v5332_v56 = vpack.c.bf16 %v5269_v39, %v5268_v30 }
 0x423   :  { %12572 = vmatprep.mubr.msk.bf16.mxu0 %vm227_vm2, %v4382_v24  ;;  %v4401_v24 = vpack.c.bf16 %v11024_v62, %v11023_v7 }
 0x424   :  { %12622 = vmatprep.mubr.msk.bf16.mxu1 %vm4995_vm3, %v5332_v56 }
 0x42a   :  { %12573 = vmatmul.mubr.msk.bf16.gmra.mrb[16].mxu0 %vm227_vm2, %v4383_v11  ;;  %v11031_v11 = vld [vmem:[%s17510_s0 + $0x34a] sm:$0xff] }
 0x42b   :  { %12576 = vmatprep.mubr.msk.bf16.mxu0 %vm227_vm2, %v4384_v33  ;;  %v11032_v33 = vld [vmem:[%s17510_s0 + $0x352] sm:$0xff] }
 0x42c   :  { %v4405_v35 = vpack.c.bf16 %v11032_v33, %v11031_v11 }
 0x432   :  { %12577 = vmatmul.mubr.msk.bf16.gmra.mrb[20].mxu0 %vm227_vm2, %v4385_v59 }
 0x433   :  { %12580 = vmatprep.mubr.msk.bf16.mxu0 %vm227_vm2, %v4386_v8 }
 0x43a   :  { %12581 = vmatmul.mubr.msk.bf16.gmra.mrb[24].mxu0 %vm227_vm2, %v4387_v58 }
 0x43b   :  { %12584 = vmatprep.mubr.msk.bf16.mxu0 %vm227_vm2, %v15722_v54  ;;  %v11003_v54 = vld [vmem:[%s17510_s0 + $0x1fa] sm:$0xff]  ;;  %s14364_s0 = smov [#allocation3]  }
 0x43c   :  { %v4391_v6 = vpack.c.bf16 %v11004_v2, %v11003_v54 }
 0x442   :  { %12585 = vmatmul.mubr.msk.bf16.gmra.mrb[28].mxu0 %vm227_vm2, %v4389_v45 }
 0x443   :  { %12588 = vmatprep.mubr.msk.bf16.mxu0 %vm227_vm2, %v4390_v55 }
 0x44a   :  { %12589 = vmatmul.mubr.msk.bf16.gmra.mrb[32].mxu0 %vm227_vm2, %v4391_v6 }
 0x44b   :  { %12592 = vmatprep.mubr.msk.bf16.mxu0 %vm227_vm2, %v4392_v16 }
 0x452   :  { %12593 = vmatmul.mubr.msk.bf16.gmra.mrb[36].mxu0 %vm227_vm2, %v4393_v60 }
 0x453   :  { %12596 = vmatprep.mubr.msk.bf16.mxu0 %vm227_vm2, %v4394_v3 }
 0x45a   :  { %12597 = vmatmul.mubr.msk.bf16.gmra.mrb[40].mxu0 %vm227_vm2, %v4395_v0 }
 0x45b   :  { %12600 = vmatprep.mubr.msk.bf16.mxu0 %vm227_vm2, %v4396_v1 }
 0x462   :  { %12601 = vmatmul.mubr.msk.bf16.gmra.mrb[44].mxu0 %vm227_vm2, %v4397_v27 }
 0x463   :  { %12604 = vmatprep.mubr.msk.bf16.mxu0 %vm227_vm2, %v4398_v52 }
 0x46a   :  { %12605 = vmatmul.mubr.msk.bf16.gmra.mrb[48].mxu0 %vm227_vm2, %v4399_v12 }
 0x46b   :  { %12608 = vmatprep.mubr.msk.bf16.mxu0 %vm227_vm2, %v4400_v41 }
 0x472   :  { %12609 = vmatmul.mubr.msk.bf16.gmra.mrb[52].mxu0 %vm227_vm2, %v4401_v24 }
 0x473   :  { %12612 = vmatprep.mubr.msk.bf16.mxu0 %vm227_vm2, %v4402_v32 }
 0x47a   :  { %12613 = vmatmul.mubr.msk.bf16.gmra.mrb[56].mxu0 %vm227_vm2, %v4403_v9 }
 0x47b   :  { %12616 = vmatprep.mubr.msk.bf16.mxu0 %vm227_vm2, %v15772_v10  ;;  %v16523_v10 = vld [vmem:[%s17512_s2] ss:$0 sm:$0xff] }
 0x482   :  { %12617 = vmatmul.mubr.msk.bf16.gmra.mrb[60].mxu0 %vm227_vm2, %v4405_v35 }
 0x4dd   :  { %v12558_v36 = vpop.f32.mrb[0].mxu0 }
 0x4de   :  { %v4869_v59 = vadd.f32 %v12558_v36, %v16523_v10  ;;  %v4541_v8 = vpop.f32.mrb[1].mxu0 }
 0x4df   :  { %v4867_v13 = vadd.f32 %v16523_v10, %v4541_v8  ;;  %v12559_v44 = vpop.f32.mrb[2].mxu0 }
 0x4e0   :  { %v4933_v58 = vmax.f32 %v4869_v59, 0.0  ;;  %v4870_v57 = vadd.f32 %v12559_v44, %v16523_v10  ;;  %v4544_v18 = vpop.f32.mrb[3].mxu0 }
 0x4e1   :  { %v4931_v48 = vmax.f32 %v4867_v13, 0.0  ;;  %v4868_v42 = vadd.f32 %v16523_v10, %v4544_v18 }
 0x4e2   :  { %5108 = vst.msk [vmem:[#allocation2 + $0x31] sm:$0xff] %vm4995_vm3, %v4933_v58  ;;  %v4934_v45 = vmax.f32 %v4870_v57, 0.0 }
 0x4e3   :  { %5106 = vst.msk [vmem:[#allocation2 + $0x19] sm:$0xff] %vm4995_vm3, %v4931_v48  ;;  %v4932_v55 = vmax.f32 %v4868_v42, 0.0 }
 0x4e4   :  { %5109 = vst.msk [vmem:[#allocation2 + $0x39] sm:$0xff] %vm4995_vm3, %v4934_v45 }
 0x4e5   :  { %5107 = vst.msk [vmem:[#allocation2 + $0x21] sm:$0xff] %vm4995_vm3, %v4932_v55  ;;  %v12562_v54 = vpop.f32.mrb[4].mxu0 }
 0x4e6   :  { %v4873_v2 = vadd.f32 %v12562_v54, %v16523_v10  ;;  %v4557_v5 = vpop.f32.mrb[5].mxu0 }
 0x4e7   :  { %v4871_v15 = vadd.f32 %v16523_v10, %v4557_v5  ;;  %v12563_v6 = vpop.f32.mrb[6].mxu0 }
 0x4e8   :  { %v4937_v16 = vmax.f32 %v4873_v2, 0.0  ;;  %v4874_v29 = vadd.f32 %v12563_v6, %v16523_v10  ;;  %v4560_v19 = vpop.f32.mrb[7].mxu0 }
 0x4e9   :  { %v4935_v38 = vmax.f32 %v4871_v15, 0.0  ;;  %v4872_v43 = vadd.f32 %v16523_v10, %v4560_v19  ;;  %v5272_v1 = vld [vmem:[#allocation2 + $0x31] sm:$0xff] }
 0x4ea   :  { %5112 = vst.msk [vmem:[#allocation2 + $0x61] sm:$0xff] %vm4995_vm3, %v4937_v16  ;;  %v4938_v60 = vmax.f32 %v4874_v29, 0.0  ;;  %v5270_v34 = vld [vmem:[#allocation2 + $0x19] sm:$0xff] }
 0x4eb   :  { %5110 = vst.msk [vmem:[#allocation2 + $0x49] sm:$0xff] %vm4995_vm3, %v4935_v38  ;;  %v4936_v3 = vmax.f32 %v4872_v43, 0.0  ;;  %v5273_v28 = vld [vmem:[#allocation2 + $0x39] sm:$0xff] }
 0x4ec   :  { %5113 = vst.msk [vmem:[#allocation2 + $0x69] sm:$0xff] %vm4995_vm3, %v4938_v60  ;;  %v5271_v21 = vld [vmem:[#allocation2 + $0x21] sm:$0xff]  ;;  %v5334_v50 = vpack.c.bf16 %v5273_v28, %v5272_v1 }
 0x4ed   :  { %5111 = vst.msk [vmem:[#allocation2 + $0x51] sm:$0xff] %vm4995_vm3, %v4936_v3  ;;  %v12566_v22 = vpop.f32.mrb[8].mxu0  ;;  %v5333_v0 = vpack.c.bf16 %v5271_v21, %v5270_v34 }
 0x4ee   :  { %v4877_v25 = vadd.f32 %v12566_v22, %v16523_v10  ;;  %v4573_v49 = vpop.f32.mrb[9].mxu0 }
 0x4ef   :  { %v4875_v27 = vadd.f32 %v16523_v10, %v4573_v49  ;;  %v12567_v52 = vpop.f32.mrb[10].mxu0  ;;  %12623 = vmatmul.mubr.msk.bf16.vlgmr.msra.gmra.mrb[0].mxu1 %vm4995_vm3, %v5333_v0 }
 0x4f0   :  { %v4941_v14 = vmax.f32 %v4877_v25, 0.0  ;;  %v4878_v26 = vadd.f32 %v12567_v52, %v16523_v10  ;;  %v4576_v4 = vpop.f32.mrb[11].mxu0  ;;  %12626 = vmatprep.mubr.msk.bf16.mxu1 %vm4995_vm3, %v5334_v50  ;;  %12687 = vmatpush3.bf16.msra.mxu1 %v5852_v20 }
 0x4f1   :  { %v4939_v17 = vmax.f32 %v4875_v27, 0.0  ;;  %v4876_v12 = vadd.f32 %v16523_v10, %v4576_v4  ;;  %v5276_v39 = vld [vmem:[#allocation2 + $0x61] sm:$0xff] }
 0x4f2   :  { %5116 = vst.msk [vmem:[#allocation2 + $0x91] sm:$0xff] %vm4995_vm3, %v4941_v14  ;;  %v4942_v41 = vmax.f32 %v4878_v26, 0.0  ;;  %v5274_v7 = vld [vmem:[#allocation2 + $0x49] sm:$0xff] }
 0x4f3   :  { %5114 = vst.msk [vmem:[#allocation2 + $0x79] sm:$0xff] %vm4995_vm3, %v4939_v17  ;;  %v4940_v31 = vmax.f32 %v4876_v12, 0.0  ;;  %v5277_v37 = vld [vmem:[#allocation2 + $0x69] sm:$0xff] }
 0x4f4   :  { %5117 = vst.msk [vmem:[#allocation2 + $0x99] sm:$0xff] %vm4995_vm3, %v4942_v41  ;;  %v5275_v62 = vld [vmem:[#allocation2 + $0x51] sm:$0xff]  ;;  %v5336_v56 = vpack.c.bf16 %v5277_v37, %v5276_v39 }
 0x4f5   :  { %5115 = vst.msk [vmem:[#allocation2 + $0x81] sm:$0xff] %vm4995_vm3, %v4940_v31  ;;  %v12570_v63 = vpop.f32.mrb[12].mxu0  ;;  %v5335_v30 = vpack.c.bf16 %v5275_v62, %v5274_v7 }
 0x4f6   :  { %v4881_v40 = vadd.f32 %v12570_v63, %v16523_v10  ;;  %v4589_v51 = vpop.f32.mrb[13].mxu0 }
 0x4f7   :  { %v4879_v24 = vadd.f32 %v16523_v10, %v4589_v51  ;;  %v12571_v32 = vpop.f32.mrb[14].mxu0  ;;  %12627 = vmatmul.mubr.msk.bf16.gmra.mrb[4].mxu1 %vm4995_vm3, %v5335_v30 }
 0x4f8   :  { %v4945_v46 = vmax.f32 %v4881_v40, 0.0  ;;  %v4882_v47 = vadd.f32 %v12571_v32, %v16523_v10  ;;  %v4592_v9 = vpop.f32.mrb[15].mxu0  ;;  %12630 = vmatprep.mubr.msk.bf16.mxu1 %vm4995_vm3, %v5336_v56 }
 0x4f9   :  { %v4943_v11 = vmax.f32 %v4879_v24, 0.0  ;;  %v4880_v33 = vadd.f32 %v16523_v10, %v4592_v9  ;;  %v5280_v44 = vld [vmem:[#allocation2 + $0x91] sm:$0xff] }
 0x4fa   :  { %5120 = vst.msk [vmem:[#allocation2 + $0xc1] sm:$0xff] %vm4995_vm3, %v4945_v46  ;;  %v4946_v35 = vmax.f32 %v4882_v47, 0.0  ;;  %v5278_v36 = vld [vmem:[#allocation2 + $0x79] sm:$0xff] }
 0x4fb   :  { %5118 = vst.msk [vmem:[#allocation2 + $0xa9] sm:$0xff] %vm4995_vm3, %v4943_v11  ;;  %v4944_v61 = vmax.f32 %v4880_v33, 0.0  ;;  %v5281_v23 = vld [vmem:[#allocation2 + $0x99] sm:$0xff] }
 0x4fc   :  { %5121 = vst.msk [vmem:[#allocation2 + $0xc9] sm:$0xff] %vm4995_vm3, %v4946_v35  ;;  %v5279_v59 = vld [vmem:[#allocation2 + $0x81] sm:$0xff]  ;;  %v5338_v18 = vpack.c.bf16 %v5281_v23, %v5280_v44 }
 0x4fd   :  { %5119 = vst.msk [vmem:[#allocation2 + $0xb1] sm:$0xff] %vm4995_vm3, %v4944_v61  ;;  %v12574_v8 = vpop.f32.mrb[16].mxu0  ;;  %v5337_v13 = vpack.c.bf16 %v5279_v59, %v5278_v36 }
 0x4fe   :  { %v4885_v58 = vadd.f32 %v12574_v8, %v16523_v10  ;;  %v4605_v57 = vpop.f32.mrb[17].mxu0 }
 0x4ff   :  { %v4883_v48 = vadd.f32 %v16523_v10, %v4605_v57  ;;  %v12575_v42 = vpop.f32.mrb[18].mxu0  ;;  %12631 = vmatmul.mubr.msk.bf16.gmra.mrb[8].mxu1 %vm4995_vm3, %v5337_v13 }
 0x500   :  { %v4949_v45 = vmax.f32 %v4885_v58, 0.0  ;;  %v4886_v55 = vadd.f32 %v12575_v42, %v16523_v10  ;;  %v4608_v54 = vpop.f32.mrb[19].mxu0  ;;  %12634 = vmatprep.mubr.msk.bf16.mxu1 %vm4995_vm3, %v5338_v18 }
 0x501   :  { %v4947_v2 = vmax.f32 %v4883_v48, 0.0  ;;  %v4884_v5 = vadd.f32 %v16523_v10, %v4608_v54  ;;  %v5284_v60 = vld [vmem:[#allocation2 + $0xc1] sm:$0xff] }
 0x502   :  { %5124 = vst.msk [vmem:[#allocation2 + $0xf1] sm:$0xff] %vm4995_vm3, %v4949_v45  ;;  %v4950_v15 = vmax.f32 %v4886_v55, 0.0  ;;  %v5282_v29 = vld [vmem:[#allocation2 + $0xa9] sm:$0xff] }
 0x503   :  { %5122 = vst.msk [vmem:[#allocation2 + $0xd9] sm:$0xff] %vm4995_vm3, %v4947_v2  ;;  %v4948_v6 = vmax.f32 %v4884_v5, 0.0  ;;  %v5285_v16 = vld [vmem:[#allocation2 + $0xc9] sm:$0xff] }
 0x504   :  { %5125 = vst.msk [vmem:[#allocation2 + $0xf9] sm:$0xff] %vm4995_vm3, %v4950_v15  ;;  %v5283_v19 = vld [vmem:[#allocation2 + $0xb1] sm:$0xff]  ;;  %v5340_v34 = vpack.c.bf16 %v5285_v16, %v5284_v60 }
 0x505   :  { %5123 = vst.msk [vmem:[#allocation2 + $0xe1] sm:$0xff] %vm4995_vm3, %v4948_v6  ;;  %v12578_v38 = vpop.f32.mrb[20].mxu0  ;;  %v5339_v43 = vpack.c.bf16 %v5283_v19, %v5282_v29 }
 0x506   :  { %v4889_v3 = vadd.f32 %v12578_v38, %v16523_v10  ;;  %v4621_v28 = vpop.f32.mrb[21].mxu0 }
 0x507   :  { %v4887_v21 = vadd.f32 %v16523_v10, %v4621_v28  ;;  %v12579_v22 = vpop.f32.mrb[22].mxu0  ;;  %12635 = vmatmul.mubr.msk.bf16.gmra.mrb[12].mxu1 %vm4995_vm3, %v5339_v43 }
 0x508   :  { %v4953_v0 = vmax.f32 %v4889_v3, 0.0  ;;  %v4890_v1 = vadd.f32 %v12579_v22, %v16523_v10  ;;  %v4624_v20 = vpop.f32.mrb[23].mxu0  ;;  %12638 = vmatprep.mubr.msk.bf16.mxu1 %vm4995_vm3, %v5340_v34  ;;  %v5300_v34 = vld [vmem:[#allocation2 + $0x1b1] sm:$0xff] }
 0x509   :  { %v4951_v25 = vmax.f32 %v4887_v21, 0.0  ;;  %v4888_v49 = vadd.f32 %v16523_v10, %v4624_v20  ;;  %v5288_v12 = vld [vmem:[#allocation2 + $0xf1] sm:$0xff]  ;;  %v5301_v21 = vld [vmem:[#allocation2 + $0x1b9] sm:$0xff] }
 0x50a   :  { %5128 = vst.msk [vmem:[#allocation2 + $0x121] sm:$0xff] %vm4995_vm3, %v4953_v0  ;;  %v4954_v50 = vmax.f32 %v4890_v1, 0.0  ;;  %v5286_v14 = vld [vmem:[#allocation2 + $0xd9] sm:$0xff] }
 0x50b   :  { %5126 = vst.msk [vmem:[#allocation2 + $0x109] sm:$0xff] %vm4995_vm3, %v4951_v25  ;;  %v4952_v27 = vmax.f32 %v4888_v49, 0.0  ;;  %v5289_v52 = vld [vmem:[#allocation2 + $0xf9] sm:$0xff]  ;;  %v5348_v25 = vpack.c.bf16 %v5301_v21, %v5300_v34 }
 0x50c   :  { %5129 = vst.msk [vmem:[#allocation2 + $0x129] sm:$0xff] %vm4995_vm3, %v4954_v50  ;;  %v5287_v26 = vld [vmem:[#allocation2 + $0xe1] sm:$0xff]  ;;  %v5342_v37 = vpack.c.bf16 %v5289_v52, %v5288_v12 }
 0x50d   :  { %5127 = vst.msk [vmem:[#allocation2 + $0x111] sm:$0xff] %vm4995_vm3, %v4952_v27  ;;  %v12582_v4 = vpop.f32.mrb[24].mxu0  ;;  %v5341_v17 = vpack.c.bf16 %v5287_v26, %v5286_v14 }
 0x50e   :  { %v4893_v41 = vadd.f32 %v12582_v4, %v16523_v10  ;;  %v4637_v31 = vpop.f32.mrb[25].mxu0 }
 0x50f   :  { %v4891_v7 = vadd.f32 %v16523_v10, %v4637_v31  ;;  %v12583_v62 = vpop.f32.mrb[26].mxu0  ;;  %12639 = vmatmul.mubr.msk.bf16.gmra.mrb[16].mxu1 %vm4995_vm3, %v5341_v17 }
 0x510   :  { %v4957_v63 = vmax.f32 %v4893_v41, 0.0  ;;  %v4894_v30 = vadd.f32 %v12583_v62, %v16523_v10  ;;  %v4640_v39 = vpop.f32.mrb[27].mxu0  ;;  %12642 = vmatprep.mubr.msk.bf16.mxu1 %vm4995_vm3, %v5342_v37 }
 0x511   :  { %v4955_v40 = vmax.f32 %v4891_v7, 0.0  ;;  %v4892_v51 = vadd.f32 %v16523_v10, %v4640_v39  ;;  %v5292_v33 = vld [vmem:[#allocation2 + $0x121] sm:$0xff] }
 0x512   :  { %5132 = vst.msk [vmem:[#allocation2 + $0x151] sm:$0xff] %vm4995_vm3, %v4957_v63  ;;  %v4958_v56 = vmax.f32 %v4894_v30, 0.0  ;;  %v5290_v46 = vld [vmem:[#allocation2 + $0x109] sm:$0xff] }
 0x513   :  { %5130 = vst.msk [vmem:[#allocation2 + $0x139] sm:$0xff] %vm4995_vm3, %v4955_v40  ;;  %v4956_v24 = vmax.f32 %v4892_v51, 0.0  ;;  %v5293_v32 = vld [vmem:[#allocation2 + $0x129] sm:$0xff] }
 0x514   :  { %5133 = vst.msk [vmem:[#allocation2 + $0x159] sm:$0xff] %vm4995_vm3, %v4958_v56  ;;  %v5291_v47 = vld [vmem:[#allocation2 + $0x111] sm:$0xff]  ;;  %v5344_v23 = vpack.c.bf16 %v5293_v32, %v5292_v33 }
 0x515   :  { %5131 = vst.msk [vmem:[#allocation2 + $0x141] sm:$0xff] %vm4995_vm3, %v4956_v24  ;;  %v12586_v9 = vpop.f32.mrb[28].mxu0  ;;  %v5343_v11 = vpack.c.bf16 %v5291_v47, %v5290_v46 }
 0x516   :  { %v4897_v35 = vadd.f32 %v12586_v9, %v16523_v10  ;;  %v4653_v61 = vpop.f32.mrb[29].mxu0 }
 0x517   :  { %v4895_v36 = vadd.f32 %v16523_v10, %v4653_v61  ;;  %v12587_v59 = vpop.f32.mrb[30].mxu0  ;;  %12643 = vmatmul.mubr.msk.bf16.gmra.mrb[20].mxu1 %vm4995_vm3, %v5343_v11 }
 0x518   :  { %v4961_v8 = vmax.f32 %v4897_v35, 0.0  ;;  %v4898_v13 = vadd.f32 %v12587_v59, %v16523_v10  ;;  %v4656_v44 = vpop.f32.mrb[31].mxu0  ;;  %12646 = vmatprep.mubr.msk.bf16.mxu1 %vm4995_vm3, %v5344_v23 }
 0x519   :  { %v4959_v58 = vmax.f32 %v4895_v36, 0.0  ;;  %v4896_v57 = vadd.f32 %v16523_v10, %v4656_v44  ;;  %v5296_v5 = vld [vmem:[#allocation2 + $0x151] sm:$0xff] }
 0x51a   :  { %5136 = vst.msk [vmem:[#allocation2 + $0x181] sm:$0xff] %vm4995_vm3, %v4961_v8  ;;  %v4962_v18 = vmax.f32 %v4898_v13, 0.0  ;;  %v5294_v45 = vld [vmem:[#allocation2 + $0x139] sm:$0xff] }
 0x51b   :  { %5134 = vst.msk [vmem:[#allocation2 + $0x169] sm:$0xff] %vm4995_vm3, %v4959_v58  ;;  %v4960_v48 = vmax.f32 %v4896_v57, 0.0  ;;  %v5297_v42 = vld [vmem:[#allocation2 + $0x159] sm:$0xff] }
 0x51c   :  { %5137 = vst.msk [vmem:[#allocation2 + $0x189] sm:$0xff] %vm4995_vm3, %v4962_v18  ;;  %v5295_v55 = vld [vmem:[#allocation2 + $0x141] sm:$0xff]  ;;  %v5346_v16 = vpack.c.bf16 %v5297_v42, %v5296_v5 }
 0x51d   :  { %5135 = vst.msk [vmem:[#allocation2 + $0x171] sm:$0xff] %vm4995_vm3, %v4960_v48  ;;  %v12590_v54 = vpop.f32.mrb[32].mxu0  ;;  %v5345_v2 = vpack.c.bf16 %v5295_v55, %v5294_v45 }
 0x51e   :  { %v4901_v15 = vadd.f32 %v12590_v54, %v16523_v10  ;;  %v4669_v6 = vpop.f32.mrb[33].mxu0 }
 0x51f   :  { %v4899_v29 = vadd.f32 %v16523_v10, %v4669_v6  ;;  %v12591_v19 = vpop.f32.mrb[34].mxu0  ;;  %12647 = vmatmul.mubr.msk.bf16.gmra.mrb[24].mxu1 %vm4995_vm3, %v5345_v2 }
 0x520   :  { %v4965_v38 = vmax.f32 %v4901_v15, 0.0  ;;  %v4902_v43 = vadd.f32 %v12591_v19, %v16523_v10  ;;  %v4672_v60 = vpop.f32.mrb[35].mxu0  ;;  %12650 = vmatprep.mubr.msk.bf16.mxu1 %vm4995_vm3, %v5346_v16 }
 0x521   :  { %v4963_v3 = vmax.f32 %v4899_v29, 0.0  ;;  %v4900_v28 = vadd.f32 %v16523_v10, %v4672_v60 }
 0x522   :  { %5140 = vst.msk [vmem:[#allocation2 + $0x1e1] sm:$0xff] %vm4995_vm3, %v4965_v38  ;;  %v4966_v22 = vmax.f32 %v4902_v43, 0.0  ;;  %v5298_v1 = vld [vmem:[#allocation2 + $0x169] sm:$0xff] }
 0x523   :  { %5138 = vst.msk [vmem:[#allocation2 + $0x1c9] sm:$0xff] %vm4995_vm3, %v4963_v3  ;;  %v4964_v0 = vmax.f32 %v4900_v28, 0.0 }
 0x524   :  { %5141 = vst.msk [vmem:[#allocation2 + $0x1e9] sm:$0xff] %vm4995_vm3, %v4966_v22  ;;  %v5299_v20 = vld [vmem:[#allocation2 + $0x171] sm:$0xff] }
 0x525   :  { %5139 = vst.msk [vmem:[#allocation2 + $0x1d1] sm:$0xff] %vm4995_vm3, %v4964_v0  ;;  %v12594_v49 = vpop.f32.mrb[36].mxu0  ;;  %v5347_v50 = vpack.c.bf16 %v5299_v20, %v5298_v1 }
 0x526   :  { %v4905_v27 = vadd.f32 %v12594_v49, %v16523_v10  ;;  %v4685_v52 = vpop.f32.mrb[37].mxu0 }
 0x527   :  { %v4903_v14 = vadd.f32 %v16523_v10, %v4685_v52  ;;  %v12595_v26 = vpop.f32.mrb[38].mxu0  ;;  %12651 = vmatmul.mubr.msk.bf16.gmra.mrb[28].mxu1 %vm4995_vm3, %v5347_v50 }
 0x528   :  { %v4969_v4 = vmax.f32 %v4905_v27, 0.0  ;;  %v4906_v17 = vadd.f32 %v12595_v26, %v16523_v10  ;;  %v4688_v12 = vpop.f32.mrb[39].mxu0  ;;  %12654 = vmatprep.mubr.msk.bf16.mxu1 %vm4995_vm3, %v5348_v25 }
 0x529   :  { %v4967_v41 = vmax.f32 %v4903_v14, 0.0  ;;  %v4904_v31 = vadd.f32 %v16523_v10, %v4688_v12  ;;  %v5304_v51 = vld [vmem:[#allocation2 + $0x1e1] sm:$0xff] }
 0x52a   :  { %5144 = vst.msk [vmem:[#allocation2 + $0x211] sm:$0xff] %vm4995_vm3, %v4969_v4  ;;  %v4970_v37 = vmax.f32 %v4906_v17, 0.0  ;;  %v5302_v63 = vld [vmem:[#allocation2 + $0x1c9] sm:$0xff] }
 0x52b   :  { %5142 = vst.msk [vmem:[#allocation2 + $0x1f9] sm:$0xff] %vm4995_vm3, %v4967_v41  ;;  %v4968_v7 = vmax.f32 %v4904_v31, 0.0  ;;  %v5305_v62 = vld [vmem:[#allocation2 + $0x1e9] sm:$0xff] }
 0x52c   :  { %5145 = vst.msk [vmem:[#allocation2 + $0x219] sm:$0xff] %vm4995_vm3, %v4970_v37  ;;  %v5303_v30 = vld [vmem:[#allocation2 + $0x1d1] sm:$0xff]  ;;  %v5350_v32 = vpack.c.bf16 %v5305_v62, %v5304_v51 }
 0x52d   :  { %5143 = vst.msk [vmem:[#allocation2 + $0x201] sm:$0xff] %vm4995_vm3, %v4968_v7  ;;  %v12598_v39 = vpop.f32.mrb[40].mxu0  ;;  %v5349_v40 = vpack.c.bf16 %v5303_v30, %v5302_v63 }
 0x52e   :  { %v4909_v56 = vadd.f32 %v12598_v39, %v16523_v10  ;;  %v4701_v24 = vpop.f32.mrb[41].mxu0 }
 0x52f   :  { %v4907_v46 = vadd.f32 %v16523_v10, %v4701_v24  ;;  %v12599_v47 = vpop.f32.mrb[42].mxu0  ;;  %12655 = vmatmul.mubr.msk.bf16.gmra.mrb[32].mxu1 %vm4995_vm3, %v5349_v40 }
 0x530   :  { %v4973_v9 = vmax.f32 %v4909_v56, 0.0  ;;  %v4910_v11 = vadd.f32 %v12599_v47, %v16523_v10  ;;  %v4704_v33 = vpop.f32.mrb[43].mxu0  ;;  %12658 = vmatprep.mubr.msk.bf16.mxu1 %vm4995_vm3, %v5350_v32 }
 0x531   :  { %v4971_v35 = vmax.f32 %v4907_v46, 0.0  ;;  %v4908_v61 = vadd.f32 %v16523_v10, %v4704_v33  ;;  %v5308_v57 = vld [vmem:[#allocation2 + $0x211] sm:$0xff] }
 0x532   :  { %5148 = vst.msk [vmem:[#allocation2 + $0x241] sm:$0xff] %vm4995_vm3, %v4973_v9  ;;  %v4974_v23 = vmax.f32 %v4910_v11, 0.0  ;;  %v5306_v8 = vld [vmem:[#allocation2 + $0x1f9] sm:$0xff] }
 0x533   :  { %5146 = vst.msk [vmem:[#allocation2 + $0x229] sm:$0xff] %vm4995_vm3, %v4971_v35  ;;  %v4972_v36 = vmax.f32 %v4908_v61, 0.0  ;;  %v5309_v59 = vld [vmem:[#allocation2 + $0x219] sm:$0xff] }
 0x534   :  { %5149 = vst.msk [vmem:[#allocation2 + $0x249] sm:$0xff] %vm4995_vm3, %v4974_v23  ;;  %v5307_v13 = vld [vmem:[#allocation2 + $0x201] sm:$0xff]  ;;  %v5352_v42 = vpack.c.bf16 %v5309_v59, %v5308_v57 }
 0x535   :  { %5147 = vst.msk [vmem:[#allocation2 + $0x231] sm:$0xff] %vm4995_vm3, %v4972_v36  ;;  %v12602_v44 = vpop.f32.mrb[44].mxu0  ;;  %v5351_v58 = vpack.c.bf16 %v5307_v13, %v5306_v8 }
 0x536   :  { %v4913_v18 = vadd.f32 %v12602_v44, %v16523_v10  ;;  %v4717_v48 = vpop.f32.mrb[45].mxu0  ;;  %v6239_v44 = vld [vmem:[%s17513_s3 + $0x10] sm:$0xff] }
 0x537   :  { %v4911_v45 = vadd.f32 %v16523_v10, %v4717_v48  ;;  %v12603_v55 = vpop.f32.mrb[46].mxu0  ;;  %12659 = vmatmul.mubr.msk.bf16.gmra.mrb[36].mxu1 %vm4995_vm3, %v5351_v58  ;;  %v6240_v48 = vpack.c.bf16 %v6239_v44, %v6239_v44 }
 0x538   :  { %v4977_v54 = vmax.f32 %v4913_v18, 0.0  ;;  %v4914_v2 = vadd.f32 %v12603_v55, %v16523_v10  ;;  %v4720_v5 = vpop.f32.mrb[47].mxu0  ;;  %12662 = vmatprep.mubr.msk.bf16.mxu1 %vm4995_vm3, %v5352_v42 }
 0x539   :  { %v4975_v15 = vmax.f32 %v4911_v45, 0.0  ;;  %v4912_v6 = vadd.f32 %v16523_v10, %v4720_v5  ;;  %v5312_v28 = vld [vmem:[#allocation2 + $0x241] sm:$0xff]  ;;  %14321 = vmatprep.subr.msk.bf16.mxu1 %vm5462_vm5, %v6240_v48 }
 0x53a   :  { %5152 = vst.msk [vmem:[#allocation2 + $0x271] sm:$0xff] %vm4995_vm3, %v4977_v54  ;;  %v4978_v16 = vmax.f32 %v4914_v2, 0.0  ;;  %v5310_v38 = vld [vmem:[#allocation2 + $0x229] sm:$0xff] }
 0x53b   :  { %5150 = vst.msk [vmem:[#allocation2 + $0x259] sm:$0xff] %vm4995_vm3, %v4975_v15  ;;  %v4976_v29 = vmax.f32 %v4912_v6, 0.0  ;;  %v5313_v19 = vld [vmem:[#allocation2 + $0x249] sm:$0xff] }
 0x53c   :  { %5153 = vst.msk [vmem:[#allocation2 + $0x279] sm:$0xff] %vm4995_vm3, %v4978_v16  ;;  %v5311_v43 = vld [vmem:[#allocation2 + $0x231] sm:$0xff]  ;;  %v5354_v22 = vpack.c.bf16 %v5313_v19, %v5312_v28 }
 0x53d   :  { %5151 = vst.msk [vmem:[#allocation2 + $0x261] sm:$0xff] %vm4995_vm3, %v4976_v29  ;;  %v12606_v60 = vpop.f32.mrb[48].mxu0  ;;  %v5353_v3 = vpack.c.bf16 %v5311_v43, %v5310_v38 }
 0x53e   :  { %v4917_v34 = vadd.f32 %v12606_v60, %v16523_v10  ;;  %v4733_v21 = vpop.f32.mrb[49].mxu0 }
 0x53f   :  { %v4915_v0 = vadd.f32 %v16523_v10, %v4733_v21  ;;  %v12607_v1 = vpop.f32.mrb[50].mxu0  ;;  %12663 = vmatmul.mubr.msk.bf16.gmra.mrb[40].mxu1 %vm4995_vm3, %v5353_v3 }
 0x540   :  { %v4981_v20 = vmax.f32 %v4917_v34, 0.0  ;;  %v4918_v25 = vadd.f32 %v12607_v1, %v16523_v10  ;;  %v4736_v49 = vpop.f32.mrb[51].mxu0  ;;  %12666 = vmatprep.mubr.msk.bf16.mxu1 %vm4995_vm3, %v5354_v22 }
 0x541   :  { %v4979_v50 = vmax.f32 %v4915_v0, 0.0  ;;  %v4916_v27 = vadd.f32 %v16523_v10, %v4736_v49  ;;  %v5316_v31 = vld [vmem:[#allocation2 + $0x271] sm:$0xff] }
 0x542   :  { %5156 = vst.msk [vmem:[#allocation2 + $0x2a1] sm:$0xff] %vm4995_vm3, %v4981_v20  ;;  %v4982_v52 = vmax.f32 %v4918_v25, 0.0  ;;  %v5314_v4 = vld [vmem:[#allocation2 + $0x259] sm:$0xff] }
 0x543   :  { %5154 = vst.msk [vmem:[#allocation2 + $0x289] sm:$0xff] %vm4995_vm3, %v4979_v50  ;;  %v4980_v14 = vmax.f32 %v4916_v27, 0.0  ;;  %v5317_v26 = vld [vmem:[#allocation2 + $0x279] sm:$0xff] }
 0x544   :  { %5157 = vst.msk [vmem:[#allocation2 + $0x2a9] sm:$0xff] %vm4995_vm3, %v4982_v52  ;;  %v5315_v17 = vld [vmem:[#allocation2 + $0x261] sm:$0xff]  ;;  %v5356_v62 = vpack.c.bf16 %v5317_v26, %v5316_v31 }
 0x545   :  { %5155 = vst.msk [vmem:[#allocation2 + $0x291] sm:$0xff] %vm4995_vm3, %v4980_v14  ;;  %v12610_v12 = vpop.f32.mrb[52].mxu0  ;;  %v5355_v41 = vpack.c.bf16 %v5315_v17, %v5314_v4  ;;  %v5171_v26 = vld [vmem:[#allocation2 + $0x8] sm:$0xff]  ;;  %v5173_v31 = vld [vmem:[#allocation2 + $0x20] sm:$0xff] }
 0x546   :  { %v4921_v37 = vadd.f32 %v12610_v12, %v16523_v10  ;;  %v4749_v7 = vpop.f32.mrb[53].mxu0 }
 0x547   :  { %v4919_v63 = vadd.f32 %v16523_v10, %v4749_v7  ;;  %v12611_v30 = vpop.f32.mrb[54].mxu0  ;;  %12667 = vmatmul.mubr.msk.bf16.gmra.mrb[44].mxu1 %vm4995_vm3, %v5355_v41  ;;  %v5172_v7 = vld [vmem:[#allocation2 + $0x18] sm:$0xff] }
 0x548   :  { %v4985_v39 = vmax.f32 %v4921_v37, 0.0  ;;  %v4922_v40 = vadd.f32 %v12611_v30, %v16523_v10  ;;  %v4752_v51 = vpop.f32.mrb[55].mxu0  ;;  %12670 = vmatprep.mubr.msk.bf16.mxu1 %vm4995_vm3, %v5356_v62  ;;  %v5175_v37 = vld [vmem:[#allocation2 + $0x38] sm:$0xff]  ;;  %v16690_v62 = vpack.c.bf16 %v5173_v31, %v5172_v7  ;;  %v6338_v30 = vsel %vm5462_vm5, %v6240_v48, 0  ;;  %v5212_v31 = vld [vmem:[#allocation2 + $0x228] sm:$0xff]  ;;  %v5214_v7 = vld [vmem:[#allocation2 + $0x240] sm:$0xff] }
 0x549   :  { %v4983_v56 = vmax.f32 %v4919_v63, 0.0  ;;  %v4920_v24 = vadd.f32 %v16523_v10, %v4752_v51  ;;  %v5320_v61 = vld [vmem:[#allocation2 + $0x2a1] sm:$0xff]  ;;  %v5174_v63 = vld [vmem:[#allocation2 + $0x30] sm:$0xff] }
 0x54a   :  { %5160 = vst.msk [vmem:[#allocation2 + $0x2d1] sm:$0xff] %vm4995_vm3, %v4985_v39  ;;  %v4986_v32 = vmax.f32 %v4922_v40, 0.0  ;;  %v5318_v9 = vld [vmem:[#allocation2 + $0x289] sm:$0xff]  ;;  %v16693_v39 = vpack.c.bf16 %v5175_v37, %v5174_v63 }
 0x54b   :  { %5158 = vst.msk [vmem:[#allocation2 + $0x2b9] sm:$0xff] %vm4995_vm3, %v4983_v56  ;;  %v4984_v46 = vmax.f32 %v4920_v24, 0.0  ;;  %v5321_v47 = vld [vmem:[#allocation2 + $0x2a9] sm:$0xff] }
 0x54c   :  { %5161 = vst.msk [vmem:[#allocation2 + $0x2d9] sm:$0xff] %vm4995_vm3, %v4986_v32  ;;  %v5319_v11 = vld [vmem:[#allocation2 + $0x291] sm:$0xff]  ;;  %v5358_v59 = vpack.c.bf16 %v5321_v47, %v5320_v61  ;;  %v5179_v51 = vld [vmem:[#allocation2 + $0x68] sm:$0xff]  ;;  %v5178_v32 = vld [vmem:[#allocation2 + $0x60] sm:$0xff] }
 0x54d   :  { %5159 = vst.msk [vmem:[#allocation2 + $0x2c1] sm:$0xff] %vm4995_vm3, %v4984_v46  ;;  %v12614_v33 = vpop.f32.mrb[56].mxu0  ;;  %v5357_v35 = vpack.c.bf16 %v5319_v11, %v5318_v9  ;;  %v5177_v40 = vld [vmem:[#allocation2 + $0x50] sm:$0xff]  ;;  %v5176_v56 = vld [vmem:[#allocation2 + $0x48] sm:$0xff]  ;;  %v16701_v46 = vpack.c.bf16 %v5179_v51, %v5178_v32  ;;  %v5181_v47 = vld [vmem:[#allocation2 + $0x80] sm:$0xff] }
 0x54e   :  { %v4925_v23 = vadd.f32 %v12614_v33, %v16523_v10  ;;  %v4765_v36 = vpop.f32.mrb[57].mxu0  ;;  %v16699_v24 = vpack.c.bf16 %v5177_v40, %v5176_v56  ;;  %v5183_v9 = vld [vmem:[#allocation2 + $0x98] sm:$0xff]  ;;  %v5218_v32 = vld [vmem:[#allocation2 + $0x270] sm:$0xff] }
 0x54f   :  { %v4923_v8 = vadd.f32 %v16523_v10, %v4765_v36  ;;  %v12615_v13 = vpop.f32.mrb[58].mxu0  ;;  %12671 = vmatmul.mubr.msk.bf16.gmra.mrb[48].mxu1 %vm4995_vm3, %v5357_v35  ;;  %v5180_v11 = vld [vmem:[#allocation2 + $0x78] sm:$0xff]  ;;  %v5182_v35 = vld [vmem:[#allocation2 + $0x90] sm:$0xff]  ;;  %v5187_v36 = vld [vmem:[#allocation2 + $0xc8] sm:$0xff] }
 0x550   :  { %v4989_v58 = vmax.f32 %v4925_v23, 0.0  ;;  %v4926_v57 = vadd.f32 %v12615_v13, %v16523_v10  ;;  %v4768_v18 = vpop.f32.mrb[59].mxu0  ;;  %12674 = vmatprep.mubr.msk.bf16.mxu1 %vm4995_vm3, %v5358_v59  ;;  %v16707_v33 = vpack.c.bf16 %v5181_v47, %v5180_v11  ;;  %v16709_v61 = vpack.c.bf16 %v5183_v9, %v5182_v35  ;;  %v5185_v23 = vld [vmem:[#allocation2 + $0xb0] sm:$0xff]  ;;  %v5184_v59 = vld [vmem:[#allocation2 + $0xa8] sm:$0xff]  ;;  %v5186_v13 = vld [vmem:[#allocation2 + $0xc0] sm:$0xff] }
 0x551   :  { %v4987_v42 = vmax.f32 %v4923_v8, 0.0  ;;  %v4924_v45 = vadd.f32 %v16523_v10, %v4768_v18  ;;  %v5324_v29 = vld [vmem:[#allocation2 + $0x2d1] sm:$0xff]  ;;  %v16715_v8 = vpack.c.bf16 %v5185_v23, %v5184_v59  ;;  %v16717_v44 = vpack.c.bf16 %v5187_v36, %v5186_v13  ;;  %v5223_v11 = vld [vmem:[#allocation2 + $0x2a8] sm:$0xff]  ;;  %v5222_v36 = vld [vmem:[#allocation2 + $0x2a0] sm:$0xff] }
 0x552   :  { %5164 = vst.msk [vmem:[#allocation2 + $0x301] sm:$0xff] %vm4995_vm3, %v4989_v58  ;;  %v4990_v55 = vmax.f32 %v4926_v57, 0.0  ;;  %v5322_v5 = vld [vmem:[#allocation2 + $0x2b9] sm:$0xff]  ;;  %v5221_v9 = vld [vmem:[#allocation2 + $0x290] sm:$0xff]  ;;  %v5220_v35 = vld [vmem:[#allocation2 + $0x288] sm:$0xff]  ;;  %v16786_v59 = vpack.c.bf16 %v5223_v11, %v5222_v36 }
 0x553   :  { %5162 = vst.msk [vmem:[#allocation2 + $0x2e9] sm:$0xff] %vm4995_vm3, %v4987_v42  ;;  %v4988_v54 = vmax.f32 %v4924_v45, 0.0  ;;  %v5325_v2 = vld [vmem:[#allocation2 + $0x2d9] sm:$0xff]  ;;  %v5190_v42 = vld [vmem:[#allocation2 + $0xf0] sm:$0xff]  ;;  %v16784_v23 = vpack.c.bf16 %v5221_v9, %v5220_v35  ;;  %v6154_v9 = vld [vmem:[#allocation2 + $0x82] sm:$0xff] }
 0x554   :  { %5165 = vst.msk [vmem:[#allocation2 + $0x309] sm:$0xff] %vm4995_vm3, %v4990_v55  ;;  %v5323_v15 = vld [vmem:[#allocation2 + $0x2c1] sm:$0xff]  ;;  %v5360_v43 = vpack.c.bf16 %v5325_v2, %v5324_v29  ;;  %v5191_v57 = vld [vmem:[#allocation2 + $0xf8] sm:$0xff]  ;;  %v5193_v55 = vld [vmem:[#allocation2 + $0x110] sm:$0xff] }
 0x555   :  { %5163 = vst.msk [vmem:[#allocation2 + $0x2f1] sm:$0xff] %vm4995_vm3, %v4988_v54  ;;  %v12618_v6 = vpop.f32.mrb[60].mxu0  ;;  %v5359_v16 = vpack.c.bf16 %v5323_v15, %v5322_v5  ;;  %v5189_v58 = vld [vmem:[#allocation2 + $0xe0] sm:$0xff]  ;;  %v5188_v18 = vld [vmem:[#allocation2 + $0xd8] sm:$0xff]  ;;  %v16725_v45 = vpack.c.bf16 %v5191_v57, %v5190_v42  ;;  %v5195_v54 = vld [vmem:[#allocation2 + $0x128] sm:$0xff] }
 0x556   :  { %v4929_v19 = vadd.f32 %v12618_v6, %v16523_v10  ;;  %v4781_v38 = vpop.f32.mrb[61].mxu0  ;;  %v16723_v48 = vpack.c.bf16 %v5189_v58, %v5188_v18  ;;  %v5192_v2 = vld [vmem:[#allocation2 + $0x108] sm:$0xff]  ;;  %v5194_v15 = vld [vmem:[#allocation2 + $0x120] sm:$0xff]  ;;  %v5199_v29 = vld [vmem:[#allocation2 + $0x158] sm:$0xff] }
 0x557   :  { %v4927_v60 = vadd.f32 %v16523_v10, %v4781_v38  ;;  %v12619_v3 = vpop.f32.mrb[62].mxu0  ;;  %12675 = vmatmul.mubr.msk.bf16.gmra.mrb[52].mxu1 %vm4995_vm3, %v5359_v16  ;;  %v16731_v5 = vpack.c.bf16 %v5193_v55, %v5192_v2  ;;  %v16733_v6 = vpack.c.bf16 %v5195_v54, %v5194_v15  ;;  %v5197_v16 = vld [vmem:[#allocation2 + $0x140] sm:$0xff]  ;;  %v5219_v40 = vld [vmem:[#allocation2 + $0x278] sm:$0xff]  ;;  %v5226_v54 = vld [vmem:[#allocation2 + $0x2d0] sm:$0xff] }
 0x558   :  { %v4993_v28 = vmax.f32 %v4929_v19, 0.0  ;;  %v4930_v34 = vadd.f32 %v12619_v3, %v16523_v10  ;;  %v4784_v21 = vpop.f32.mrb[63].mxu0  ;;  %12678 = vmatprep.mubr.msk.bf16.mxu1 %vm4995_vm3, %v5360_v43  ;;  %v5196_v19 = vld [vmem:[#allocation2 + $0x138] sm:$0xff]  ;;  %v5198_v43 = vld [vmem:[#allocation2 + $0x150] sm:$0xff]  ;;  %v16778_v47 = vpack.c.bf16 %v5219_v40, %v5218_v32  ;;  %v5225_v57 = vld [vmem:[#allocation2 + $0x2c0] sm:$0xff] }
 0x559   :  { %v4991_v22 = vmax.f32 %v4927_v60, 0.0  ;;  %v4928_v0 = vadd.f32 %v16523_v10, %v4784_v21  ;;  %v5328_v52 = vld [vmem:[#allocation2 + $0x301] sm:$0xff]  ;;  %v16739_v38 = vpack.c.bf16 %v5197_v16, %v5196_v19  ;;  %v16741_v60 = vpack.c.bf16 %v5199_v29, %v5198_v43  ;;  %v5202_v3 = vld [vmem:[#allocation2 + $0x1b0] sm:$0xff]  ;;  %v5216_v51 = vld [vmem:[#allocation2 + $0x258] sm:$0xff] }
 0x55a   :  { %5168 = vst.msk [vmem:[#allocation2 + $0x331] sm:$0xff] %vm4995_vm3, %v4993_v28  ;;  %v4994_v1 = vmax.f32 %v4930_v34, 0.0  ;;  %v5326_v49 = vld [vmem:[#allocation2 + $0x2e9] sm:$0xff]  ;;  %v5170_v10 = vld [vmem:[#allocation2] sm:$0xff]  ;;  %v5203_v28 = vld [vmem:[#allocation2 + $0x1b8] sm:$0xff] }
 0x55b   :  { %5166 = vst.msk [vmem:[#allocation2 + $0x319] sm:$0xff] %vm4995_vm3, %v4991_v22  ;;  %v4992_v20 = vmax.f32 %v4928_v0, 0.0  ;;  %v5329_v25 = vld [vmem:[#allocation2 + $0x309] sm:$0xff]  ;;  %v5234_v12 = vpack.c.bf16 %v5171_v26, %v5170_v10  ;;  %v5250_v22 = vpack.c.bf16 %v5203_v28, %v5202_v3  ;;  %v5208_v10 = vld [vmem:[#allocation2 + $0x1f8] sm:$0xff]  ;;  %v5230_v43 = vld [vmem:[#allocation2 + $0x300] sm:$0xff] }
 0x55c   :  { %5169 = vst.msk [vmem:[#allocation2 + $0x339] sm:$0xff] %vm4995_vm3, %v4994_v1  ;;  %v5327_v50 = vld [vmem:[#allocation2 + $0x2f1] sm:$0xff]  ;;  %v5362_v14 = vpack.c.bf16 %v5329_v25, %v5328_v52  ;;  %v5200_v21 = vld [vmem:[#allocation2 + $0x168] sm:$0xff]  ;;  %v5209_v52 = vld [vmem:[#allocation2 + $0x200] sm:$0xff] }
 0x55d   :  { %5167 = vst.msk [vmem:[#allocation2 + $0x321] sm:$0xff] %vm4995_vm3, %v4992_v20  ;;  %v5361_v27 = vpack.c.bf16 %v5327_v50, %v5326_v49  ;;  %v5201_v34 = vld [vmem:[#allocation2 + $0x170] sm:$0xff]  ;;  %v5207_v20 = vld [vmem:[#allocation2 + $0x1e8] sm:$0xff]  ;;  %v5206_v50 = vld [vmem:[#allocation2 + $0x1e0] sm:$0xff]  ;;  %v16760_v26 = vpack.c.bf16 %v5209_v52, %v5208_v10 }
 0x55e   :  { %v16747_v0 = vpack.c.bf16 %v5201_v34, %v5200_v21  ;;  %v5205_v1 = vld [vmem:[#allocation2 + $0x1d0] sm:$0xff]  ;;  %v5204_v25 = vld [vmem:[#allocation2 + $0x1c8] sm:$0xff]  ;;  %v6789_v13 = vld [vmem:[%s17513_s3 + $0x18] sm:$0xff] }
 0x55f   :  { %12679 = vmatmul.mubr.msk.bf16.gmra.mrb[56].mxu1 %vm4995_vm3, %v5361_v27  ;;  %v16752_v49 = vpack.c.bf16 %v5205_v1, %v5204_v25  ;;  %v16754_v27 = vpack.c.bf16 %v5207_v20, %v5206_v50  ;;  %v6790_v58 = vpack.c.bf16 %v6789_v13, %v6789_v13  ;;  %v5227_v18 = vld [vmem:[#allocation2 + $0x2d8] sm:$0xff]  ;;  %v5229_v15 = vld [vmem:[#allocation2 + $0x2f0] sm:$0xff]  ;;  %v5231_v16 = vld [vmem:[#allocation2 + $0x308] sm:$0xff] }
 0x560   :  { %12682 = vmatprep.mubr.msk.bf16.mxu1 %vm4995_vm3, %v5362_v14  ;;  %v5211_v14 = vld [vmem:[#allocation2 + $0x218] sm:$0xff]  ;;  %v16798_v2 = vpack.c.bf16 %v5227_v18, %v5226_v54  ;;  %v5228_v29 = vld [vmem:[#allocation2 + $0x2e8] sm:$0xff]  ;;  %v16806_v3 = vpack.c.bf16 %v5231_v16, %v5230_v43 }
 0x561   :  { %v5224_v42 = vld [vmem:[#allocation2 + $0x2b8] sm:$0xff]  ;;  %v16804_v19 = vpack.c.bf16 %v5229_v15, %v5228_v29  ;;  %v6143_v28 = vld [vmem:[#allocation2 + $0x2] sm:$0xff]  ;;  %v6144_v34 = vld [vmem:[#allocation2 + $0xa] sm:$0xff] }
 0x562   :  { %v5330_v4 = vld [vmem:[#allocation2 + $0x319] sm:$0xff]  ;;  %v16796_v55 = vpack.c.bf16 %v5225_v57, %v5224_v42  ;;  %v6207_v1 = vpack.c.bf16 %v6144_v34, %v6143_v28  ;;  %v6146_v50 = vld [vmem:[#allocation2 + $0x22] sm:$0xff]  ;;  %v6160_v42 = vld [vmem:[#allocation2 + $0xca] sm:$0xff] }
 0x563   :  { %v6145_v25 = vld [vmem:[#allocation2 + $0x1a] sm:$0xff]  ;;  %v6147_v52 = vld [vmem:[#allocation2 + $0x32] sm:$0xff]  ;;  %v6159_v18 = vld [vmem:[#allocation2 + $0xc2] sm:$0xff] }
 0x564   :  { %v5331_v17 = vld [vmem:[#allocation2 + $0x321] sm:$0xff]  ;;  %v16817_v10 = vpack.c.bf16 %v6146_v50, %v6145_v25  ;;  %v6155_v11 = vld [vmem:[#allocation2 + $0x92] sm:$0xff]  ;;  %v16844_v15 = vpack.c.bf16 %v6160_v42, %v6159_v18  ;;  %v6168_v50 = vld [vmem:[#allocation2 + $0x12a] sm:$0xff] }
 0x565   :  { %v5363_v41 = vpack.c.bf16 %v5331_v17, %v5330_v4  ;;  %v5210_v4 = vld [vmem:[#allocation2 + $0x210] sm:$0xff]  ;;  %v5233_v21 = vld [vmem:[#allocation2 + $0x320] sm:$0xff] }
 0x566   :  { %v16762_v17 = vpack.c.bf16 %v5211_v14, %v5210_v4  ;;  %v6148_v14 = vld [vmem:[#allocation2 + $0x3a] sm:$0xff]  ;;  %v6888_v4 = vsel %vm5462_vm5, %v6790_v58, 0  ;;  %v6158_v57 = vld [vmem:[#allocation2 + $0xb2] sm:$0xff]  ;;  %v6162_v29 = vld [vmem:[#allocation2 + $0xe2] sm:$0xff] }
 0x567   :  { %12683 = vmatmul.mubr.msk.bf16.gmra.mrb[60].mxu1 %vm4995_vm3, %v5363_v41  ;;  %v5215_v41 = vld [vmem:[#allocation2 + $0x248] sm:$0xff]  ;;  %v6153_v32 = vld [vmem:[#allocation2 + $0x7a] sm:$0xff]  ;;  %v6163_v43 = vld [vmem:[#allocation2 + $0xf2] sm:$0xff] }
 0x568   :  { %12688 = vmatprep.mubr.msk.bf16.mxu1 %vm4995_vm3, %v5234_v12  ;;  %v5213_v12 = vld [vmem:[#allocation2 + $0x230] sm:$0xff]  ;;  %v16770_v63 = vpack.c.bf16 %v5215_v41, %v5214_v7  ;;  %v6151_v7 = vld [vmem:[#allocation2 + $0x62] sm:$0xff]  ;;  %v6156_v35 = vld [vmem:[#allocation2 + $0x9a] sm:$0xff]  ;;  %v16834_v36 = vpack.c.bf16 %v6154_v9, %v6153_v32 }
 0x569   :  { %v16768_v37 = vpack.c.bf16 %v5213_v12, %v5212_v31  ;;  %v16820_v12 = vpack.c.bf16 %v6148_v14, %v6147_v52  ;;  %v6149_v41 = vld [vmem:[#allocation2 + $0x4a] sm:$0xff]  ;;  %v6150_v31 = vld [vmem:[#allocation2 + $0x52] sm:$0xff]  ;;  %v16836_v13 = vpack.c.bf16 %v6156_v35, %v6155_v11  ;;  %v6161_v16 = vld [vmem:[#allocation2 + $0xda] sm:$0xff] }
 0x56a   :  { %v16826_v40 = vpack.c.bf16 %v6150_v31, %v6149_v41  ;;  %v6164_v28 = vld [vmem:[#allocation2 + $0xfa] sm:$0xff]  ;;  %v16850_v34 = vpack.c.bf16 %v6162_v29, %v6161_v16  ;;  %v6167_v25 = vld [vmem:[#allocation2 + $0x122] sm:$0xff]  ;;  %v6171_v31 = vld [vmem:[#allocation2 + $0x152] sm:$0xff] }
 0x56b   :  { %v16860_v14 = vpack.c.bf16 %v6168_v50, %v6167_v25  ;;  %v6170_v41 = vld [vmem:[#allocation2 + $0x142] sm:$0xff]  ;;  %v6175_v9 = vld [vmem:[#allocation2 + $0x1b2] sm:$0xff]  ;;  %v6176_v11 = vld [vmem:[#allocation2 + $0x1ba] sm:$0xff] }
 0x56c   :  { %v6173_v35 = vld [vmem:[#allocation2 + $0x16a] sm:$0xff]  ;;  %v6178_v16 = vld [vmem:[#allocation2 + $0x1d2] sm:$0xff]  ;;  %v6179_v29 = vld [vmem:[#allocation2 + $0x1e2] sm:$0xff] }
 0x56d   :  { %v6177_v42 = vld [vmem:[#allocation2 + $0x1ca] sm:$0xff]  ;;  %v6182_v25 = vld [vmem:[#allocation2 + $0x202] sm:$0xff]  ;;  %v6183_v50 = vld [vmem:[#allocation2 + $0x212] sm:$0xff] }
 0x56e   :  { %v6199_v53 = vld [vmem:[#allocation2 + $0x2d2] sm:$0xff] }
 0x56f   :  { %12689 = vmatmul.mubr.msk.bf16.vlgmr.msra.gmra.mrb[0].mxu1 %vm4995_vm3, %v16690_v62 }
 0x570   :  { %12692 = vmatprep.mubr.msk.bf16.mxu1 %vm4995_vm3, %v16693_v39  ;;  %12753 = vmatpush3.bf16.msra.mxu1 %v6338_v30  ;;  %v5217_v30 = vld [vmem:[#allocation2 + $0x260] sm:$0xff] }
 0x571   :  { %v16776_v56 = vpack.c.bf16 %v5217_v30, %v5216_v51  ;;  %14322 = vmatprep.subr.msk.bf16.mxu1 %vm5462_vm5, %v6790_v58  ;;  %v6152_v30 = vld [vmem:[#allocation2 + $0x6a] sm:$0xff] }
 0x572   :  { %v16828_v51 = vpack.c.bf16 %v6152_v30, %v6151_v7  ;;  %v6157_v58 = vld [vmem:[#allocation2 + $0xaa] sm:$0xff]  ;;  %v6172_v7 = vld [vmem:[#allocation2 + $0x15a] sm:$0xff] }
 0x573   :  { %v16842_v54 = vpack.c.bf16 %v6158_v57, %v6157_v58  ;;  %v16868_v32 = vpack.c.bf16 %v6172_v7, %v6171_v31  ;;  %v6174_v58 = vld [vmem:[#allocation2 + $0x172] sm:$0xff]  ;;  %v6223_v57 = vpack.c.bf16 %v6176_v11, %v6175_v9  ;;  %v6185_v7 = vld [vmem:[#allocation2 + $0x22a] sm:$0xff]  ;;  %v6187_v11 = vld [vmem:[#allocation2 + $0x242] sm:$0xff] }
 0x574   :  { %v16874_v18 = vpack.c.bf16 %v6174_v58, %v6173_v35  ;;  %v6186_v9 = vld [vmem:[#allocation2 + $0x232] sm:$0xff]  ;;  %v6188_v35 = vld [vmem:[#allocation2 + $0x24a] sm:$0xff] }
 0x575   :  { %v16895_v58 = vpack.c.bf16 %v6186_v9, %v6185_v7  ;;  %v6195_v7 = vld [vmem:[#allocation2 + $0x2a2] sm:$0xff]  ;;  %v6196_v9 = vld [vmem:[#allocation2 + $0x2aa] sm:$0xff] }
 0x577   :  { %12693 = vmatmul.mubr.msk.bf16.gmra.mrb[4].mxu1 %vm4995_vm3, %v16699_v24 }
 0x578   :  { %12696 = vmatprep.mubr.msk.bf16.mxu1 %vm4995_vm3, %v16701_v46 }
 0x57f   :  { %12697 = vmatmul.mubr.msk.bf16.gmra.mrb[8].mxu1 %vm4995_vm3, %v16707_v33 }
 0x580   :  { %12700 = vmatprep.mubr.msk.bf16.mxu1 %vm4995_vm3, %v16709_v61 }
 0x587   :  { %12701 = vmatmul.mubr.msk.bf16.gmra.mrb[12].mxu1 %vm4995_vm3, %v16715_v8 }
 0x588   :  { %12704 = vmatprep.mubr.msk.bf16.mxu1 %vm4995_vm3, %v16717_v44 }
 0x58f   :  { %12705 = vmatmul.mubr.msk.bf16.gmra.mrb[16].mxu1 %vm4995_vm3, %v16723_v48 }
 0x590   :  { %12708 = vmatprep.mubr.msk.bf16.mxu1 %vm4995_vm3, %v16725_v45 }
 0x597   :  { %12709 = vmatmul.mubr.msk.bf16.gmra.mrb[20].mxu1 %vm4995_vm3, %v16731_v5 }
 0x598   :  { %12712 = vmatprep.mubr.msk.bf16.mxu1 %vm4995_vm3, %v16733_v6 }
 0x59f   :  { %12713 = vmatmul.mubr.msk.bf16.gmra.mrb[24].mxu1 %vm4995_vm3, %v16739_v38 }
 0x5a0   :  { %12716 = vmatprep.mubr.msk.bf16.mxu1 %vm4995_vm3, %v16741_v60 }
 0x5a7   :  { %12717 = vmatmul.mubr.msk.bf16.gmra.mrb[28].mxu1 %vm4995_vm3, %v16747_v0 }
 0x5a8   :  { %12720 = vmatprep.mubr.msk.bf16.mxu1 %vm4995_vm3, %v5250_v22  ;;  %v5232_v22 = vld [vmem:[#allocation2 + $0x318] sm:$0xff] }
 0x5a9   :  { %v16812_v20 = vpack.c.bf16 %v5233_v21, %v5232_v22  ;;  %v16852_v21 = vpack.c.bf16 %v6164_v28, %v6163_v43  ;;  %v6165_v22 = vld [vmem:[#allocation2 + $0x10a] sm:$0xff]  ;;  %v16879_v28 = vpack.c.bf16 %v6178_v16, %v6177_v42  ;;  %v6189_v42 = vld [vmem:[#allocation2 + $0x25a] sm:$0xff]  ;;  %v6190_v16 = vld [vmem:[#allocation2 + $0x262] sm:$0xff] }
 0x5aa   :  { %v6180_v43 = vld [vmem:[#allocation2 + $0x1ea] sm:$0xff] }
 0x5af   :  { %12721 = vmatmul.mubr.msk.bf16.gmra.mrb[32].mxu1 %vm4995_vm3, %v16752_v49 }
 0x5b0   :  { %12724 = vmatprep.mubr.msk.bf16.mxu1 %vm4995_vm3, %v16754_v27 }
 0x5b7   :  { %12725 = vmatmul.mubr.msk.bf16.gmra.mrb[36].mxu1 %vm4995_vm3, %v16760_v26 }
 0x5b8   :  { %12728 = vmatprep.mubr.msk.bf16.mxu1 %vm4995_vm3, %v16762_v17 }
 0x5bf   :  { %12729 = vmatmul.mubr.msk.bf16.gmra.mrb[40].mxu1 %vm4995_vm3, %v16768_v37 }
 0x5c0   :  { %12732 = vmatprep.mubr.msk.bf16.mxu1 %vm4995_vm3, %v16770_v63 }
 0x5c7   :  { %12733 = vmatmul.mubr.msk.bf16.gmra.mrb[44].mxu1 %vm4995_vm3, %v16776_v56 }
 0x5c8   :  { %12736 = vmatprep.mubr.msk.bf16.mxu1 %vm4995_vm3, %v16778_v47 }
 0x5cf   :  { %12737 = vmatmul.mubr.msk.bf16.gmra.mrb[48].mxu1 %vm4995_vm3, %v16784_v23 }
 0x5d0   :  { %12740 = vmatprep.mubr.msk.bf16.mxu1 %vm4995_vm3, %v16786_v59 }
 0x5d7   :  { %12741 = vmatmul.mubr.msk.bf16.gmra.mrb[52].mxu1 %vm4995_vm3, %v16796_v55 }
 0x5d8   :  { %12744 = vmatprep.mubr.msk.bf16.mxu1 %vm4995_vm3, %v16798_v2 }
 0x5df   :  { %12745 = vmatmul.mubr.msk.bf16.gmra.mrb[56].mxu1 %vm4995_vm3, %v16804_v19 }
 0x5e0   :  { %12748 = vmatprep.mubr.msk.bf16.mxu1 %vm4995_vm3, %v16806_v3 }
 0x5e7   :  { %12749 = vmatmul.mubr.msk.bf16.gmra.mrb[60].mxu1 %vm4995_vm3, %v16812_v20 }
 0x5e8   :  { %12754 = vmatprep.mubr.msk.bf16.mxu1 %vm4995_vm3, %v6207_v1  ;;  %v6166_v1 = vld [vmem:[#allocation2 + $0x112] sm:$0xff] }
 0x5e9   :  { %v16858_v52 = vpack.c.bf16 %v6166_v1, %v6165_v22  ;;  %v16881_v22 = vpack.c.bf16 %v6180_v43, %v6179_v29  ;;  %v6181_v1 = vld [vmem:[#allocation2 + $0x1fa] sm:$0xff]  ;;  %v6191_v29 = vld [vmem:[#allocation2 + $0x272] sm:$0xff] }
 0x5ea   :  { %v6192_v43 = vld [vmem:[#allocation2 + $0x27a] sm:$0xff] }
 0x5ef   :  { %12755 = vmatmul.mubr.msk.bf16.vlgmr.msra.gmra.mrb[0].mxu1 %vm4995_vm3, %v16817_v10 }
 0x5f0   :  { %12758 = vmatprep.mubr.msk.bf16.mxu1 %vm4995_vm3, %v16820_v12  ;;  %12819 = vmatpush3.bf16.msra.mxu1 %v6888_v4  ;;  %v6169_v4 = vld [vmem:[#allocation2 + $0x13a] sm:$0xff] }
 0x5f1   :  { %v16866_v30 = vpack.c.bf16 %v6170_v41, %v6169_v4  ;;  %v6184_v4 = vld [vmem:[#allocation2 + $0x21a] sm:$0xff]  ;;  %v16887_v41 = vpack.c.bf16 %v6182_v25, %v6181_v1  ;;  %v16903_v1 = vpack.c.bf16 %v6190_v16, %v6189_v42  ;;  %v16905_v25 = vpack.c.bf16 %v6192_v43, %v6191_v29  ;;  %v6198_v43 = vld [vmem:[#allocation2 + $0x2c2] sm:$0xff] }
 0x5f2   :  { %v16889_v31 = vpack.c.bf16 %v6184_v4, %v6183_v50  ;;  %v6193_v50 = vld [vmem:[#allocation2 + $0x28a] sm:$0xff]  ;;  %v6194_v4 = vld [vmem:[#allocation2 + $0x292] sm:$0xff]  ;;  %v7339_v42 = vld [vmem:[%s17513_s3 + $0x20] sm:$0xff] }
 0x5f3   :  { %17544 = vst [vmem:[#allocation6_spill] sm:$0xff] %v16903_v1  ;;  %17545 = vst [vmem:[#allocation7_spill] sm:$0xff] %v16905_v25  ;;  %v7340_v16 = vpack.c.bf16 %v7339_v42, %v7339_v42  ;;  %v6197_v29 = vld [vmem:[#allocation2 + $0x2ba] sm:$0xff]  ;;  %v6204_v42 = vld [vmem:[#allocation2 + $0x30a] sm:$0xff] }
 0x5f5   :  { %14323 = vmatprep.subr.msk.bf16.mxu1 %vm5462_vm5, %v7340_v16 }
 0x5f7   :  { %12759 = vmatmul.mubr.msk.bf16.gmra.mrb[4].mxu1 %vm4995_vm3, %v16826_v40 }
 0x5f8   :  { %12762 = vmatprep.mubr.msk.bf16.mxu1 %vm4995_vm3, %v16828_v51 }
 0x5ff   :  { %12763 = vmatmul.mubr.msk.bf16.gmra.mrb[8].mxu1 %vm4995_vm3, %v16834_v36 }
 0x600   :  { %12766 = vmatprep.mubr.msk.bf16.mxu1 %vm4995_vm3, %v16836_v13 }
 0x607   :  { %12767 = vmatmul.mubr.msk.bf16.gmra.mrb[12].mxu1 %vm4995_vm3, %v16842_v54 }
 0x608   :  { %12770 = vmatprep.mubr.msk.bf16.mxu1 %vm4995_vm3, %v16844_v15 }
 0x60f   :  { %12771 = vmatmul.mubr.msk.bf16.gmra.mrb[16].mxu1 %vm4995_vm3, %v16850_v34 }
 0x610   :  { %12774 = vmatprep.mubr.msk.bf16.mxu1 %vm4995_vm3, %v16852_v21 }
 0x617   :  { %12775 = vmatmul.mubr.msk.bf16.gmra.mrb[20].mxu1 %vm4995_vm3, %v16858_v52 }
 0x618   :  { %12778 = vmatprep.mubr.msk.bf16.mxu1 %vm4995_vm3, %v16860_v14 }
 0x61f   :  { %12779 = vmatmul.mubr.msk.bf16.gmra.mrb[24].mxu1 %vm4995_vm3, %v16866_v30 }
 0x620   :  { %12782 = vmatprep.mubr.msk.bf16.mxu1 %vm4995_vm3, %v16868_v32 }
 0x627   :  { %12783 = vmatmul.mubr.msk.bf16.gmra.mrb[28].mxu1 %vm4995_vm3, %v16874_v18 }
 0x628   :  { %12786 = vmatprep.mubr.msk.bf16.mxu1 %vm4995_vm3, %v6223_v57  ;;  %v16897_v57 = vpack.c.bf16 %v6188_v35, %v6187_v11  ;;  %v16911_v11 = vpack.c.bf16 %v6194_v4, %v6193_v50  ;;  %v16913_v35 = vpack.c.bf16 %v6196_v9, %v6195_v7  ;;  %v6200_v50 = vld [vmem:[#allocation2 + $0x2da] sm:$0xff]  ;;  %v16923_v4 = vpack.c.bf16 %v6198_v43, %v6197_v29  ;;  %v6201_v9 = vld [vmem:[#allocation2 + $0x2ea] sm:$0xff]  ;;  %v6206_v29 = vld [vmem:[#allocation2 + $0x322] sm:$0xff] }
 0x629   :  { %v16925_v7 = vpack.c.bf16 %v6200_v50, %v6199_v53  ;;  %v6205_v53 = vld [vmem:[#allocation2 + $0x31a] sm:$0xff] }
 0x62a   :  { %17546 = vst [vmem:[#allocation8_spill] sm:$0xff] %v16911_v11  ;;  %17547 = vst [vmem:[#allocation9_spill] sm:$0xff] %v16913_v35  ;;  %v16939_v43 = vpack.c.bf16 %v6206_v29, %v6205_v53  ;;  %v7257_v50 = vld [vmem:[#allocation2 + $0xc1] sm:$0xff]  ;;  %v7262_v29 = vld [vmem:[#allocation2 + $0xf9] sm:$0xff] }
 0x62f   :  { %12787 = vmatmul.mubr.msk.bf16.gmra.mrb[32].mxu1 %vm4995_vm3, %v16879_v28 }
 0x630   :  { %12790 = vmatprep.mubr.msk.bf16.mxu1 %vm4995_vm3, %v16881_v22 }
 0x637   :  { %12791 = vmatmul.mubr.msk.bf16.gmra.mrb[36].mxu1 %vm4995_vm3, %v16887_v41 }
 0x638   :  { %12794 = vmatprep.mubr.msk.bf16.mxu1 %vm4995_vm3, %v16889_v31 }
 0x63f   :  { %12795 = vmatmul.mubr.msk.bf16.gmra.mrb[40].mxu1 %vm4995_vm3, %v16895_v58 }
 0x640   :  { %12798 = vmatprep.mubr.msk.bf16.mxu1 %vm4995_vm3, %v16897_v57 }
 0x647   :  { %12799 = vmatmul.mubr.msk.bf16.gmra.mrb[44].mxu1 %vm4995_vm3, %v16903_v1 }
 0x648   :  { %12802 = vmatprep.mubr.msk.bf16.mxu1 %vm4995_vm3, %v16905_v25 }
 0x64f   :  { %12803 = vmatmul.mubr.msk.bf16.gmra.mrb[48].mxu1 %vm4995_vm3, %v16911_v11  ;;  %v6202_v11 = vld [vmem:[#allocation2 + $0x2f2] sm:$0xff] }
 0x650   :  { %12806 = vmatprep.mubr.msk.bf16.mxu1 %vm4995_vm3, %v16913_v35  ;;  %v6203_v35 = vld [vmem:[#allocation2 + $0x302] sm:$0xff]  ;;  %v16931_v25 = vpack.c.bf16 %v6202_v11, %v6201_v9  ;;  %v7438_v11 = vsel %vm5462_vm5, %v7340_v16, 0 }
 0x651   :  { %v16933_v1 = vpack.c.bf16 %v6204_v42, %v6203_v35  ;;  %v7258_v35 = vld [vmem:[#allocation2 + $0xc9] sm:$0xff]  ;;  %v7260_v16 = vld [vmem:[#allocation2 + $0xe1] sm:$0xff]  ;;  %v7259_v42 = vld [vmem:[#allocation2 + $0xd9] sm:$0xff] }
 0x652   :  { %v17042_v9 = vpack.c.bf16 %v7258_v35, %v7257_v50  ;;  %v17044_v53 = vpack.c.bf16 %v7260_v16, %v7259_v42  ;;  %v7278_v35 = vld [vmem:[#allocation2 + $0x1e9] sm:$0xff]  ;;  %v7280_v16 = vld [vmem:[#allocation2 + $0x201] sm:$0xff] }
 0x653   :  { %v7277_v50 = vld [vmem:[#allocation2 + $0x1e1] sm:$0xff] }
 0x654   :  { %v17079_v42 = vpack.c.bf16 %v7278_v35, %v7277_v50 }
 0x657   :  { %12807 = vmatmul.mubr.msk.bf16.gmra.mrb[52].mxu1 %vm4995_vm3, %v16923_v4 }
 0x658   :  { %12810 = vmatprep.mubr.msk.bf16.mxu1 %vm4995_vm3, %v16925_v7 }
 0x65f   :  { %12811 = vmatmul.mubr.msk.bf16.gmra.mrb[56].mxu1 %vm4995_vm3, %v16931_v25 }
 0x660   :  { %12814 = vmatprep.mubr.msk.bf16.mxu1 %vm4995_vm3, %v16933_v1 }
 0x667   :  { %12815 = vmatmul.mubr.msk.bf16.gmra.mrb[60].mxu1 %vm4995_vm3, %v16939_v43 }
 0x668   :  { %12820 = vmatprep.mubr.msk.bf16.mxu1 %vm4995_vm3, %v16690_v62  ;;  %v6724_v62 = vld [vmem:[#allocation2 + $0x188] sm:$0xff] }
 0x66f   :  { %12821 = vmatmul.mubr.msk.bf16.vlgmr.msra.gmra.mrb[0].mxu1 %vm4995_vm3, %v16693_v39  ;;  %v6723_v39 = vld [vmem:[#allocation2 + $0x180] sm:$0xff] }
 0x670   :  { %12824 = vmatprep.mubr.msk.bf16.mxu1 %vm4995_vm3, %v16699_v24  ;;  %12885 = vmatpush3.bf16.msra.mxu1 %v7438_v11  ;;  %v16974_v24 = vpack.c.bf16 %v6724_v62, %v6723_v39  ;;  %v7264_v11 = vld [vmem:[#allocation2 + $0x111] sm:$0xff] }
 0x671   :  { %v7261_v62 = vld [vmem:[#allocation2 + $0xf1] sm:$0xff] }
 0x672   :  { %v17050_v39 = vpack.c.bf16 %v7262_v29, %v7261_v62  ;;  %v7279_v29 = vld [vmem:[#allocation2 + $0x1f9] sm:$0xff] }
 0x673   :  { %v7282_v62 = vld [vmem:[#allocation2 + $0x219] sm:$0xff] }
 0x677   :  { %12825 = vmatmul.mubr.msk.bf16.gmra.mrb[4].mxu1 %vm4995_vm3, %v16701_v46  ;;  %v7889_v46 = vld [vmem:[%s17513_s3 + $0x28] sm:$0xff] }
 0x678   :  { %12828 = vmatprep.mubr.msk.bf16.mxu1 %vm4995_vm3, %v16707_v33  ;;  %v7890_v33 = vpack.c.bf16 %v7889_v46, %v7889_v46  ;;  %v7263_v46 = vld [vmem:[#allocation2 + $0x109] sm:$0xff] }
 0x67a   :  { %14324 = vmatprep.subr.msk.bf16.mxu1 %vm5462_vm5, %v7890_v33 }
 0x67f   :  { %12829 = vmatmul.mubr.msk.bf16.gmra.mrb[8].mxu1 %vm4995_vm3, %v16709_v61  ;;  %v6756_v61 = vld [vmem:[#allocation2 + $0x338] sm:$0xff] }
 0x680   :  { %12832 = vmatprep.mubr.msk.bf16.mxu1 %vm4995_vm3, %v16715_v8  ;;  %v7244_v8 = vld [vmem:[#allocation2 + $0x21] sm:$0xff] }
 0x687   :  { %12833 = vmatmul.mubr.msk.bf16.gmra.mrb[12].mxu1 %vm4995_vm3, %v16717_v44  ;;  %v6755_v44 = vld [vmem:[#allocation2 + $0x330] sm:$0xff] }
 0x688   :  { %12836 = vmatprep.mubr.msk.bf16.mxu1 %vm4995_vm3, %v16723_v48  ;;  %v17012_v48 = vpack.c.bf16 %v6756_v61, %v6755_v44  ;;  %v7266_v61 = vld [vmem:[#allocation2 + $0x129] sm:$0xff]  ;;  %v7265_v44 = vld [vmem:[#allocation2 + $0x121] sm:$0xff] }
 0x68f   :  { %12837 = vmatmul.mubr.msk.bf16.gmra.mrb[16].mxu1 %vm4995_vm3, %v16725_v45  ;;  %v7243_v45 = vld [vmem:[#allocation2 + $0x19] sm:$0xff] }
 0x690   :  { %12840 = vmatprep.mubr.msk.bf16.mxu1 %vm4995_vm3, %v16731_v5  ;;  %v7307_v5 = vpack.c.bf16 %v7244_v8, %v7243_v45  ;;  %v7268_v8 = vld [vmem:[#allocation2 + $0x141] sm:$0xff]  ;;  %v17058_v45 = vpack.c.bf16 %v7266_v61, %v7265_v44  ;;  %v7281_v61 = vld [vmem:[#allocation2 + $0x211] sm:$0xff]  ;;  %v7283_v44 = vld [vmem:[#allocation2 + $0x229] sm:$0xff] }
 0x697   :  { %12841 = vmatmul.mubr.msk.bf16.gmra.mrb[20].mxu1 %vm4995_vm3, %v16733_v6  ;;  %v7246_v6 = vld [vmem:[#allocation2 + $0x39] sm:$0xff] }
 0x698   :  { %12844 = vmatprep.mubr.msk.bf16.mxu1 %vm4995_vm3, %v16739_v38  ;;  %v7248_v38 = vld [vmem:[#allocation2 + $0x51] sm:$0xff] }
 0x69f   :  { %12845 = vmatmul.mubr.msk.bf16.gmra.mrb[24].mxu1 %vm4995_vm3, %v16741_v60  ;;  %v7245_v60 = vld [vmem:[#allocation2 + $0x31] sm:$0xff] }
 0x6a0   :  { %12848 = vmatprep.mubr.msk.bf16.mxu1 %vm4995_vm3, %v16747_v0  ;;  %v17017_v0 = vpack.c.bf16 %v7246_v6, %v7245_v60  ;;  %v7272_v60 = vld [vmem:[#allocation2 + $0x171] sm:$0xff] }
 0x6a7   :  { %12849 = vmatmul.mubr.msk.bf16.gmra.mrb[28].mxu1 %vm4995_vm3, %v16974_v24 }
 0x6a8   :  { %12852 = vmatprep.mubr.msk.bf16.mxu1 %vm4995_vm3, %v16752_v49  ;;  %v7247_v49 = vld [vmem:[#allocation2 + $0x49] sm:$0xff] }
 0x6af   :  { %12853 = vmatmul.mubr.msk.bf16.gmra.mrb[32].mxu1 %vm4995_vm3, %v16754_v27  ;;  %v7988_v27 = vsel %vm5462_vm5, %v7890_v33, 0  ;;  %v17052_v33 = vpack.c.bf16 %v7264_v11, %v7263_v46  ;;  %v17081_v11 = vpack.c.bf16 %v7280_v16, %v7279_v29  ;;  %v7284_v46 = vld [vmem:[#allocation2 + $0x231] sm:$0xff]  ;;  %v7291_v16 = vld [vmem:[#allocation2 + $0x289] sm:$0xff] }
 0x6b0   :  { %12856 = vmatprep.mubr.msk.bf16.mxu1 %vm4995_vm3, %v16760_v26  ;;  %v17020_v26 = vpack.c.bf16 %v7248_v38, %v7247_v49  ;;  %v7270_v38 = vld [vmem:[#allocation2 + $0x159] sm:$0xff]  ;;  %v7269_v49 = vld [vmem:[#allocation2 + $0x151] sm:$0xff]  ;;  %v7294_v29 = vld [vmem:[#allocation2 + $0x2a9] sm:$0xff] }
 0x6b7   :  { %12857 = vmatmul.mubr.msk.bf16.gmra.mrb[36].mxu1 %vm4995_vm3, %v16762_v17  ;;  %v7250_v17 = vld [vmem:[#allocation2 + $0x69] sm:$0xff] }
 0x6b8   :  { %12860 = vmatprep.mubr.msk.bf16.mxu1 %vm4995_vm3, %v16768_v37  ;;  %v7252_v37 = vld [vmem:[#allocation2 + $0x81] sm:$0xff] }
 0x6bf   :  { %12861 = vmatmul.mubr.msk.bf16.gmra.mrb[40].mxu1 %vm4995_vm3, %v16770_v63  ;;  %v7249_v63 = vld [vmem:[#allocation2 + $0x61] sm:$0xff] }
 0x6c0   :  { %12864 = vmatprep.mubr.msk.bf16.mxu1 %vm4995_vm3, %v16776_v56  ;;  %v17026_v56 = vpack.c.bf16 %v7250_v17, %v7249_v63  ;;  %v7271_v17 = vld [vmem:[#allocation2 + $0x169] sm:$0xff] }
 0x6c1   :  { %v7274_v63 = vld [vmem:[#allocation2 + $0x189] sm:$0xff] }
 0x6c7   :  { %12865 = vmatmul.mubr.msk.bf16.gmra.mrb[44].mxu1 %vm4995_vm3, %v16778_v47  ;;  %v7251_v47 = vld [vmem:[#allocation2 + $0x79] sm:$0xff] }
 0x6c8   :  { %12868 = vmatprep.mubr.msk.bf16.mxu1 %vm4995_vm3, %v16784_v23  ;;  %v17028_v23 = vpack.c.bf16 %v7252_v37, %v7251_v47  ;;  %v17068_v37 = vpack.c.bf16 %v7272_v60, %v7271_v17  ;;  %v7276_v47 = vld [vmem:[#allocation2 + $0x1d1] sm:$0xff]  ;;  %v7288_v60 = vld [vmem:[#allocation2 + $0x261] sm:$0xff] }
 0x6cf   :  { %12869 = vmatmul.mubr.msk.bf16.gmra.mrb[48].mxu1 %vm4995_vm3, %v16786_v59  ;;  %v7254_v59 = vld [vmem:[#allocation2 + $0x99] sm:$0xff] }
 0x6d0   :  { %12872 = vmatprep.mubr.msk.bf16.mxu1 %vm4995_vm3, %v16796_v55  ;;  %v7256_v55 = vld [vmem:[#allocation2 + $0xb1] sm:$0xff] }
 0x6d7   :  { %12873 = vmatmul.mubr.msk.bf16.gmra.mrb[52].mxu1 %vm4995_vm3, %v16798_v2  ;;  %v7253_v2 = vld [vmem:[#allocation2 + $0x91] sm:$0xff] }
 0x6d8   :  { %12876 = vmatprep.mubr.msk.bf16.mxu1 %vm4995_vm3, %v16804_v19  ;;  %v17034_v19 = vpack.c.bf16 %v7254_v59, %v7253_v2  ;;  %v7273_v59 = vld [vmem:[#allocation2 + $0x181] sm:$0xff]  ;;  %v7275_v2 = vld [vmem:[#allocation2 + $0x1c9] sm:$0xff] }
 0x6df   :  { %12877 = vmatmul.mubr.msk.bf16.gmra.mrb[56].mxu1 %vm4995_vm3, %v16806_v3  ;;  %v7255_v3 = vld [vmem:[#allocation2 + $0xa9] sm:$0xff] }
 0x6e0   :  { %12880 = vmatprep.mubr.msk.bf16.mxu1 %vm4995_vm3, %v16812_v20  ;;  %v17036_v20 = vpack.c.bf16 %v7256_v55, %v7255_v3  ;;  %v17074_v55 = vpack.c.bf16 %v7274_v63, %v7273_v59  ;;  %v7323_v3 = vpack.c.bf16 %v7276_v47, %v7275_v2  ;;  %v7287_v63 = vld [vmem:[#allocation2 + $0x259] sm:$0xff]  ;;  %v7292_v2 = vld [vmem:[#allocation2 + $0x291] sm:$0xff] }
 0x6e1   :  { %v17097_v47 = vpack.c.bf16 %v7288_v60, %v7287_v63  ;;  %v7290_v59 = vld [vmem:[#allocation2 + $0x279] sm:$0xff]  ;;  %v17105_v50 = vpack.c.bf16 %v7292_v2, %v7291_v16  ;;  %v8440_v60 = vld [vmem:[%s17513_s3 + $0x30] sm:$0xff] }
 0x6e2   :  { %v7298_v63 = vld [vmem:[#allocation2 + $0x2d9] sm:$0xff]  ;;  %v7297_v2 = vld [vmem:[#allocation2 + $0x2d1] sm:$0xff]  ;;  %v7299_v16 = vld [vmem:[#allocation2 + $0x2e9] sm:$0xff] }
 0x6e7   :  { %12881 = vmatmul.mubr.msk.bf16.gmra.mrb[60].mxu1 %vm4995_vm3, %v17012_v48 }
 0x6e8   :  { %12886 = vmatprep.mubr.msk.bf16.mxu1 %vm4995_vm3, %v7307_v5  ;;  %v7267_v5 = vld [vmem:[#allocation2 + $0x139] sm:$0xff] }
 0x6e9   :  { %v17060_v6 = vpack.c.bf16 %v7268_v8, %v7267_v5  ;;  %v17087_v8 = vpack.c.bf16 %v7282_v62, %v7281_v61  ;;  %v17089_v5 = vpack.c.bf16 %v7284_v46, %v7283_v44  ;;  %v7296_v62 = vld [vmem:[#allocation2 + $0x2c1] sm:$0xff]  ;;  %v7295_v44 = vld [vmem:[#allocation2 + $0x2b9] sm:$0xff] }
 0x6ea   :  { %v7293_v46 = vld [vmem:[#allocation2 + $0x2a1] sm:$0xff] }
 0x6eb   :  { %v17111_v61 = vpack.c.bf16 %v7294_v29, %v7293_v46  ;;  %v7304_v46 = vld [vmem:[#allocation2 + $0x321] sm:$0xff] }
 0x6ed   :  { %17548 = vst [vmem:[#allocation10_spill] sm:$0xff] %v17111_v61 }
 0x6ef   :  { %12887 = vmatmul.mubr.msk.bf16.vlgmr.msra.gmra.mrb[0].mxu1 %vm4995_vm3, %v17017_v0 }
 0x6f0   :  { %12890 = vmatprep.mubr.msk.bf16.mxu1 %vm4995_vm3, %v17020_v26  ;;  %12951 = vmatpush3.bf16.msra.mxu1 %v7988_v27  ;;  %v17066_v27 = vpack.c.bf16 %v7270_v38, %v7269_v49  ;;  %v7286_v38 = vld [vmem:[#allocation2 + $0x249] sm:$0xff]  ;;  %v7285_v49 = vld [vmem:[#allocation2 + $0x241] sm:$0xff] }
 0x6f1   :  { %v17095_v17 = vpack.c.bf16 %v7286_v38, %v7285_v49  ;;  %v17113_v38 = vpack.c.bf16 %v7296_v62, %v7295_v44  ;;  %v8441_v49 = vpack.c.bf16 %v8440_v60, %v8440_v60  ;;  %v7302_v62 = vld [vmem:[#allocation2 + $0x309] sm:$0xff]  ;;  %v7301_v44 = vld [vmem:[#allocation2 + $0x301] sm:$0xff] }
 0x6f2   :  { %v17131_v60 = vpack.c.bf16 %v7302_v62, %v7301_v44  ;;  %v8355_v62 = vld [vmem:[#allocation2 + $0xb0] sm:$0xff]  ;;  %v8354_v44 = vld [vmem:[#allocation2 + $0xa8] sm:$0xff] }
 0x6f3   :  { %17549 = vst [vmem:[#allocation11_spill] sm:$0xff] %v17113_v38  ;;  %14325 = vmatprep.subr.msk.bf16.mxu1 %vm5462_vm5, %v8441_v49 }
 0x6f7   :  { %12891 = vmatmul.mubr.msk.bf16.gmra.mrb[4].mxu1 %vm4995_vm3, %v17026_v56 }
 0x6f8   :  { %12894 = vmatprep.mubr.msk.bf16.mxu1 %vm4995_vm3, %v17028_v23 }
 0x6ff   :  { %12895 = vmatmul.mubr.msk.bf16.gmra.mrb[8].mxu1 %vm4995_vm3, %v17034_v19 }
 0x700   :  { %12898 = vmatprep.mubr.msk.bf16.mxu1 %vm4995_vm3, %v17036_v20 }
 0x707   :  { %12899 = vmatmul.mubr.msk.bf16.gmra.mrb[12].mxu1 %vm4995_vm3, %v17042_v9 }
 0x708   :  { %12902 = vmatprep.mubr.msk.bf16.mxu1 %vm4995_vm3, %v17044_v53 }
 0x70f   :  { %12903 = vmatmul.mubr.msk.bf16.gmra.mrb[16].mxu1 %vm4995_vm3, %v17050_v39 }
 0x710   :  { %12906 = vmatprep.mubr.msk.bf16.mxu1 %vm4995_vm3, %v17052_v33 }
 0x717   :  { %12907 = vmatmul.mubr.msk.bf16.gmra.mrb[20].mxu1 %vm4995_vm3, %v17058_v45 }
 0x718   :  { %12910 = vmatprep.mubr.msk.bf16.mxu1 %vm4995_vm3, %v17060_v6 }
 0x71f   :  { %12911 = vmatmul.mubr.msk.bf16.gmra.mrb[24].mxu1 %vm4995_vm3, %v17066_v27 }
 0x720   :  { %12914 = vmatprep.mubr.msk.bf16.mxu1 %vm4995_vm3, %v17068_v37 }
 0x727   :  { %12915 = vmatmul.mubr.msk.bf16.gmra.mrb[28].mxu1 %vm4995_vm3, %v17074_v55 }
 0x728   :  { %12918 = vmatprep.mubr.msk.bf16.mxu1 %vm4995_vm3, %v7323_v3  ;;  %v7289_v3 = vld [vmem:[#allocation2 + $0x271] sm:$0xff] }
 0x729   :  { %v17103_v35 = vpack.c.bf16 %v7290_v59, %v7289_v3  ;;  %v7300_v59 = vld [vmem:[#allocation2 + $0x2f1] sm:$0xff]  ;;  %v17123_v3 = vpack.c.bf16 %v7298_v63, %v7297_v2  ;;  %v7306_v63 = vld [vmem:[#allocation2 + $0x339] sm:$0xff] }
 0x72a   :  { %v17125_v29 = vpack.c.bf16 %v7300_v59, %v7299_v16  ;;  %v7305_v59 = vld [vmem:[#allocation2 + $0x331] sm:$0xff]  ;;  %v8539_v16 = vsel %vm5462_vm5, %v8441_v49, 0 }
 0x72b   :  { %v17139_v2 = vpack.c.bf16 %v7306_v63, %v7305_v59  ;;  %v8413_v63 = vpack.c.bf16 %v8355_v62, %v8354_v44  ;;  %v8356_v59 = vld [vmem:[#allocation2 + $0xc0] sm:$0xff]  ;;  %v8381_v44 = vld [vmem:[#allocation2 + $0x218] sm:$0xff] }
 0x72f   :  { %12919 = vmatmul.mubr.msk.bf16.gmra.mrb[32].mxu1 %vm4995_vm3, %v17079_v42 }
 0x730   :  { %12922 = vmatprep.mubr.msk.bf16.mxu1 %vm4995_vm3, %v17081_v11 }
 0x737   :  { %12923 = vmatmul.mubr.msk.bf16.gmra.mrb[36].mxu1 %vm4995_vm3, %v17087_v8 }
 0x738   :  { %12926 = vmatprep.mubr.msk.bf16.mxu1 %vm4995_vm3, %v17089_v5 }
 0x73f   :  { %12927 = vmatmul.mubr.msk.bf16.gmra.mrb[40].mxu1 %vm4995_vm3, %v17095_v17 }
 0x740   :  { %12930 = vmatprep.mubr.msk.bf16.mxu1 %vm4995_vm3, %v17097_v47 }
 0x747   :  { %12931 = vmatmul.mubr.msk.bf16.gmra.mrb[44].mxu1 %vm4995_vm3, %v17103_v35 }
 0x748   :  { %12934 = vmatprep.mubr.msk.bf16.mxu1 %vm4995_vm3, %v17105_v50 }
 0x74f   :  { %12935 = vmatmul.mubr.msk.bf16.gmra.mrb[48].mxu1 %vm4995_vm3, %v17111_v61 }
 0x750   :  { %12938 = vmatprep.mubr.msk.bf16.mxu1 %vm4995_vm3, %v17113_v38  ;;  %v7303_v38 = vld [vmem:[#allocation2 + $0x319] sm:$0xff] }
 0x751   :  { %v17133_v61 = vpack.c.bf16 %v7304_v46, %v7303_v38  ;;  %v8352_v38 = vld [vmem:[#allocation2 + $0x90] sm:$0xff]  ;;  %v8357_v46 = vld [vmem:[#allocation2 + $0xc8] sm:$0xff] }
 0x757   :  { %12939 = vmatmul.mubr.msk.bf16.gmra.mrb[52].mxu1 %vm4995_vm3, %v17123_v3 }
 0x758   :  { %12942 = vmatprep.mubr.msk.bf16.mxu1 %vm4995_vm3, %v17125_v29 }
 0x75f   :  { %12943 = vmatmul.mubr.msk.bf16.gmra.mrb[56].mxu1 %vm4995_vm3, %v17131_v60 }
 0x760   :  { %12946 = vmatprep.mubr.msk.bf16.mxu1 %vm4995_vm3, %v17133_v61 }
 0x767   :  { %12947 = vmatmul.mubr.msk.bf16.gmra.mrb[60].mxu1 %vm4995_vm3, %v17139_v2 }
 0x768   :  { %12952 = vmatprep.mubr.msk.bf16.mxu1 %vm4995_vm3, %v16817_v10  ;;  %v7823_v10 = vld [vmem:[#allocation2 + $0x182] sm:$0xff] }
 0x76f   :  { %12953 = vmatmul.mubr.msk.bf16.vlgmr.msra.gmra.mrb[0].mxu1 %vm4995_vm3, %v16820_v12  ;;  %v7824_v12 = vld [vmem:[#allocation2 + $0x18a] sm:$0xff] }
 0x770   :  { %12956 = vmatprep.mubr.msk.bf16.mxu1 %vm4995_vm3, %v16826_v40  ;;  %13017 = vmatpush3.bf16.msra.mxu1 %v8539_v16  ;;  %v17174_v40 = vpack.c.bf16 %v7824_v12, %v7823_v10  ;;  %v8414_v16 = vpack.c.bf16 %v8357_v46, %v8356_v59  ;;  %v8359_v10 = vld [vmem:[#allocation2 + $0xe0] sm:$0xff]  ;;  %v8361_v12 = vld [vmem:[#allocation2 + $0xf8] sm:$0xff] }
 0x771   :  { %v8379_v46 = vld [vmem:[#allocation2 + $0x200] sm:$0xff] }
 0x777   :  { %12957 = vmatmul.mubr.msk.bf16.gmra.mrb[4].mxu1 %vm4995_vm3, %v16828_v51  ;;  %v17550_v51 = vld [vmem:[#allocation6_spill] sm:$0xff] }
 0x778   :  { %12960 = vmatprep.mubr.msk.bf16.mxu1 %vm4995_vm3, %v16834_v36  ;;  %v17551_v36 = vld [vmem:[#allocation7_spill] sm:$0xff] }
 0x77f   :  { %12961 = vmatmul.mubr.msk.bf16.gmra.mrb[8].mxu1 %vm4995_vm3, %v16836_v13  ;;  %v17552_v13 = vld [vmem:[#allocation8_spill] sm:$0xff] }
 0x780   :  { %12964 = vmatprep.mubr.msk.bf16.mxu1 %vm4995_vm3, %v16842_v54  ;;  %v17553_v54 = vld [vmem:[#allocation9_spill] sm:$0xff] }
 0x787   :  { %12965 = vmatmul.mubr.msk.bf16.gmra.mrb[12].mxu1 %vm4995_vm3, %v16844_v15  ;;  %v8990_v15 = vld [vmem:[%s17513_s3 + $0x38] sm:$0xff] }
 0x788   :  { %12968 = vmatprep.mubr.msk.bf16.mxu1 %vm4995_vm3, %v16850_v34  ;;  %v8991_v34 = vpack.c.bf16 %v8990_v15, %v8990_v15  ;;  %v8363_v15 = vld [vmem:[#allocation2 + $0x110] sm:$0xff] }
 0x78a   :  { %14326 = vmatprep.subr.msk.bf16.mxu1 %vm5462_vm5, %v8991_v34 }
 0x78f   :  { %12969 = vmatmul.mubr.msk.bf16.gmra.mrb[16].mxu1 %vm4995_vm3, %v16852_v21  ;;  %v7855_v21 = vld [vmem:[#allocation2 + $0x332] sm:$0xff] }
 0x790   :  { %12972 = vmatprep.mubr.msk.bf16.mxu1 %vm4995_vm3, %v16858_v52  ;;  %v7856_v52 = vld [vmem:[#allocation2 + $0x33a] sm:$0xff] }
 0x797   :  { %12973 = vmatmul.mubr.msk.bf16.gmra.mrb[20].mxu1 %vm4995_vm3, %v16860_v14  ;;  %v8345_v14 = vld [vmem:[#allocation2 + $0x38] sm:$0xff] }
 0x798   :  { %12976 = vmatprep.mubr.msk.bf16.mxu1 %vm4995_vm3, %v16866_v30  ;;  %v17212_v30 = vpack.c.bf16 %v7856_v52, %v7855_v21  ;;  %v8362_v21 = vld [vmem:[#allocation2 + $0x108] sm:$0xff] }
 0x799   :  { %v8417_v52 = vpack.c.bf16 %v8363_v15, %v8362_v21  ;;  %v8387_v15 = vld [vmem:[#allocation2 + $0x260] sm:$0xff]  ;;  %v8386_v21 = vld [vmem:[#allocation2 + $0x258] sm:$0xff] }
 0x79f   :  { %12977 = vmatmul.mubr.msk.bf16.gmra.mrb[24].mxu1 %vm4995_vm3, %v16868_v32  ;;  %v8344_v32 = vld [vmem:[#allocation2 + $0x30] sm:$0xff] }
 0x7a0   :  { %12980 = vmatprep.mubr.msk.bf16.mxu1 %vm4995_vm3, %v16874_v18  ;;  %v8408_v18 = vpack.c.bf16 %v8345_v14, %v8344_v32  ;;  %v8364_v14 = vld [vmem:[#allocation2 + $0x120] sm:$0xff] }
 0x7a7   :  { %12981 = vmatmul.mubr.msk.bf16.gmra.mrb[28].mxu1 %vm4995_vm3, %v17174_v40 }
 0x7a8   :  { %12984 = vmatprep.mubr.msk.bf16.mxu1 %vm4995_vm3, %v16879_v28  ;;  %v8347_v28 = vld [vmem:[#allocation2 + $0x50] sm:$0xff] }
 0x7af   :  { %12985 = vmatmul.mubr.msk.bf16.gmra.mrb[32].mxu1 %vm4995_vm3, %v16881_v22  ;;  %v8349_v22 = vld [vmem:[#allocation2 + $0x68] sm:$0xff] }
 0x7b0   :  { %12988 = vmatprep.mubr.msk.bf16.mxu1 %vm4995_vm3, %v16887_v41  ;;  %v8346_v41 = vld [vmem:[#allocation2 + $0x48] sm:$0xff] }
 0x7b7   :  { %12989 = vmatmul.mubr.msk.bf16.gmra.mrb[36].mxu1 %vm4995_vm3, %v16889_v31  ;;  %v8409_v31 = vpack.c.bf16 %v8347_v28, %v8346_v41  ;;  %v8369_v28 = vld [vmem:[#allocation2 + $0x158] sm:$0xff] }
 0x7b8   :  { %12992 = vmatprep.mubr.msk.bf16.mxu1 %vm4995_vm3, %v16895_v58  ;;  %v8348_v58 = vld [vmem:[#allocation2 + $0x60] sm:$0xff] }
 0x7bf   :  { %12993 = vmatmul.mubr.msk.bf16.gmra.mrb[40].mxu1 %vm4995_vm3, %v16897_v57  ;;  %v9089_v57 = vsel %vm5462_vm5, %v8991_v34, 0  ;;  %v8365_v34 = vld [vmem:[#allocation2 + $0x128] sm:$0xff] }
 0x7c0   :  { %12996 = vmatprep.mubr.msk.bf16.mxu1 %vm4995_vm3, %v17550_v51  ;;  %v8358_v51 = vld [vmem:[#allocation2 + $0xd8] sm:$0xff]  ;;  %v8418_v32 = vpack.c.bf16 %v8365_v34, %v8364_v14  ;;  %v8388_v14 = vld [vmem:[#allocation2 + $0x270] sm:$0xff] }
 0x7c1   :  { %v8389_v34 = vld [vmem:[#allocation2 + $0x278] sm:$0xff] }
 0x7c7   :  { %12997 = vmatmul.mubr.msk.bf16.gmra.mrb[44].mxu1 %vm4995_vm3, %v17551_v36  ;;  %v8415_v36 = vpack.c.bf16 %v8359_v10, %v8358_v51  ;;  %v8382_v51 = vld [vmem:[#allocation2 + $0x228] sm:$0xff] }
 0x7c8   :  { %13000 = vmatprep.mubr.msk.bf16.mxu1 %vm4995_vm3, %v17552_v13  ;;  %v8360_v13 = vld [vmem:[#allocation2 + $0xf0] sm:$0xff] }
 0x7cf   :  { %13001 = vmatmul.mubr.msk.bf16.gmra.mrb[48].mxu1 %vm4995_vm3, %v17553_v54  ;;  %v8416_v54 = vpack.c.bf16 %v8361_v12, %v8360_v13  ;;  %v8385_v12 = vld [vmem:[#allocation2 + $0x248] sm:$0xff]  ;;  %v8384_v13 = vld [vmem:[#allocation2 + $0x240] sm:$0xff] }
 0x7d0   :  { %13004 = vmatprep.mubr.msk.bf16.mxu1 %vm4995_vm3, %v16923_v4  ;;  %v8353_v4 = vld [vmem:[#allocation2 + $0x98] sm:$0xff] }
 0x7d1   :  { %v8412_v49 = vpack.c.bf16 %v8353_v4, %v8352_v38  ;;  %v8374_v4 = vld [vmem:[#allocation2 + $0x198] sm:$0xff]  ;;  %v8377_v38 = vld [vmem:[#allocation2 + $0x1e8] sm:$0xff] }
 0x7d7   :  { %13005 = vmatmul.mubr.msk.bf16.gmra.mrb[52].mxu1 %vm4995_vm3, %v16925_v7  ;;  %v8350_v7 = vld [vmem:[#allocation2 + $0x78] sm:$0xff] }
 0x7d8   :  { %13008 = vmatprep.mubr.msk.bf16.mxu1 %vm4995_vm3, %v16931_v25  ;;  %v8351_v25 = vld [vmem:[#allocation2 + $0x80] sm:$0xff] }
 0x7df   :  { %13009 = vmatmul.mubr.msk.bf16.gmra.mrb[56].mxu1 %vm4995_vm3, %v16933_v1  ;;  %v8410_v1 = vpack.c.bf16 %v8349_v22, %v8348_v58  ;;  %v8366_v22 = vld [vmem:[#allocation2 + $0x138] sm:$0xff] }
 0x7e0   :  { %13012 = vmatprep.mubr.msk.bf16.mxu1 %vm4995_vm3, %v16939_v43  ;;  %v8411_v43 = vpack.c.bf16 %v8351_v25, %v8350_v7  ;;  %v8375_v7 = vld [vmem:[#allocation2 + $0x1a0] sm:$0xff] }
 0x7e7   :  { %13013 = vmatmul.mubr.msk.bf16.gmra.mrb[60].mxu1 %vm4995_vm3, %v17212_v30 }
 0x7e8   :  { %13018 = vmatprep.mubr.msk.bf16.mxu1 %vm4995_vm3, %v8408_v18  ;;  %v8367_v18 = vld [vmem:[#allocation2 + $0x140] sm:$0xff] }
 0x7e9   :  { %v8419_v41 = vpack.c.bf16 %v8367_v18, %v8366_v22  ;;  %v8391_v18 = vld [vmem:[#allocation2 + $0x290] sm:$0xff]  ;;  %v8390_v22 = vld [vmem:[#allocation2 + $0x288] sm:$0xff] }
 0x7ef   :  { %13019 = vmatmul.mubr.msk.bf16.vlgmr.msra.gmra.mrb[0].mxu1 %vm4995_vm3, %v8409_v31  ;;  %v8368_v31 = vld [vmem:[#allocation2 + $0x150] sm:$0xff] }
 0x7f0   :  { %13022 = vmatprep.mubr.msk.bf16.mxu1 %vm4995_vm3, %v8410_v1  ;;  %13083 = vmatpush3.bf16.msra.mxu1 %v9089_v57  ;;  %v8420_v58 = vpack.c.bf16 %v8369_v28, %v8368_v31  ;;  %v8371_v57 = vld [vmem:[#allocation2 + $0x170] sm:$0xff]  ;;  %v8370_v1 = vld [vmem:[#allocation2 + $0x168] sm:$0xff]  ;;  %v8392_v31 = vld [vmem:[#allocation2 + $0x2a0] sm:$0xff] }
 0x7f1   :  { %v8421_v25 = vpack.c.bf16 %v8371_v57, %v8370_v1  ;;  %v8393_v28 = vld [vmem:[#allocation2 + $0x2a8] sm:$0xff]  ;;  %v8395_v57 = vld [vmem:[#allocation2 + $0x2c0] sm:$0xff]  ;;  %v8397_v1 = vld [vmem:[#allocation2 + $0x2d8] sm:$0xff] }
 0x7f7   :  { %13023 = vmatmul.mubr.msk.bf16.gmra.mrb[4].mxu1 %vm4995_vm3, %v8411_v43  ;;  %v8423_v43 = vpack.c.bf16 %v8375_v7, %v8374_v4  ;;  %v8396_v7 = vld [vmem:[#allocation2 + $0x2d0] sm:$0xff] }
 0x7f8   :  { %13026 = vmatprep.mubr.msk.bf16.mxu1 %vm4995_vm3, %v8412_v49  ;;  %v8376_v49 = vld [vmem:[#allocation2 + $0x1e0] sm:$0xff] }
 0x7f9   :  { %v8424_v62 = vpack.c.bf16 %v8377_v38, %v8376_v49  ;;  %v9540_v38 = vld [vmem:[%s17513_s3 + $0x40] sm:$0xff] }
 0x7fa   :  { %v9541_v49 = vpack.c.bf16 %v9540_v38, %v9540_v38  ;;  %v9470_v38 = vld [vmem:[#allocation2 + $0x16a] sm:$0xff] }
 0x7fc   :  { %14327 = vmatprep.subr.msk.bf16.mxu1 %vm5462_vm5, %v9541_v49 }
 0x7ff   :  { %13027 = vmatmul.mubr.msk.bf16.gmra.mrb[8].mxu1 %vm4995_vm3, %v8413_v63  ;;  %v8378_v63 = vld [vmem:[#allocation2 + $0x1f8] sm:$0xff] }
 0x800   :  { %13030 = vmatprep.mubr.msk.bf16.mxu1 %vm4995_vm3, %v8414_v16  ;;  %v8425_v59 = vpack.c.bf16 %v8379_v46, %v8378_v63  ;;  %v8380_v16 = vld [vmem:[#allocation2 + $0x210] sm:$0xff]  ;;  %v8401_v46 = vld [vmem:[#allocation2 + $0x308] sm:$0xff] }
 0x801   :  { %v8426_v10 = vpack.c.bf16 %v8381_v44, %v8380_v16  ;;  %v8398_v44 = vld [vmem:[#allocation2 + $0x2e8] sm:$0xff] }
 0x807   :  { %13031 = vmatmul.mubr.msk.bf16.gmra.mrb[12].mxu1 %vm4995_vm3, %v8415_v36 }
 0x808   :  { %13034 = vmatprep.mubr.msk.bf16.mxu1 %vm4995_vm3, %v8416_v54  ;;  %v8428_v54 = vpack.c.bf16 %v8385_v12, %v8384_v13 }
 0x80f   :  { %13035 = vmatmul.mubr.msk.bf16.gmra.mrb[16].mxu1 %vm4995_vm3, %v8417_v52  ;;  %v8429_v52 = vpack.c.bf16 %v8387_v15, %v8386_v21  ;;  %v9458_v15 = vld [vmem:[#allocation2 + $0xda] sm:$0xff]  ;;  %v9460_v21 = vld [vmem:[#allocation2 + $0xf2] sm:$0xff] }
 0x810   :  { %13038 = vmatprep.mubr.msk.bf16.mxu1 %vm4995_vm3, %v8418_v32  ;;  %v8430_v32 = vpack.c.bf16 %v8389_v34, %v8388_v14  ;;  %v9459_v34 = vld [vmem:[#allocation2 + $0xe2] sm:$0xff] }
 0x811   :  { %v9515_v14 = vpack.c.bf16 %v9459_v34, %v9458_v15  ;;  %v9502_v15 = vld [vmem:[#allocation2 + $0x31a] sm:$0xff]  ;;  %v9503_v34 = vld [vmem:[#allocation2 + $0x322] sm:$0xff] }
 0x817   :  { %13039 = vmatmul.mubr.msk.bf16.gmra.mrb[20].mxu1 %vm4995_vm3, %v8419_v41  ;;  %v8431_v41 = vpack.c.bf16 %v8391_v18, %v8390_v22  ;;  %v9462_v18 = vld [vmem:[#allocation2 + $0x10a] sm:$0xff]  ;;  %v9464_v22 = vld [vmem:[#allocation2 + $0x122] sm:$0xff] }
 0x818   :  { %13042 = vmatprep.mubr.msk.bf16.mxu1 %vm4995_vm3, %v8420_v58  ;;  %v8432_v58 = vpack.c.bf16 %v8393_v28, %v8392_v31  ;;  %v9463_v28 = vld [vmem:[#allocation2 + $0x112] sm:$0xff] }
 0x819   :  { %v9517_v31 = vpack.c.bf16 %v9463_v28, %v9462_v18  ;;  %v17355_v18 = vld [vmem:[%s17514_s4] ss:$0 sm:$0xff] }
 0x81f   :  { %13043 = vmatmul.mubr.msk.bf16.gmra.mrb[24].mxu1 %vm4995_vm3, %v8421_v25  ;;  %v8394_v25 = vld [vmem:[#allocation2 + $0x2b8] sm:$0xff] }
 0x820   :  { %13046 = vmatprep.mubr.msk.bf16.mxu1 %vm4995_vm3, %v16974_v24  ;;  %v8383_v24 = vld [vmem:[#allocation2 + $0x230] sm:$0xff]  ;;  %v8433_v4 = vpack.c.bf16 %v8395_v57, %v8394_v25  ;;  %v9466_v57 = vld [vmem:[#allocation2 + $0x13a] sm:$0xff] }
 0x821   :  { %v8427_v36 = vpack.c.bf16 %v8383_v24, %v8382_v51  ;;  %v8402_v24 = vld [vmem:[#allocation2 + $0x318] sm:$0xff]  ;;  %v8406_v51 = vld [vmem:[#allocation2 + $0x348] sm:$0xff] }
 0x822   :  { %v9468_v25 = vld [vmem:[#allocation2 + $0x152] sm:$0xff] }
 0x827   :  { %13047 = vmatmul.mubr.msk.bf16.gmra.mrb[28].mxu1 %vm4995_vm3, %v8423_v43  ;;  %v8434_v43 = vpack.c.bf16 %v8397_v1, %v8396_v7  ;;  %v9467_v1 = vld [vmem:[#allocation2 + $0x142] sm:$0xff] }
 0x828   :  { %13050 = vmatprep.mubr.msk.bf16.mxu1 %vm4995_vm3, %v8424_v62  ;;  %v8399_v62 = vld [vmem:[#allocation2 + $0x2f0] sm:$0xff]  ;;  %v9519_v7 = vpack.c.bf16 %v9467_v1, %v9466_v57 }
 0x829   :  { %v8435_v63 = vpack.c.bf16 %v8399_v62, %v8398_v44  ;;  %v9475_v44 = vld [vmem:[#allocation2 + $0x1a2] sm:$0xff] }
 0x82f   :  { %13051 = vmatmul.mubr.msk.bf16.gmra.mrb[32].mxu1 %vm4995_vm3, %v8425_v59  ;;  %v8400_v59 = vld [vmem:[#allocation2 + $0x300] sm:$0xff] }
 0x830   :  { %13054 = vmatprep.mubr.msk.bf16.mxu1 %vm4995_vm3, %v8426_v10  ;;  %v8436_v16 = vpack.c.bf16 %v8401_v46, %v8400_v59  ;;  %v8403_v10 = vld [vmem:[#allocation2 + $0x320] sm:$0xff] }
 0x831   :  { %v8437_v12 = vpack.c.bf16 %v8403_v10, %v8402_v24  ;;  %v9474_v46 = vld [vmem:[#allocation2 + $0x19a] sm:$0xff]  ;;  %v9476_v59 = vld [vmem:[#allocation2 + $0x1e2] sm:$0xff] }
 0x832   :  { %v9478_v24 = vld [vmem:[#allocation2 + $0x1fa] sm:$0xff] }
 0x837   :  { %13055 = vmatmul.mubr.msk.bf16.gmra.mrb[36].mxu1 %vm4995_vm3, %v8427_v36  ;;  %v8407_v36 = vld [vmem:[#allocation2 + $0x350] sm:$0xff] }
 0x838   :  { %13058 = vmatprep.mubr.msk.bf16.mxu1 %vm4995_vm3, %v8428_v54  ;;  %v8439_v13 = vpack.c.bf16 %v8407_v36, %v8406_v51  ;;  %v9639_v54 = vsel %vm5462_vm5, %v9541_v49, 0  ;;  %v9471_v49 = vld [vmem:[#allocation2 + $0x172] sm:$0xff]  ;;  %v9481_v36 = vld [vmem:[#allocation2 + $0x21a] sm:$0xff] }
 0x839   :  { %v9521_v62 = vpack.c.bf16 %v9471_v49, %v9470_v38  ;;  %v9480_v51 = vld [vmem:[#allocation2 + $0x212] sm:$0xff]  ;;  %v10129_v49 = vld [vmem:[%s17515_s5] sm:$0xff] }
 0x83f   :  { %13059 = vmatmul.mubr.msk.bf16.gmra.mrb[40].mxu1 %vm4995_vm3, %v8429_v52  ;;  %v9461_v52 = vld [vmem:[#allocation2 + $0xfa] sm:$0xff] }
 0x840   :  { %13062 = vmatprep.mubr.msk.bf16.mxu1 %vm4995_vm3, %v8430_v32  ;;  %v9516_v32 = vpack.c.bf16 %v9461_v52, %v9460_v21  ;;  %v9537_v21 = vpack.c.bf16 %v9503_v34, %v9502_v15  ;;  %v9506_v52 = vld [vmem:[#allocation2 + $0x34a] sm:$0xff] }
 0x847   :  { %13063 = vmatmul.mubr.msk.bf16.gmra.mrb[44].mxu1 %vm4995_vm3, %v8431_v41  ;;  %v9465_v41 = vld [vmem:[#allocation2 + $0x12a] sm:$0xff] }
 0x848   :  { %13066 = vmatprep.mubr.msk.bf16.mxu1 %vm4995_vm3, %v8432_v58  ;;  %v9518_v58 = vpack.c.bf16 %v9465_v41, %v9464_v22 }
 0x84f   :  { %13067 = vmatmul.mubr.msk.bf16.gmra.mrb[48].mxu1 %vm4995_vm3, %v8433_v4  ;;  %v9469_v4 = vld [vmem:[#allocation2 + $0x15a] sm:$0xff] }
 0x850   :  { %13070 = vmatprep.mubr.msk.bf16.mxu1 %vm4995_vm3, %v8434_v43  ;;  %v9520_v43 = vpack.c.bf16 %v9469_v4, %v9468_v25 }
 0x857   :  { %13071 = vmatmul.mubr.msk.bf16.gmra.mrb[52].mxu1 %vm4995_vm3, %v8435_v63  ;;  %v9523_v63 = vpack.c.bf16 %v9475_v44, %v9474_v46 }
 0x858   :  { %13074 = vmatprep.mubr.msk.bf16.mxu1 %vm4995_vm3, %v8436_v16  ;;  %v9477_v16 = vld [vmem:[#allocation2 + $0x1ea] sm:$0xff] }
 0x859   :  { %v9524_v10 = vpack.c.bf16 %v9477_v16, %v9476_v59 }
 0x85f   :  { %13075 = vmatmul.mubr.msk.bf16.gmra.mrb[56].mxu1 %vm4995_vm3, %v8437_v12  ;;  %v9479_v12 = vld [vmem:[#allocation2 + $0x202] sm:$0xff] }
 0x860   :  { %13078 = vmatprep.mubr.msk.bf16.mxu1 %vm4995_vm3, %v17012_v48  ;;  %v8924_v48 = vld [vmem:[#allocation2 + $0x199] sm:$0xff] }
 0x867   :  { %13079 = vmatmul.mubr.msk.bf16.gmra.mrb[60].mxu1 %vm4995_vm3, %v8439_v13  ;;  %v9525_v13 = vpack.c.bf16 %v9479_v12, %v9478_v24 }
 0x868   :  { %13084 = vmatprep.mubr.msk.bf16.mxu1 %vm4995_vm3, %v17017_v0  ;;  %v8925_v0 = vld [vmem:[#allocation2 + $0x1a1] sm:$0xff] }
 0x86f   :  { %13085 = vmatmul.mubr.msk.bf16.vlgmr.msra.gmra.mrb[0].mxu1 %vm4995_vm3, %v17020_v26  ;;  %v8973_v26 = vpack.c.bf16 %v8925_v0, %v8924_v48  ;;  %v9483_v48 = vld [vmem:[#allocation2 + $0x232] sm:$0xff]  ;;  %v9484_v0 = vld [vmem:[#allocation2 + $0x242] sm:$0xff] }
 0x870   :  { %13088 = vmatprep.mubr.msk.bf16.mxu1 %vm4995_vm3, %v17026_v56  ;;  %13149 = vmatpush3.bf16.msra.mxu1 %v9639_v54  ;;  %v17554_v56 = vld [vmem:[#allocation10_spill] sm:$0xff]  ;;  %v9526_v54 = vpack.c.bf16 %v9481_v36, %v9480_v51 }
 0x877   :  { %13089 = vmatmul.mubr.msk.bf16.gmra.mrb[4].mxu1 %vm4995_vm3, %v17028_v23  ;;  %v17555_v23 = vld [vmem:[#allocation11_spill] sm:$0xff] }
 0x878   :  { %13092 = vmatprep.mubr.msk.bf16.mxu1 %vm4995_vm3, %v17034_v19  ;;  %v8956_v19 = vld [vmem:[#allocation2 + $0x349] sm:$0xff] }
 0x87f   :  { %13093 = vmatmul.mubr.msk.bf16.gmra.mrb[8].mxu1 %vm4995_vm3, %v17036_v20  ;;  %v8957_v20 = vld [vmem:[#allocation2 + $0x351] sm:$0xff] }
 0x880   :  { %13096 = vmatprep.mubr.msk.bf16.mxu1 %vm4995_vm3, %v17042_v9  ;;  %v8989_v9 = vpack.c.bf16 %v8957_v20, %v8956_v19  ;;  %v9486_v19 = vld [vmem:[#allocation2 + $0x25a] sm:$0xff]  ;;  %v9487_v20 = vld [vmem:[#allocation2 + $0x262] sm:$0xff] }
 0x887   :  { %13097 = vmatmul.mubr.msk.bf16.gmra.mrb[12].mxu1 %vm4995_vm3, %v17044_v53  ;;  %v9444_v53 = vld [vmem:[#allocation2 + $0x32] sm:$0xff] }
 0x888   :  { %13100 = vmatprep.mubr.msk.bf16.mxu1 %vm4995_vm3, %v17050_v39  ;;  %v9445_v39 = vld [vmem:[#allocation2 + $0x3a] sm:$0xff] }
 0x88f   :  { %13101 = vmatmul.mubr.msk.bf16.gmra.mrb[16].mxu1 %vm4995_vm3, %v17052_v33  ;;  %v9508_v33 = vpack.c.bf16 %v9445_v39, %v9444_v53  ;;  %v9489_v53 = vld [vmem:[#allocation2 + $0x27a] sm:$0xff]  ;;  %v9529_v39 = vpack.c.bf16 %v9487_v20, %v9486_v19 }
 0x890   :  { %13104 = vmatprep.mubr.msk.bf16.mxu1 %vm4995_vm3, %v17058_v45  ;;  %v9446_v45 = vld [vmem:[#allocation2 + $0x4a] sm:$0xff] }
 0x897   :  { %13105 = vmatmul.mubr.msk.bf16.gmra.mrb[20].mxu1 %vm4995_vm3, %v17060_v6  ;;  %v9447_v6 = vld [vmem:[#allocation2 + $0x52] sm:$0xff] }
 0x898   :  { %13108 = vmatprep.mubr.msk.bf16.mxu1 %vm4995_vm3, %v17066_v27  ;;  %v9448_v27 = vld [vmem:[#allocation2 + $0x62] sm:$0xff] }
 0x89f   :  { %13109 = vmatmul.mubr.msk.bf16.gmra.mrb[24].mxu1 %vm4995_vm3, %v17068_v37  ;;  %v9449_v37 = vld [vmem:[#allocation2 + $0x6a] sm:$0xff] }
 0x8a0   :  { %13112 = vmatprep.mubr.msk.bf16.mxu1 %vm4995_vm3, %v17074_v55  ;;  %v9509_v55 = vpack.c.bf16 %v9447_v6, %v9446_v45  ;;  %v9490_v45 = vld [vmem:[#allocation2 + $0x28a] sm:$0xff]  ;;  %v9491_v6 = vld [vmem:[#allocation2 + $0x292] sm:$0xff] }
 0x8a7   :  { %13113 = vmatmul.mubr.msk.bf16.gmra.mrb[28].mxu1 %vm4995_vm3, %v8973_v26  ;;  %v9485_v26 = vld [vmem:[#allocation2 + $0x24a] sm:$0xff] }
 0x8a8   :  { %13116 = vmatprep.mubr.msk.bf16.mxu1 %vm4995_vm3, %v17079_v42  ;;  %v9510_v42 = vpack.c.bf16 %v9449_v37, %v9448_v27  ;;  %v9492_v27 = vld [vmem:[#allocation2 + $0x2a2] sm:$0xff]  ;;  %v9493_v37 = vld [vmem:[#allocation2 + $0x2aa] sm:$0xff] }
 0x8af   :  { %13117 = vmatmul.mubr.msk.bf16.gmra.mrb[32].mxu1 %vm4995_vm3, %v17081_v11  ;;  %v9450_v11 = vld [vmem:[#allocation2 + $0x7a] sm:$0xff] }
 0x8b0   :  { %13120 = vmatprep.mubr.msk.bf16.mxu1 %vm4995_vm3, %v17087_v8  ;;  %v9451_v8 = vld [vmem:[#allocation2 + $0x82] sm:$0xff] }
 0x8b7   :  { %13121 = vmatmul.mubr.msk.bf16.gmra.mrb[36].mxu1 %vm4995_vm3, %v17089_v5  ;;  %v9452_v5 = vld [vmem:[#allocation2 + $0x92] sm:$0xff] }
 0x8b8   :  { %13124 = vmatprep.mubr.msk.bf16.mxu1 %vm4995_vm3, %v17095_v17  ;;  %v9453_v17 = vld [vmem:[#allocation2 + $0x9a] sm:$0xff] }
 0x8bf   :  { %13125 = vmatmul.mubr.msk.bf16.gmra.mrb[40].mxu1 %vm4995_vm3, %v17097_v47  ;;  %v9511_v47 = vpack.c.bf16 %v9451_v8, %v9450_v11  ;;  %v9494_v11 = vld [vmem:[#allocation2 + $0x2ba] sm:$0xff]  ;;  %v9495_v8 = vld [vmem:[#allocation2 + $0x2c2] sm:$0xff] }
 0x8c0   :  { %13128 = vmatprep.mubr.msk.bf16.mxu1 %vm4995_vm3, %v17103_v35  ;;  %v9512_v35 = vpack.c.bf16 %v9453_v17, %v9452_v5  ;;  %v9496_v5 = vld [vmem:[#allocation2 + $0x2d2] sm:$0xff]  ;;  %v9497_v17 = vld [vmem:[#allocation2 + $0x2da] sm:$0xff] }
 0x8c7   :  { %13129 = vmatmul.mubr.msk.bf16.gmra.mrb[44].mxu1 %vm4995_vm3, %v17105_v50  ;;  %v9454_v50 = vld [vmem:[#allocation2 + $0xaa] sm:$0xff] }
 0x8c8   :  { %13132 = vmatprep.mubr.msk.bf16.mxu1 %vm4995_vm3, %v17554_v56 }
 0x8cf   :  { %13133 = vmatmul.mubr.msk.bf16.gmra.mrb[48].mxu1 %vm4995_vm3, %v17555_v23  ;;  %v9528_v23 = vpack.c.bf16 %v9485_v26, %v9484_v0 }
 0x8d0   :  { %13136 = vmatprep.mubr.msk.bf16.mxu1 %vm4995_vm3, %v17123_v3  ;;  %v9456_v3 = vld [vmem:[#allocation2 + $0xc2] sm:$0xff] }
 0x8d7   :  { %13137 = vmatmul.mubr.msk.bf16.gmra.mrb[52].mxu1 %vm4995_vm3, %v17125_v29  ;;  %v9457_v29 = vld [vmem:[#allocation2 + $0xca] sm:$0xff] }
 0x8d8   :  { %13140 = vmatprep.mubr.msk.bf16.mxu1 %vm4995_vm3, %v17131_v60 }
 0x8df   :  { %13141 = vmatmul.mubr.msk.bf16.gmra.mrb[56].mxu1 %vm4995_vm3, %v17133_v61  ;;  %v9455_v61 = vld [vmem:[#allocation2 + $0xb2] sm:$0xff] }
 0x8e0   :  { %13144 = vmatprep.mubr.msk.bf16.mxu1 %vm4995_vm3, %v17139_v2  ;;  %v9513_v60 = vpack.c.bf16 %v9455_v61, %v9454_v50  ;;  %v9514_v2 = vpack.c.bf16 %v9457_v29, %v9456_v3  ;;  %v9498_v50 = vld [vmem:[#allocation2 + $0x2ea] sm:$0xff]  ;;  %v9499_v61 = vld [vmem:[#allocation2 + $0x2f2] sm:$0xff]  ;;  %v9500_v3 = vld [vmem:[#allocation2 + $0x302] sm:$0xff] }
 0x8e1   :  { %v9501_v29 = vld [vmem:[#allocation2 + $0x30a] sm:$0xff] }
 0x8e7   :  { %13145 = vmatmul.mubr.msk.bf16.gmra.mrb[60].mxu1 %vm4995_vm3, %v8989_v9  ;;  %v9488_v9 = vld [vmem:[#allocation2 + $0x272] sm:$0xff] }
 0x8e8   :  { %13150 = vmatprep.mubr.msk.bf16.mxu1 %vm4995_vm3, %v9508_v33  ;;  %v9530_v33 = vpack.c.bf16 %v9489_v53, %v9488_v9 }
 0x8ef   :  { %13151 = vmatmul.mubr.msk.bf16.vlgmr.msra.gmra.mrb[0].mxu1 %vm4995_vm3, %v9509_v55  ;;  %v9531_v55 = vpack.c.bf16 %v9491_v6, %v9490_v45 }
 0x8f0   :  { %13154 = vmatprep.mubr.msk.bf16.mxu1 %vm4995_vm3, %v9510_v42  ;;  %v9532_v42 = vpack.c.bf16 %v9493_v37, %v9492_v27 }
 0x8f7   :  { %13155 = vmatmul.mubr.msk.bf16.gmra.mrb[4].mxu1 %vm4995_vm3, %v9511_v47  ;;  %v9533_v47 = vpack.c.bf16 %v9495_v8, %v9494_v11 }
 0x8f8   :  { %13158 = vmatprep.mubr.msk.bf16.mxu1 %vm4995_vm3, %v9512_v35  ;;  %v9534_v35 = vpack.c.bf16 %v9497_v17, %v9496_v5 }
 0x8ff   :  { %13159 = vmatmul.mubr.msk.bf16.gmra.mrb[8].mxu1 %vm4995_vm3, %v9513_v60  ;;  %v9535_v60 = vpack.c.bf16 %v9499_v61, %v9498_v50 }
 0x900   :  { %13162 = vmatprep.mubr.msk.bf16.mxu1 %vm4995_vm3, %v9514_v2  ;;  %v9536_v2 = vpack.c.bf16 %v9501_v29, %v9500_v3 }
 0x907   :  { %13163 = vmatmul.mubr.msk.bf16.gmra.mrb[12].mxu1 %vm4995_vm3, %v9515_v14  ;;  %v9507_v14 = vld [vmem:[#allocation2 + $0x352] sm:$0xff] }
 0x908   :  { %13166 = vmatprep.mubr.msk.bf16.mxu1 %vm4995_vm3, %v9516_v32  ;;  %v9539_v32 = vpack.c.bf16 %v9507_v14, %v9506_v52 }
 0x90f   :  { %13167 = vmatmul.mubr.msk.bf16.gmra.mrb[16].mxu1 %vm4995_vm3, %v9517_v31 }
 0x910   :  { %13170 = vmatprep.mubr.msk.bf16.mxu1 %vm4995_vm3, %v9518_v58 }
 0x917   :  { %13171 = vmatmul.mubr.msk.bf16.gmra.mrb[20].mxu1 %vm4995_vm3, %v9519_v7 }
 0x918   :  { %13174 = vmatprep.mubr.msk.bf16.mxu1 %vm4995_vm3, %v9520_v43 }
 0x91f   :  { %13175 = vmatmul.mubr.msk.bf16.gmra.mrb[24].mxu1 %vm4995_vm3, %v9521_v62  ;;  %v10135_v62 = vlaneseq }
 0x920   :  { %13178 = vmatprep.mubr.msk.bf16.mxu1 %vm4995_vm3, %v17174_v40  ;;  %v9482_v40 = vld [vmem:[#allocation2 + $0x22a] sm:$0xff] }
 0x921   :  { %v9527_v56 = vpack.c.bf16 %v9483_v48, %v9482_v40  ;;  %v10136_v24 = vshrl.u32 %v10135_v62, 7 }
 0x927   :  { %13179 = vmatmul.mubr.msk.bf16.gmra.mrb[28].mxu1 %vm4995_vm3, %v9523_v63  ;;  %v14361_v63 = vmov 1983009808  }
 0x928   :  { %13182 = vmatprep.mubr.msk.bf16.mxu1 %vm4995_vm3, %v9524_v10  ;;  %v10133_v59 = vunpack.c.l.s4 %v14361_v63 }
 0x92a   :  { %v10134_v36 = vunpack.c.0.s8 %v10133_v59 }
 0x92c   :  { %v10137_v0 = vsub.s32 %v10134_v36, %v10136_v24 }
 0x92e   :  { %v17372_v20 = vrot.slane %v10129_v49, %v10137_v0 }
 0x92f   :  { %13183 = vmatmul.mubr.msk.bf16.gmra.mrb[32].mxu1 %vm4995_vm3, %v9525_v13  ;;  %v10131_v13 = vcombine.high %v10129_v49, %v10129_v49 }
 0x930   :  { %13186 = vmatprep.mubr.msk.bf16.mxu1 %vm4995_vm3, %v9526_v54  ;;  %v10146_v45 = vcombine.high %v17372_v20, %v17372_v20 }
 0x931   :  { %v17374_v9 = vrot.slane %v10131_v13, %v10137_v0 }
 0x932   :  { %10216 = vmatprep.mubr.f32.mxu0 %v10146_v45 }
 0x933   :  { %v10147_v6 = vcombine.high %v17374_v9, %v17374_v9 }
 0x937   :  { %13187 = vmatmul.mubr.msk.bf16.gmra.mrb[36].mxu1 %vm4995_vm3, %v9527_v56 }
 0x938   :  { %13190 = vmatprep.mubr.msk.bf16.mxu1 %vm4995_vm3, %v9528_v23 }
 0x93f   :  { %13191 = vmatmul.mubr.msk.bf16.gmra.mrb[40].mxu1 %vm4995_vm3, %v9529_v39 }
 0x940   :  { %13194 = vmatprep.mubr.msk.bf16.mxu1 %vm4995_vm3, %v9530_v33 }
 0x947   :  { %13195 = vmatmul.mubr.msk.bf16.gmra.mrb[44].mxu1 %vm4995_vm3, %v9531_v55 }
 0x948   :  { %13198 = vmatprep.mubr.msk.bf16.mxu1 %vm4995_vm3, %v9532_v42 }
 0x94f   :  { %13199 = vmatmul.mubr.msk.bf16.gmra.mrb[48].mxu1 %vm4995_vm3, %v9533_v47 }
 0x950   :  { %13202 = vmatprep.mubr.msk.bf16.mxu1 %vm4995_vm3, %v9534_v35 }
 0x957   :  { %13203 = vmatmul.mubr.msk.bf16.gmra.mrb[52].mxu1 %vm4995_vm3, %v9535_v60 }
 0x958   :  { %13206 = vmatprep.mubr.msk.bf16.mxu1 %vm4995_vm3, %v9536_v2 }
 0x95f   :  { %13207 = vmatmul.mubr.msk.bf16.gmra.mrb[56].mxu1 %vm4995_vm3, %v9537_v21 }
 0x960   :  { %13210 = vmatprep.mubr.msk.bf16.mxu1 %vm4995_vm3, %v17212_v30 }
 0x967   :  { %13211 = vmatmul.mubr.msk.bf16.gmra.mrb[60].mxu1 %vm4995_vm3, %v9539_v32 }
 0x968   :  { %10286 = vmatprep.mubr.f32.mxu1 %v10147_v6 }
 0x9c2   :  { %v13152_v28 = vpop.f32.mrb[0].mxu1 }
 0x9c3   :  { %v10003_v22 = vadd.f32 %v13152_v28, %v17355_v18  ;;  %v9675_v41 = vpop.f32.mrb[1].mxu1 }
 0x9c4   :  { %v10001_v31 = vadd.f32 %v17355_v18, %v9675_v41  ;;  %v13153_v58 = vpop.f32.mrb[2].mxu1 }
 0x9c5   :  { %v10004_v57 = vadd.f32 %v13153_v58, %v17355_v18  ;;  %v9678_v30 = vpop.f32.mrb[3].mxu1  ;;  %v10067_v25 = vmax.f32 %v10003_v22, 0.0 }
 0x9c6   :  { %v10002_v1 = vadd.f32 %v17355_v18, %v9678_v30  ;;  %v10065_v7 = vmax.f32 %v10001_v31, 0.0 }
 0x9c7   :  { %v10068_v4 = vmax.f32 %v10004_v57, 0.0 }
 0x9c8   :  { %v10066_v43 = vmax.f32 %v10002_v1, 0.0 }
 0x9c9   :  { %v17361_v38 = vpack.c.bf16 %v10068_v4, %v10067_v25 }
 0x9ca   :  { %v17366_v46 = vpack.c.bf16 %v10066_v43, %v10065_v7  ;;  %v13156_v44 = vpop.f32.mrb[4].mxu1 }
 0x9cb   :  { %v10007_v16 = vadd.f32 %v13156_v44, %v17355_v18  ;;  %v9691_v10 = vpop.f32.mrb[5].mxu1 }
 0x9cc   :  { %v10005_v12 = vadd.f32 %v17355_v18, %v9691_v10  ;;  %v13157_v51 = vpop.f32.mrb[6].mxu1 }
 0x9cd   :  { %v10008_v54 = vadd.f32 %v13157_v51, %v17355_v18  ;;  %v9694_v40 = vpop.f32.mrb[7].mxu1  ;;  %v10071_v26 = vmax.f32 %v10007_v16, 0.0 }
 0x9ce   :  { %v10006_v48 = vadd.f32 %v17355_v18, %v9694_v40  ;;  %v10069_v23 = vmax.f32 %v10005_v12, 0.0 }
 0x9cf   :  { %v10072_v56 = vmax.f32 %v10008_v54, 0.0 }
 0x9d0   :  { %v10070_v19 = vmax.f32 %v10006_v48, 0.0 }
 0x9d1   :  { %v17376_v53 = vpack.c.bf16 %v10072_v56, %v10071_v26 }
 0x9d2   :  { %v17378_v39 = vpack.c.bf16 %v10070_v19, %v10069_v23  ;;  %v13160_v33 = vpop.f32.mrb[8].mxu1 }
 0x9d3   :  { %v10011_v27 = vadd.f32 %v13160_v33, %v17355_v18  ;;  %v9707_v37 = vpop.f32.mrb[9].mxu1 }
 0x9d4   :  { %v10009_v55 = vadd.f32 %v17355_v18, %v9707_v37  ;;  %v13161_v42 = vpop.f32.mrb[10].mxu1 }
 0x9d5   :  { %v10012_v11 = vadd.f32 %v13161_v42, %v17355_v18  ;;  %v9710_v8 = vpop.f32.mrb[11].mxu1  ;;  %v10075_v17 = vmax.f32 %v10011_v27, 0.0 }
 0x9d6   :  { %v10010_v5 = vadd.f32 %v17355_v18, %v9710_v8  ;;  %v10073_v35 = vmax.f32 %v10009_v55, 0.0 }
 0x9d7   :  { %v10076_v47 = vmax.f32 %v10012_v11, 0.0 }
 0x9d8   :  { %v10074_v50 = vmax.f32 %v10010_v5, 0.0 }
 0x9d9   :  { %v17388_v61 = vpack.c.bf16 %v10076_v47, %v10075_v17 }
 0x9da   :  { %v17390_v3 = vpack.c.bf16 %v10074_v50, %v10073_v35  ;;  %v13164_v29 = vpop.f32.mrb[12].mxu1 }
 0x9db   :  { %v10015_v60 = vadd.f32 %v13164_v29, %v17355_v18  ;;  %v9723_v2 = vpop.f32.mrb[13].mxu1 }
 0x9dc   :  { %v10013_v15 = vadd.f32 %v17355_v18, %v9723_v2  ;;  %v13165_v34 = vpop.f32.mrb[14].mxu1 }
 0x9dd   :  { %v10016_v21 = vadd.f32 %v13165_v34, %v17355_v18  ;;  %v9726_v52 = vpop.f32.mrb[15].mxu1  ;;  %v10079_v32 = vmax.f32 %v10015_v60, 0.0 }
 0x9de   :  { %v10014_v14 = vadd.f32 %v17355_v18, %v9726_v52  ;;  %v10077_v22 = vmax.f32 %v10013_v15, 0.0 }
 0x9df   :  { %v10080_v28 = vmax.f32 %v10016_v21, 0.0 }
 0x9e0   :  { %v10078_v41 = vmax.f32 %v10014_v14, 0.0 }
 0x9e1   :  { %v17396_v31 = vpack.c.bf16 %v10080_v28, %v10079_v32 }
 0x9e2   :  { %v17398_v58 = vpack.c.bf16 %v10078_v41, %v10077_v22  ;;  %v13168_v57 = vpop.f32.mrb[16].mxu1 }
 0x9e3   :  { %v10019_v30 = vadd.f32 %v13168_v57, %v17355_v18  ;;  %v9739_v1 = vpop.f32.mrb[17].mxu1 }
 0x9e4   :  { %v10017_v25 = vadd.f32 %v17355_v18, %v9739_v1  ;;  %v13169_v4 = vpop.f32.mrb[18].mxu1 }
 0x9e5   :  { %v10020_v7 = vadd.f32 %v13169_v4, %v17355_v18  ;;  %v9742_v43 = vpop.f32.mrb[19].mxu1  ;;  %v10083_v62 = vmax.f32 %v10019_v30, 0.0 }
 0x9e6   :  { %v10018_v49 = vadd.f32 %v17355_v18, %v9742_v43  ;;  %v10081_v63 = vmax.f32 %v10017_v25, 0.0  ;;  %v10293_v43 = vld [vmem:[%s17516_s6 + $0x8] sm:$0xff] }
 0x9e7   :  { %v10084_v44 = vmax.f32 %v10020_v7, 0.0 }
 0x9e8   :  { %v10082_v59 = vmax.f32 %v10018_v49, 0.0 }
 0x9e9   :  { %v13229_v16 = vpack.c.bf16 %v10084_v44, %v10083_v62 }
 0x9ea   :  { %v13225_v10 = vpack.c.bf16 %v10082_v59, %v10081_v63  ;;  %v13172_v24 = vpop.f32.mrb[20].mxu1 }
 0x9eb   :  { %v10023_v12 = vadd.f32 %v13172_v24, %v17355_v18  ;;  %v9755_v51 = vpop.f32.mrb[21].mxu1  ;;  %v14362_v24 = vmov 0.0|0.0  }
 0x9ec   :  { %v10021_v36 = vadd.f32 %v17355_v18, %v9755_v51  ;;  %v13173_v13 = vpop.f32.mrb[22].mxu1  ;;  %13226 = vmatprep.subr.bf16.mxu0 %v13225_v10 }
 0x9ed   :  { %v10024_v54 = vadd.f32 %v13173_v13, %v17355_v18  ;;  %v9758_v40 = vpop.f32.mrb[23].mxu1  ;;  %13228 = vmatpush3.bf16.msra.mxu0 %v17366_v46  ;;  %v10087_v0 = vmax.f32 %v10023_v12, 0.0 }
 0x9ee   :  { %v10022_v48 = vadd.f32 %v17355_v18, %v9758_v40  ;;  %13230 = vmatprep.subr.bf16.mxu0 %v13229_v16  ;;  %v10085_v56 = vmax.f32 %v10021_v36, 0.0 }
 0x9ef   :  { %v10088_v26 = vmax.f32 %v10024_v54, 0.0 }
 0x9f0   :  { %v10086_v23 = vmax.f32 %v10022_v48, 0.0 }
 0x9f1   :  { %v13237_v19 = vpack.c.bf16 %v10088_v26, %v10087_v0  ;;  %13232 = vmatpush3.bf16.msra.mxu0 %v17361_v38 }
 0x9f2   :  { %v13233_v33 = vpack.c.bf16 %v10086_v23, %v10085_v56  ;;  %v13176_v45 = vpop.f32.mrb[24].mxu1 }
 0x9f3   :  { %v10027_v6 = vadd.f32 %v13176_v45, %v17355_v18  ;;  %v9771_v27 = vpop.f32.mrb[25].mxu1 }
 0x9f4   :  { %v10025_v37 = vadd.f32 %v17355_v18, %v9771_v27  ;;  %v13177_v55 = vpop.f32.mrb[26].mxu1  ;;  %13234 = vmatprep.subr.bf16.mxu0 %v13233_v33 }
 0x9f5   :  { %v10028_v46 = vadd.f32 %v13177_v55, %v17355_v18  ;;  %v9774_v42 = vpop.f32.mrb[27].mxu1  ;;  %13236 = vmatpush3.bf16.msra.mxu0 %v17378_v39  ;;  %v10091_v8 = vmax.f32 %v10027_v6, 0.0 }
 0x9f6   :  { %v10026_v11 = vadd.f32 %v17355_v18, %v9774_v42  ;;  %13238 = vmatprep.subr.bf16.mxu0 %v13237_v19  ;;  %v10089_v38 = vmax.f32 %v10025_v37, 0.0 }
 0x9f7   :  { %v10092_v5 = vmax.f32 %v10028_v46, 0.0 }
 0x9f8   :  { %v10090_v17 = vmax.f32 %v10026_v11, 0.0 }
 0x9f9   :  { %v13245_v47 = vpack.c.bf16 %v10092_v5, %v10091_v8  ;;  %13240 = vmatpush3.bf16.msra.mxu0 %v17376_v53 }
 0x9fa   :  { %v13241_v35 = vpack.c.bf16 %v10090_v17, %v10089_v38  ;;  %v13180_v50 = vpop.f32.mrb[28].mxu1 }
 0x9fb   :  { %v10031_v29 = vadd.f32 %v13180_v50, %v17355_v18  ;;  %v9787_v60 = vpop.f32.mrb[29].mxu1 }
 0x9fc   :  { %v10029_v2 = vadd.f32 %v17355_v18, %v9787_v60  ;;  %v13181_v15 = vpop.f32.mrb[30].mxu1  ;;  %13242 = vmatprep.subr.bf16.mxu0 %v13241_v35 }
 0x9fd   :  { %v10032_v39 = vadd.f32 %v13181_v15, %v17355_v18  ;;  %v9790_v34 = vpop.f32.mrb[31].mxu1  ;;  %13244 = vmatpush3.bf16.msra.mxu0 %v17390_v3  ;;  %v10095_v52 = vmax.f32 %v10031_v29, 0.0 }
 0x9fe   :  { %v10030_v21 = vadd.f32 %v17355_v18, %v9790_v34  ;;  %13246 = vmatprep.subr.bf16.mxu0 %v13245_v47  ;;  %v10093_v53 = vmax.f32 %v10029_v2, 0.0 }
 0x9ff   :  { %v10096_v14 = vmax.f32 %v10032_v39, 0.0 }
 0xa00   :  { %v10094_v32 = vmax.f32 %v10030_v21, 0.0 }
 0xa01   :  { %v13253_v28 = vpack.c.bf16 %v10096_v14, %v10095_v52  ;;  %13248 = vmatpush3.bf16.msra.mxu0 %v17388_v61  ;;  %v10292_v61 = vld [vmem:[%s17516_s6] sm:$0xff] }
 0xa02   :  { %v13249_v22 = vpack.c.bf16 %v10094_v32, %v10093_v53  ;;  %v13184_v41 = vpop.f32.mrb[32].mxu1 }
 0xa03   :  { %v10035_v57 = vadd.f32 %v13184_v41, %v17355_v18  ;;  %v9803_v30 = vpop.f32.mrb[33].mxu1 }
 0xa04   :  { %v10033_v1 = vadd.f32 %v17355_v18, %v9803_v30  ;;  %v13185_v25 = vpop.f32.mrb[34].mxu1  ;;  %13250 = vmatprep.subr.bf16.mxu0 %v13249_v22 }
 0xa05   :  { %v10036_v3 = vadd.f32 %v13185_v25, %v17355_v18  ;;  %v9806_v4 = vpop.f32.mrb[35].mxu1  ;;  %13252 = vmatpush3.bf16.msra.mxu0 %v17398_v58  ;;  %v10099_v49 = vmax.f32 %v10035_v57, 0.0  ;;  %v13290_v58 = vpack.c.bf16 %v10293_v43, %v10292_v61 }
 0xa06   :  { %v10034_v7 = vadd.f32 %v17355_v18, %v9806_v4  ;;  %13254 = vmatprep.subr.bf16.mxu0 %v13253_v28  ;;  %v10097_v44 = vmax.f32 %v10033_v1, 0.0 }
 0xa07   :  { %v10100_v62 = vmax.f32 %v10036_v3, 0.0 }
 0xa08   :  { %v10098_v63 = vmax.f32 %v10034_v7, 0.0 }
 0xa09   :  { %v17433_v59 = vpack.c.bf16 %v10100_v62, %v10099_v49  ;;  %13256 = vmatpush3.bf16.msra.mxu0 %v17396_v31 }
 0xa0a   :  { %v17436_v16 = vpack.c.bf16 %v10098_v63, %v10097_v44  ;;  %v13188_v10 = vpop.f32.mrb[36].mxu1  ;;  %13289 = vmatprep.subr.bf16.mxu0 %v14362_v24 }
 0xa0b   :  { %v10039_v12 = vadd.f32 %v13188_v10, %v17355_v18  ;;  %v9819_v51 = vpop.f32.mrb[37].mxu1 }
 0xa0c   :  { %v10037_v36 = vadd.f32 %v17355_v18, %v9819_v51  ;;  %v13189_v13 = vpop.f32.mrb[38].mxu1  ;;  %10217 = vmatmul.mubr.f32.vlgmr.msra.gmra.mrb[64].mxu0 %v17372_v20 }
 0xa0d   :  { %v10040_v54 = vadd.f32 %v13189_v13, %v17355_v18  ;;  %v9822_v40 = vpop.f32.mrb[39].mxu1  ;;  %13291 = vmatpush3.bf16.msra.mxu0 %v13290_v58  ;;  %v10103_v48 = vmax.f32 %v10039_v12, 0.0 }
 0xa0e   :  { %v10038_v31 = vadd.f32 %v17355_v18, %v9822_v40  ;;  %13292 = vmatprep.subr.bf16.mxu0 %v14362_v24  ;;  %v10101_v26 = vmax.f32 %v10037_v36, 0.0 }
 0xa0f   :  { %v10104_v0 = vmax.f32 %v10040_v54, 0.0 }
 0xa10   :  { %v10102_v56 = vmax.f32 %v10038_v31, 0.0 }
 0xa11   :  { %v17443_v23 = vpack.c.bf16 %v10104_v0, %v10103_v48 }
 0xa12   :  { %v17445_v19 = vpack.c.bf16 %v10102_v56, %v10101_v26  ;;  %v13192_v33 = vpop.f32.mrb[40].mxu1 }
 0xa13   :  { %v10043_v45 = vadd.f32 %v13192_v33, %v17355_v18  ;;  %v9835_v6 = vpop.f32.mrb[41].mxu1 }
 0xa14   :  { %v10041_v20 = vadd.f32 %v17355_v18, %v9835_v6  ;;  %v13193_v27 = vpop.f32.mrb[42].mxu1 }
 0xa15   :  { %v10044_v37 = vadd.f32 %v13193_v27, %v17355_v18  ;;  %v9838_v55 = vpop.f32.mrb[43].mxu1  ;;  %v10107_v42 = vmax.f32 %v10043_v45, 0.0 }
 0xa16   :  { %v10042_v46 = vadd.f32 %v17355_v18, %v9838_v55  ;;  %v10105_v8 = vmax.f32 %v10041_v20, 0.0 }
 0xa17   :  { %v10108_v11 = vmax.f32 %v10044_v37, 0.0 }
 0xa18   :  { %v10106_v5 = vmax.f32 %v10042_v46, 0.0 }
 0xa19   :  { %v17451_v38 = vpack.c.bf16 %v10108_v11, %v10107_v42 }
 0xa1a   :  { %v17453_v17 = vpack.c.bf16 %v10106_v5, %v10105_v8  ;;  %v13196_v47 = vpop.f32.mrb[44].mxu1 }
 0xa1b   :  { %v10047_v35 = vadd.f32 %v13196_v47, %v17355_v18  ;;  %v9851_v50 = vpop.f32.mrb[45].mxu1 }
 0xa1c   :  { %v10045_v29 = vadd.f32 %v17355_v18, %v9851_v50  ;;  %v13197_v60 = vpop.f32.mrb[46].mxu1 }
 0xa1d   :  { %v10048_v2 = vadd.f32 %v13197_v60, %v17355_v18  ;;  %v9854_v15 = vpop.f32.mrb[47].mxu1  ;;  %v10111_v34 = vmax.f32 %v10047_v35, 0.0 }
 0xa1e   :  { %v10046_v39 = vadd.f32 %v17355_v18, %v9854_v15  ;;  %v10109_v52 = vmax.f32 %v10045_v29, 0.0 }
 0xa1f   :  { %v10112_v21 = vmax.f32 %v10048_v2, 0.0 }
 0xa20   :  { %v10110_v14 = vmax.f32 %v10046_v39, 0.0 }
 0xa21   :  { %v17459_v53 = vpack.c.bf16 %v10112_v21, %v10111_v34 }
 0xa22   :  { %v17461_v32 = vpack.c.bf16 %v10110_v14, %v10109_v52  ;;  %v13200_v28 = vpop.f32.mrb[48].mxu1 }
 0xa23   :  { %v10051_v22 = vadd.f32 %v13200_v28, %v17355_v18  ;;  %v9867_v41 = vpop.f32.mrb[49].mxu1 }
 0xa24   :  { %v10049_v57 = vadd.f32 %v17355_v18, %v9867_v41  ;;  %v13201_v30 = vpop.f32.mrb[50].mxu1 }
 0xa25   :  { %v10052_v1 = vadd.f32 %v13201_v30, %v17355_v18  ;;  %v9870_v25 = vpop.f32.mrb[51].mxu1  ;;  %v10115_v4 = vmax.f32 %v10051_v22, 0.0 }
 0xa26   :  { %v10050_v3 = vadd.f32 %v17355_v18, %v9870_v25  ;;  %v10113_v61 = vmax.f32 %v10049_v57, 0.0  ;;  %v11355_v57 = vld [vmem:[%s17517_s7] ss:$0 sm:$0xff] }
 0xa27   :  { %v10116_v7 = vmax.f32 %v10052_v1, 0.0 }
 0xa28   :  { %v10114_v43 = vmax.f32 %v10050_v3, 0.0 }
 0xa29   :  { %v13261_v49 = vpack.c.bf16 %v10116_v7, %v10115_v4 }
 0xa2a   :  { %v13257_v62 = vpack.c.bf16 %v10114_v43, %v10113_v61  ;;  %v13204_v44 = vpop.f32.mrb[52].mxu1 }
 0xa2b   :  { %v10055_v63 = vadd.f32 %v13204_v44, %v17355_v18  ;;  %v9883_v58 = vpop.f32.mrb[53].mxu1 }
 0xa2c   :  { %v10053_v10 = vadd.f32 %v17355_v18, %v9883_v58  ;;  %v13205_v24 = vpop.f32.mrb[54].mxu1  ;;  %13258 = vmatprep.subr.bf16.mxu1 %v13257_v62 }
 0xa2d   :  { %v10056_v12 = vadd.f32 %v13205_v24, %v17355_v18  ;;  %v9886_v51 = vpop.f32.mrb[55].mxu1  ;;  %13260 = vmatpush3.bf16.msra.mxu1 %v17436_v16  ;;  %v10119_v13 = vmax.f32 %v10055_v63, 0.0 }
 0xa2e   :  { %v10054_v36 = vadd.f32 %v17355_v18, %v9886_v51  ;;  %13262 = vmatprep.subr.bf16.mxu1 %v13261_v49  ;;  %v10117_v40 = vmax.f32 %v10053_v10, 0.0 }
 0xa2f   :  { %v10120_v54 = vmax.f32 %v10056_v12, 0.0 }
 0xa30   :  { %v10118_v31 = vmax.f32 %v10054_v36, 0.0 }
 0xa31   :  { %v13269_v48 = vpack.c.bf16 %v10120_v54, %v10119_v13  ;;  %13264 = vmatpush3.bf16.msra.mxu1 %v17433_v59 }
 0xa32   :  { %v13265_v0 = vpack.c.bf16 %v10118_v31, %v10117_v40  ;;  %v13208_v26 = vpop.f32.mrb[56].mxu1 }
 0xa33   :  { %v10059_v56 = vadd.f32 %v13208_v26, %v17355_v18  ;;  %v9899_v33 = vpop.f32.mrb[57].mxu1 }
 0xa34   :  { %v10057_v45 = vadd.f32 %v17355_v18, %v9899_v33  ;;  %v13209_v6 = vpop.f32.mrb[58].mxu1  ;;  %13266 = vmatprep.subr.bf16.mxu1 %v13265_v0 }
 0xa35   :  { %v10060_v16 = vadd.f32 %v13209_v6, %v17355_v18  ;;  %v9902_v20 = vpop.f32.mrb[59].mxu1  ;;  %13268 = vmatpush3.bf16.msra.mxu1 %v17445_v19  ;;  %v10123_v37 = vmax.f32 %v10059_v56, 0.0 }
 0xa36   :  { %v10058_v27 = vadd.f32 %v17355_v18, %v9902_v20  ;;  %13270 = vmatprep.subr.bf16.mxu1 %v13269_v48  ;;  %v10121_v59 = vmax.f32 %v10057_v45, 0.0 }
 0xa37   :  { %v10124_v55 = vmax.f32 %v10060_v16, 0.0 }
 0xa38   :  { %v10122_v46 = vmax.f32 %v10058_v27, 0.0 }
 0xa39   :  { %v13277_v42 = vpack.c.bf16 %v10124_v55, %v10123_v37  ;;  %13272 = vmatpush3.bf16.msra.mxu1 %v17443_v23 }
 0xa3a   :  { %v13273_v11 = vpack.c.bf16 %v10122_v46, %v10121_v59  ;;  %v13212_v8 = vpop.f32.mrb[60].mxu1 }
 0xa3b   :  { %v10063_v5 = vadd.f32 %v13212_v8, %v17355_v18  ;;  %v9915_v47 = vpop.f32.mrb[61].mxu1 }
 0xa3c   :  { %v10061_v35 = vadd.f32 %v17355_v18, %v9915_v47  ;;  %v13213_v50 = vpop.f32.mrb[62].mxu1  ;;  %13274 = vmatprep.subr.bf16.mxu1 %v13273_v11 }
 0xa3d   :  { %v10064_v19 = vadd.f32 %v13213_v50, %v17355_v18  ;;  %v9918_v29 = vpop.f32.mrb[63].mxu1  ;;  %13276 = vmatpush3.bf16.msra.mxu1 %v17453_v17  ;;  %v10127_v2 = vmax.f32 %v10063_v5, 0.0  ;;  %v10295_v17 = vld [vmem:[%s17516_s6 + $0x18] sm:$0xff] }
 0xa3e   :  { %v10062_v60 = vadd.f32 %v17355_v18, %v9918_v29  ;;  %13278 = vmatprep.subr.bf16.mxu1 %v13277_v42  ;;  %v10125_v23 = vmax.f32 %v10061_v35, 0.0  ;;  %v10294_v18 = vld [vmem:[%s17516_s6 + $0x10] sm:$0xff]  ;;  %s10385_s6 = sshll.u32 %s14364_s0, 4  ;;  %s10386_s6 = int_to_ptr.vmem [resolvable:$true] %s10385_s6 }
 0xa3f   :  { %v10128_v15 = vmax.f32 %v10064_v19, 0.0  ;;  %v13293_v52 = vpack.c.bf16 %v10295_v17, %v10294_v18  ;;  %s14335_s2 = scalar_lea.vmem %s10386_s6, 32  ;;  %p14340_p1 = scmp.lt.s32.totalorder %s10386_s6, %s10386_s6 }
 0xa40   :  { %v10126_v39 = vmax.f32 %v10062_v60, 0.0  ;;  %p14336_p0 = scmp.ne.s32.totalorder %s10386_s6, %s14335_s2  ;;  %p14341_p2 = scmp.lt.s32.totalorder %s14335_s2, %s14335_s2 }
 0xa41   :  { %v13285_v34 = vpack.c.bf16 %v10128_v15, %v10127_v2  ;;  %13280 = vmatpush3.bf16.msra.mxu1 %v17451_v38  ;;  %v17556_v38 = vmov 0.0   ;;  %13294 = vmatpush3.bf16.msra.mxu0 %v13293_v52 }
 0xa42   :  { %v13281_v21 = vpack.c.bf16 %v10126_v39, %v10125_v23  ;;  %13222 = vmatprep.mubr.msk.f32.mxu0 %vm14363_vm6, %v17556_v38  ;;  %p14342_p3 = por %p14341_p2, %p14340_p1 }
 0xa44   :  { %13282 = vmatprep.subr.bf16.mxu1 %v13281_v21  ;;  %p14343_p4 = pnand %p14342_p3, %p14336_p0 }
 0xa45   :  { %13284 = vmatpush3.bf16.msra.mxu1 %v17461_v32 }
 0xa46   :  { %13286 = vmatprep.subr.bf16.mxu1 %v13285_v34 }
 0xa49   :  { %13288 = vmatpush3.bf16.msra.mxu1 %v17459_v53 }
 0xa4c   :  { %10287 = vmatmul.mubr.f32.vlgmr.msra.gmra.mrb[64].mxu1 %v17374_v9 }
 0xadf   :  { %v11983_v14 = vpop.f32.mrb[64].mxu0 }
 0xae0   :  { %v11984_v32 = vpop.f32.mrb[65].mxu0 }
 0xae1   :  { %v11985_v28 = vadd.f32 %v11984_v32, %v11983_v14 }
 0xb1f   :  { %v12018_v22 = vpop.f32.mrb[64].mxu1 }
 0xb20   :  { %v12019_v53 = vpop.f32.mrb[65].mxu1 }
 0xb21   :  { %v12020_v41 = vadd.f32 %v12019_v53, %v12018_v22 }
 0xb23   :  { %v10289_v9 = vadd.f32 %v12020_v41, %v11985_v28 }
 0xb25   :  { %13223 = vmatmul.mubr.msk.f32.vlgmr.msra.gmra.mrb[66].mxu0 %vm10303_vm7, %v10289_v9 }
 0xbf8   :  { %v10373_v30 = vpop.f32.mrb[66].mxu0 }
 0xbf9   :  { %v10374_v1 = vadd.f32 %v11355_v57, %v10373_v30  ;;  %v13224_v25 = vpop.f32.mrb[67].mxu0 }
 0xbfb   :  { %10378 = vst.msk [vmem:[#allocation3] sm:$0x3] %vm10377_vm8, %v10374_v1 }
 0xbfc   :  { %14346 = shalt.err (!%p14343_p4)
}
 0xbfd   :  { %s14347_s30 = scalar_lea.hbm %s17518_s8, 32 }
 0xbfe   :  { %p14348_p5 = scmp.ne.s32.totalorder %s17518_s8, %s14347_s30  ;;  %p14351_p6 = scmp.lt.u32.totalorder %s14347_s30, %s17518_s8 }
 0xc00   :  { %p14353_p7 = pnand %p14351_p6, %p14348_p5 }
 0xc02   :  { %14356 = shalt.err (!%p14353_p7)
}
 0xc03   :  { %10388 = dma.vmem_to_hbm [thread:$0]  %s10386_s6, 32, %s17518_s8, [#allocation4]  }
 0xc04   :  { %14357 = dma.done.wait [#allocation4], 32  }
 0xc05   :  { %14358 = vsyncadd [#allocation4], 4294967264 }
 0xc06   :  { %10392 = vsyncpa [#allocation4], 1 }

</bundles_post_ra>
